<compile_context>
chip_gen: v7x
topology: tpu7x:2x2x1
jax: 0.10.0
libtpu: 0.0.40
codegen_flags: <defaults>
</compile_context>

<pallas_src>
import functools
import math

import jax
import jax.numpy as jnp
from jax.experimental import pallas as pl
from jax.experimental.pallas import tpu as pltpu

LN_EPS = 1e-5           # torch.nn.LayerNorm default
USE_TANH_GELU = False   # flip to move GELU from VPU erf-polynomial to EUP tanh

_WEIGHT_NAMES = (
    # cross-attention (heads=1, head_dim=latent_dim), one slab per distinct xattn layer
    "xa_ln_w", "xa_ln_b", "xa_wq", "xa_wk", "xa_wv", "xa_wo",
    # feed-forward following each cross-attention (shared with its xattn)
    "xf_ln_w", "xf_ln_b", "xf_w1a", "xf_w1g", "xf_b1a", "xf_b1g", "xf_w2", "xf_b2",
    # transformer MHSA blocks, one slab per distinct (layer, block)
    "tm_ln_w", "tm_ln_b", "tm_wq", "tm_wk", "tm_wv", "tm_wo",
    # feed-forward following each MHSA block
    "tf_ln_w", "tf_ln_b", "tf_w1a", "tf_w1g", "tf_b1a", "tf_b1g", "tf_w2", "tf_b2",
)


# ----------------------------- in-kernel helpers -----------------------------

def _layernorm(x, w, b):
    mu = jnp.mean(x, axis=-1, keepdims=True)
    var = jnp.mean((x - mu) ** 2, axis=-1, keepdims=True)
    return (x - mu) * jax.lax.rsqrt(var + LN_EPS) * w + b


def _gelu(x):
    if USE_TANH_GELU:
        c = math.sqrt(2.0 / math.pi)
        return 0.5 * x * (1.0 + jnp.tanh(c * (x + 0.044715 * x * x * x)))
    return 0.5 * x * (1.0 + jax.lax.erf(x / math.sqrt(2.0)))   # exact torch GELU


def _softmax_last(s):
    m = jnp.max(s, axis=-1, keepdims=True)
    p = jnp.exp(s - m)
    return p * pl.reciprocal(jnp.sum(p, axis=-1, keepdims=True), approx=True)


# ------------------------------ the fused kernel ------------------------------

def _perceiver_layer_kernel(xa_idx_ref, tf_idx_ref,       # scalar-prefetch (SMEM)
                            c_ref, m_ref, lat_ref, *refs,
                            heads, share_x):
    nw = len(_WEIGHT_NAMES)
    w = dict(zip(_WEIGHT_NAMES, refs[:nw]))
    x_out_ref, cls_ref = refs[nw], refs[nw + 1]
    x_sc, attn_sc, k_sc, v_sc = refs[nw + 2:]

    i = pl.program_id(1)                                   # perceiver layer
    t = pl.program_id(2)                                   # transformer block
    is_last = jnp.logical_and(i == pl.num_programs(1) - 1,
                              t == pl.num_programs(2) - 1)

    bb, N, C = c_ref.shape
    L, D = lat_ref.shape
    S = bb * L
    hd = D // heads
    xa_scale = 1.0 / math.sqrt(D)                          # heads=1, head_dim=D
    sa_scale = 1.0 / math.sqrt(hd)

    def W(name):                                           # current (1, ...) slab
        return w[name][0]

    def geglu_ff(x2, pfx):
        xn = _layernorm(x2, W(pfx + "ln_w"), W(pfx + "ln_b"))
        xb = xn.astype(jnp.bfloat16)
        a = jnp.dot(xb, W(pfx + "w1a"),
                    preferred_element_type=jnp.float32) + W(pfx + "b1a")
        g = jnp.dot(xb, W(pfx + "w1g"),
                    preferred_element_type=jnp.float32) + W(pfx + "b1g")
        h = a * _gelu(g)
        return jnp.dot(h.astype(jnp.bfloat16), W(pfx + "w2"),
                       preferred_element_type=jnp.float32) + W(pfx + "b2")

    # ---- init resident latents accumulator (once per batch block) ------------
    @pl.when(jnp.logical_and(i == 0, t == 0))
    def _init():
        lat = lat_ref[...].astype(jnp.float32)
        for bidx in range(bb):
            x_sc[bidx * L:(bidx + 1) * L, :] = lat

    # ---- cross attention + its feed-forward (once per perceiver layer) -------
    @pl.when(t == 0)
    def _xattn():
        # kvt reuse: context k/v recomputed only while i <= share_xattn_start_layer
        @pl.when(i <= share_x)
        def _kv():
            c2 = c_ref[...].reshape(bb * N, C).astype(jnp.bfloat16)
            k_sc[...] = jnp.dot(c2, W("xa_wk"), preferred_element_type=jnp.float32
                                ).reshape(bb, N, D).astype(jnp.bfloat16)
            v_sc[...] = jnp.dot(c2, W("xa_wv"), preferred_element_type=jnp.float32
                                ).reshape(bb, N, D).astype(jnp.bfloat16)

        x2 = x_sc[...]
        xn = _layernorm(x2, W("xa_ln_w"), W("xa_ln_b"))
        q = jnp.dot(xn.astype(jnp.bfloat16), W("xa_wq"),
                    preferred_element_type=jnp.float32)
        s = jnp.einsum("bld,bnd->bln",
                       q.reshape(bb, L, D).astype(jnp.bfloat16), k_sc[...],
                       preferred_element_type=jnp.float32) * xa_scale
        keep = m_ref[...] > 0.0                            # (bb, 1, N), True = attend
        s = jnp.where(keep, s, jnp.float32(-1e30))
        p = _softmax_last(s)
        a = jnp.einsum("bln,bnd->bld", p.astype(jnp.bfloat16), v_sc[...],
                       preferred_element_type=jnp.float32).reshape(S, D)
        x2 = x2 + jnp.dot(a.astype(jnp.bfloat16), W("xa_wo"),
                          preferred_element_type=jnp.float32)
        x2 = x2 + geglu_ff(x2, "xf_")
        x_sc[...] = x2

    # ---- one MHSA + FF transformer block (every grid step) -------------------
    x2 = x_sc[...]
    xn = _layernorm(x2, W("tm_ln_w"), W("tm_ln_b")).astype(jnp.bfloat16)
    q2 = jnp.dot(xn, W("tm_wq"), preferred_element_type=jnp.float32)
    k2 = jnp.dot(xn, W("tm_wk"), preferred_element_type=jnp.float32)
    v2 = jnp.dot(xn, W("tm_wv"), preferred_element_type=jnp.float32)
    for h in range(heads):                                 # static unroll over heads
        sl = slice(h * hd, (h + 1) * hd)                   # static lane slices
        qh = q2[:, sl].reshape(bb, L, hd).astype(jnp.bfloat16)
        kh = k2[:, sl].reshape(bb, L, hd).astype(jnp.bfloat16)
        vh = v2[:, sl].reshape(bb, L, hd).astype(jnp.bfloat16)
        sh = jnp.einsum("bqd,bkd->bqk", qh, kh,
                        preferred_element_type=jnp.float32) * sa_scale
        ph = _softmax_last(sh)
        ah = jnp.einsum("bqk,bkd->bqd", ph.astype(jnp.bfloat16), vh,
                        preferred_element_type=jnp.float32)
        attn_sc[:, sl] = ah.reshape(S, hd)                 # head concat via lane-slice store
    x2 = x2 + jnp.dot(attn_sc[...].astype(jnp.bfloat16), W("tm_wo"),
                      preferred_element_type=jnp.float32)  # single K=D out projection
    x2 = x2 + geglu_ff(x2, "tf_")
    x_sc[...] = x2

    # ---- finalize: write latents + fused mean pooling -------------------------
    @pl.when(is_last)
    def _finalize():
        x3 = x_sc[...].reshape(bb, L, D)
        x_out_ref[...] = x3.astype(x_out_ref.dtype)
        cls_ref[...] = jnp.mean(x3, axis=1, keepdims=True).astype(cls_ref.dtype)


# ----------------------------- pallas_call wrapper -----------------------------

def _pick_batch_block(B, L, target_rows=256):
    """Largest divisor of B with bb*L <= target_rows and >=2 batch-grid steps."""
    best = 1
    for cand in range(1, B + 1):
        if B % cand != 0 or cand * L > target_rows:
            continue
        if B > 1 and B // cand < 2:      # keep both v7x TensorCores busy
            continue
        best = cand
    return best


def _layer_spec(arr, which, tdepth):
    """BlockSpec streaming one leading-index slab, chosen via the SMEM tables."""
    nd = arr.ndim - 1
    blk = (1,) + tuple(arr.shape[1:])
    if which == "xa":
        idx = lambda b, i, t, xa, tf, _nd=nd: (xa[i],) + (0,) * _nd
    else:
        idx = lambda b, i, t, xa, tf, _nd=nd, _td=tdepth: \
            (tf[i] * _td + t,) + (0,) * _nd
    return pl.BlockSpec(blk, idx)


def _cost_estimate(params, B, N, C, L, D, heads, depth, tdepth, n_x):
    gemm = (depth * 2 * L * D * D              # xattn q / out proj
            + n_x * 2 * N * C * D              # distinct context k/v projections
            + depth * 2 * L * N * D            # xattn scores + AV
            + depth * 3 * L * D * D            # xattn GEGLU FF
            + depth * tdepth * 4 * L * D * D   # MHSA q,k,v,out proj
            + depth * tdepth * 2 * L * L * D   # MHSA scores + AV
            + depth * tdepth * 3 * L * D * D)  # MHSA GEGLU FF
    flops = 2 * B * gemm
    transcendentals = B * depth * (L * N + tdepth * heads * L * L
                                   + (1 + tdepth) * L * D)
    weight_bytes = sum(math.prod(params[n].shape) * jnp.dtype(params[n].dtype).itemsize
                       for n in _WEIGHT_NAMES)
    bytes_accessed = weight_bytes + (B * N * C + B * N + L * D
                                     + B * L * D + B * D) * 4
    return pl.CostEstimate(flops=flops, transcendentals=transcendentals,
                           bytes_accessed=bytes_accessed)


def _vmem_limit_bytes(params, bb, N, C, L, D):
    per_step_w = 0
    for name in _WEIGHT_NAMES:                 # one xattn slab + one MHSA-block slab
        a = params[name]
        per_step_w += math.prod(a.shape[1:]) * jnp.dtype(a.dtype).itemsize
    per_step_w *= 2                            # double-buffered weight streaming
    acts = (2 * bb * L * D * 4                 # x / attn scratch (f32)
            + 2 * bb * N * D * 2               # persistent k/v scratch (bf16)
            + 2 * (bb * N * C + bb * N) * 4    # context + mask blocks (dbl-buf)
            + 2 * L * D * 4                    # latents block
            + 2 * (bb * L * D + bb * D) * 4)   # outputs (dbl-buf)
    est = per_step_w + acts
    # clamp to [32 MiB, 64 MiB]: >= scoped defaults everywhere, <= v7x physical
    return int(min(64 * 2 ** 20, max(32 * 2 ** 20, 2 * est)))


def perceiver_forward(params, images, image_pad_mask, *, cfg, batch_block=None):
    """Fused Perceiver forward (repeated-xattn path). Returns (x.mean(1), x)."""
    B, N, C = images.shape
    L, D = params["latents"].shape
    depth = cfg["perceiver_depth"]
    tdepth = cfg["transformer_depth"]
    heads = cfg["mhsa_heads"]
    share_x = cfg["share_xattn_start_layer"]
    share_t = cfg["share_tf_start_layer"]
    assert depth >= 1 and tdepth >= 1 and D % heads == 0

    bb = batch_block if batch_block is not None else _pick_batch_block(B, L)
    assert B % bb == 0
    n_x = min(share_x, depth - 1) + 1

    mask3 = image_pad_mask.astype(jnp.float32).reshape(B, 1, N)

    # SMEM layer -> weight-slab index tables (reproduce min(i, share_*) sharing).
    xa_idx = jnp.asarray([min(i, share_x) for i in range(depth)], jnp.int32)
    tf_idx = jnp.asarray([min(i, share_t) for i in range(depth)], jnp.int32)

    weights = [params[name] for name in _WEIGHT_NAMES]

    def _batch_map(nd):
        return lambda b, i, t, xa, tf, _nd=nd: (b,) + (0,) * (_nd - 1)

    in_specs = [
        pl.BlockSpec((bb, N, C), _batch_map(3)),                      # context
        pl.BlockSpec((bb, 1, N), _batch_map(3)),                      # pad mask
        pl.BlockSpec((L, D), lambda b, i, t, xa, tf: (0, 0)),         # latents
    ]
    for name in _WEIGHT_NAMES:
        which = "xa" if name.startswith(("xa_", "xf_")) else "tf"
        in_specs.append(_layer_spec(params[name], which, tdepth))

    out_specs = (pl.BlockSpec((bb, L, D), _batch_map(3)),
                 pl.BlockSpec((bb, 1, D), _batch_map(3)))

    kernel = functools.partial(_perceiver_layer_kernel,
                               heads=heads, share_x=share_x)

    x_out, cls3 = pl.pallas_call(
        kernel,
        out_shape=(jax.ShapeDtypeStruct((B, L, D), jnp.float32),
                   jax.ShapeDtypeStruct((B, 1, D), jnp.float32)),
        grid_spec=pltpu.PrefetchScalarGridSpec(
            num_scalar_prefetch=2,
            grid=(B // bb, depth, tdepth),
            in_specs=in_specs,
            out_specs=out_specs,
            scratch_shapes=[
                pltpu.VMEM((bb * L, D), jnp.float32),    # resident x accumulator
                pltpu.VMEM((bb * L, D), jnp.float32),    # per-head attn assembly
                pltpu.VMEM((bb, N, D), jnp.bfloat16),    # cross-attn k (kvt reuse)
                pltpu.VMEM((bb, N, D), jnp.bfloat16),    # cross-attn v (kvt reuse)
            ]),
        compiler_params=pltpu.CompilerParams(
            dimension_semantics=("parallel", "arbitrary", "arbitrary"),
            vmem_limit_bytes=_vmem_limit_bytes(params, bb, N, C, L, D)),
        cost_estimate=_cost_estimate(params, B, N, C, L, D, heads,
                                     depth, tdepth, n_x),
    )(xa_idx, tf_idx, images, mask3, params["latents"], *weights)

    return cls3[:, 0, :], x_out


# ------------------------------ parameter setup --------------------------------

def init_params(key, *, latent_seq, latent_dim, context_dim, mhsa_heads,
                perceiver_depth, transformer_depth,
                share_xattn_start_layer, share_tf_start_layer,
                weight_dtype=jnp.bfloat16):
    assert latent_dim % mhsa_heads == 0
    D, C = latent_dim, context_dim
    n_x = min(share_xattn_start_layer, perceiver_depth - 1) + 1
    n_t = (min(share_tf_start_layer, perceiver_depth - 1) + 1) * transformer_depth
    keys = iter(jax.random.split(key, 64))

    def lin(*shape):  # linear weights pre-transposed to (in, out); bf16 MXU operands
        return (jax.random.normal(next(keys), shape, jnp.float32) * 0.02
                ).astype(weight_dtype)

    p = {"latents": jax.random.normal(next(keys), (latent_seq, D), jnp.float32)}

    # cross-attention stacks (one leading index per distinct xattn layer)
    p["xa_ln_w"] = jnp.ones((n_x, 1, D), jnp.float32)
    p["xa_ln_b"] = jnp.zeros((n_x, 1, D), jnp.float32)
    p["xa_wq"] = lin(n_x, D, D)
    p["xa_wk"] = lin(n_x, C, D)
    p["xa_wv"] = lin(n_x, C, D)
    p["xa_wo"] = lin(n_x, D, D)

    # GEGLU feed-forwards (xf_ follows xattn, tf_ follows each MHSA block)
    for pfx, n in (("xf_", n_x), ("tf_", n_t)):
        p[pfx + "ln_w"] = jnp.ones((n, 1, D), jnp.float32)
        p[pfx + "ln_b"] = jnp.zeros((n, 1, D), jnp.float32)
        p[pfx + "w1a"] = lin(n, D, D)
        p[pfx + "w1g"] = lin(n, D, D)
        p[pfx + "b1a"] = jnp.zeros((n, 1, D), jnp.float32)
        p[pfx + "b1g"] = jnp.zeros((n, 1, D), jnp.float32)
        p[pfx + "w2"] = lin(n, D, D)
        p[pfx + "b2"] = jnp.zeros((n, 1, D), jnp.float32)

    # transformer MHSA: full lane-dense (D, D) projections (no per-head split)
    p["tm_ln_w"] = jnp.ones((n_t, 1, D), jnp.float32)
    p["tm_ln_b"] = jnp.zeros((n_t, 1, D), jnp.float32)
    p["tm_wq"] = lin(n_t, D, D)
    p["tm_wk"] = lin(n_t, D, D)
    p["tm_wv"] = lin(n_t, D, D)
    p["tm_wo"] = lin(n_t, D, D)
    return p


# ------------------------------------ main --------------------------------------

if __name__ == "__main__":
    cfg = dict(latent_seq=8, latent_dim=32, context_dim=64, mhsa_heads=4,
               perceiver_depth=2, transformer_depth=2,
               share_xattn_start_layer=1, share_tf_start_layer=0)

    key = jax.random.PRNGKey(0)
    pkey, ikey = jax.random.split(key)
    params = init_params(pkey, **cfg)

    B, N = 2, 16
    images = jax.random.normal(ikey, (B, N, cfg["context_dim"]), jnp.float32)
    image_pad_mask = jnp.ones((B, N), dtype=bool).at[1, 12:].set(False)

    # Host-side input validation kept out of the jitted forward path.
    assert bool(jnp.any(image_pad_mask, axis=-1).all()), \
        "image_pad_mask contains empty sequences in some batch items"

    fwd = jax.jit(functools.partial(perceiver_forward, cfg=cfg))
    cls_emb, img_emb = fwd(params, images, image_pad_mask)
    jax.block_until_ready((cls_emb, img_emb))

    assert cls_emb.shape == (B, cfg["latent_dim"])
    assert img_emb.shape == (B, cfg["latent_seq"], cfg["latent_dim"])
    assert bool(jnp.all(jnp.isfinite(cls_emb))) and bool(jnp.all(jnp.isfinite(img_emb)))
    print("KERNEL_OK")
</pallas_src>

<mosaic_0001>
module attributes {stable_mosaic.version = 11 : i64} {
  func.func @_perceiver_layer_kernel(%arg0: i32, %arg1: i32, %arg2: i32, %arg3: memref<2xi32, #tpu.memory_space<smem>>, %arg4: memref<2xi32, #tpu.memory_space<smem>>, %arg5: memref<1x16x64xf32, #tpu.memory_space<vmem>>, %arg6: memref<1x1x16xf32, #tpu.memory_space<vmem>>, %arg7: memref<8x32xf32, #tpu.memory_space<vmem>>, %arg8: memref<1x1x32xf32, #tpu.memory_space<vmem>>, %arg9: memref<1x1x32xf32, #tpu.memory_space<vmem>>, %arg10: memref<1x32x32xbf16, #tpu.memory_space<vmem>>, %arg11: memref<1x64x32xbf16, #tpu.memory_space<vmem>>, %arg12: memref<1x64x32xbf16, #tpu.memory_space<vmem>>, %arg13: memref<1x32x32xbf16, #tpu.memory_space<vmem>>, %arg14: memref<1x1x32xf32, #tpu.memory_space<vmem>>, %arg15: memref<1x1x32xf32, #tpu.memory_space<vmem>>, %arg16: memref<1x32x32xbf16, #tpu.memory_space<vmem>>, %arg17: memref<1x32x32xbf16, #tpu.memory_space<vmem>>, %arg18: memref<1x1x32xf32, #tpu.memory_space<vmem>>, %arg19: memref<1x1x32xf32, #tpu.memory_space<vmem>>, %arg20: memref<1x32x32xbf16, #tpu.memory_space<vmem>>, %arg21: memref<1x1x32xf32, #tpu.memory_space<vmem>>, %arg22: memref<1x1x32xf32, #tpu.memory_space<vmem>>, %arg23: memref<1x1x32xf32, #tpu.memory_space<vmem>>, %arg24: memref<1x32x32xbf16, #tpu.memory_space<vmem>>, %arg25: memref<1x32x32xbf16, #tpu.memory_space<vmem>>, %arg26: memref<1x32x32xbf16, #tpu.memory_space<vmem>>, %arg27: memref<1x32x32xbf16, #tpu.memory_space<vmem>>, %arg28: memref<1x1x32xf32, #tpu.memory_space<vmem>>, %arg29: memref<1x1x32xf32, #tpu.memory_space<vmem>>, %arg30: memref<1x32x32xbf16, #tpu.memory_space<vmem>>, %arg31: memref<1x32x32xbf16, #tpu.memory_space<vmem>>, %arg32: memref<1x1x32xf32, #tpu.memory_space<vmem>>, %arg33: memref<1x1x32xf32, #tpu.memory_space<vmem>>, %arg34: memref<1x32x32xbf16, #tpu.memory_space<vmem>>, %arg35: memref<1x1x32xf32, #tpu.memory_space<vmem>>, %arg36: memref<1x8x32xf32, #tpu.memory_space<vmem>>, %arg37: memref<1x1x32xf32, #tpu.memory_space<vmem>>, %arg38: memref<8x32xf32, #tpu.memory_space<vmem>>, %arg39: memref<8x32xf32, #tpu.memory_space<vmem>>, %arg40: memref<1x16x32xbf16, #tpu.memory_space<vmem>>, %arg41: memref<1x16x32xbf16, #tpu.memory_space<vmem>>) attributes {dimension_semantics = [#tpu.dimension_semantics<parallel>, #tpu.dimension_semantics<arbitrary>, #tpu.dimension_semantics<arbitrary>], iteration_bounds = array<i64: 2, 2, 2>, scalar_prefetch = 2 : i64, scratch_operands = 4 : i64, tpu.core_type = #tpu.core_type<tc>, window_params = [{transform_indices = @transform_0, window_bounds = array<i64: 1, 16, 64>}, {transform_indices = @transform_1, window_bounds = array<i64: 1, 1, 16>}, {pipeline_mode = #tpu.pipeline_mode<synchronous>, transform_indices = @transform_2, window_bounds = array<i64: 8, 32>}, {transform_indices = @transform_3, window_bounds = array<i64: 1, 1, 32>}, {transform_indices = @transform_4, window_bounds = array<i64: 1, 1, 32>}, {transform_indices = @transform_5, window_bounds = array<i64: 1, 32, 32>}, {transform_indices = @transform_6, window_bounds = array<i64: 1, 64, 32>}, {transform_indices = @transform_7, window_bounds = array<i64: 1, 64, 32>}, {transform_indices = @transform_8, window_bounds = array<i64: 1, 32, 32>}, {transform_indices = @transform_9, window_bounds = array<i64: 1, 1, 32>}, {transform_indices = @transform_10, window_bounds = array<i64: 1, 1, 32>}, {transform_indices = @transform_11, window_bounds = array<i64: 1, 32, 32>}, {transform_indices = @transform_12, window_bounds = array<i64: 1, 32, 32>}, {transform_indices = @transform_13, window_bounds = array<i64: 1, 1, 32>}, {transform_indices = @transform_14, window_bounds = array<i64: 1, 1, 32>}, {transform_indices = @transform_15, window_bounds = array<i64: 1, 32, 32>}, {transform_indices = @transform_16, window_bounds = array<i64: 1, 1, 32>}, {transform_indices = @transform_17, window_bounds = array<i64: 1, 1, 32>}, {transform_indices = @transform_18, window_bounds = array<i64: 1, 1, 32>}, {transform_indices = @transform_19, window_bounds = array<i64: 1, 32, 32>}, {transform_indices = @transform_20, window_bounds = array<i64: 1, 32, 32>}, {transform_indices = @transform_21, window_bounds = array<i64: 1, 32, 32>}, {transform_indices = @transform_22, window_bounds = array<i64: 1, 32, 32>}, {transform_indices = @transform_23, window_bounds = array<i64: 1, 1, 32>}, {transform_indices = @transform_24, window_bounds = array<i64: 1, 1, 32>}, {transform_indices = @transform_25, window_bounds = array<i64: 1, 32, 32>}, {transform_indices = @transform_26, window_bounds = array<i64: 1, 32, 32>}, {transform_indices = @transform_27, window_bounds = array<i64: 1, 1, 32>}, {transform_indices = @transform_28, window_bounds = array<i64: 1, 1, 32>}, {transform_indices = @transform_29, window_bounds = array<i64: 1, 32, 32>}, {transform_indices = @transform_30, window_bounds = array<i64: 1, 1, 32>}, {transform_indices = @transform_31, window_bounds = array<i64: 1, 8, 32>}, {transform_indices = @transform_32, window_bounds = array<i64: 1, 1, 32>}]} {
    %c1_i32 = arith.constant 1 : i32
    %0 = arith.cmpi eq, %arg1, %c1_i32 : i32
    %c1_i32_0 = arith.constant 1 : i32
    %1 = arith.cmpi eq, %arg2, %c1_i32_0 : i32
    %2 = arith.andi %0, %1 : i1
    %c0_i32 = arith.constant 0 : i32
    %3 = arith.cmpi eq, %arg1, %c0_i32 : i32
    %c0_i32_1 = arith.constant 0 : i32
    %4 = arith.cmpi eq, %arg2, %c0_i32_1 : i32
    %5 = arith.andi %3, %4 : i1
    %6 = arith.extui %5 : i1 to i32
    %c0_i32_2 = arith.constant 0 : i32
    %7 = arith.cmpi ne, %6, %c0_i32_2 : i32
    scf.if %7 {
      %c0_97 = arith.constant 0 : index
      %c0_98 = arith.constant 0 : index
      %220 = vector.load %arg7[%c0_97, %c0_98] : memref<8x32xf32, #tpu.memory_space<vmem>>, vector<8x32xf32>
      %c0_99 = arith.constant 0 : index
      %c0_100 = arith.constant 0 : index
      %221 = vector.load %arg38[%c0_99, %c0_100] : memref<8x32xf32, #tpu.memory_space<vmem>>, vector<8x32xf32>
      tpu.vector_store %arg38[%c0_99, %c0_100], %220 {strides = array<i32>} : memref<8x32xf32, #tpu.memory_space<vmem>>, vector<8x32xf32>,
    } else {
    }
    %c0_i32_3 = arith.constant 0 : i32
    %8 = arith.cmpi eq, %arg2, %c0_i32_3 : i32
    %9 = arith.extui %8 : i1 to i32
    %c0_i32_4 = arith.constant 0 : i32
    %10 = arith.cmpi ne, %9, %c0_i32_4 : i32
    scf.if %10 {
      %c1_i32_97 = arith.constant 1 : i32
      %220 = arith.cmpi sle, %arg1, %c1_i32_97 : i32
      %221 = arith.extui %220 : i1 to i32
      %c0_i32_98 = arith.constant 0 : i32
      %222 = arith.cmpi ne, %221, %c0_i32_98 : i32
      scf.if %222 {
        %c0_173 = arith.constant 0 : index
        %c0_174 = arith.constant 0 : index
        %c0_175 = arith.constant 0 : index
        %346 = vector.load %arg5[%c0_173, %c0_174, %c0_175] : memref<1x16x64xf32, #tpu.memory_space<vmem>>, vector<1x16x64xf32>
        %347 = vector.shape_cast %346 : vector<1x16x64xf32> to vector<16x64xf32>
        %348 = arith.truncf %347 : vector<16x64xf32> to vector<16x64xbf16>
        %c0_176 = arith.constant 0 : index
        %c0_177 = arith.constant 0 : index
        %c0_178 = arith.constant 0 : index
        %349 = vector.load %arg11[%c0_176, %c0_177, %c0_178] : memref<1x64x32xbf16, #tpu.memory_space<vmem>>, vector<1x64x32xbf16>
        %350 = vector.shape_cast %349 : vector<1x64x32xbf16> to vector<64x32xbf16>
        %cst_179 = arith.constant dense<0.000000e+00> : vector<16x32xf32>
        %351 = tpu.matmul %348, %350, %cst_179 {dimension_numbers = #tpu.dot_dimension_numbers<[1], [0], [0], [1], [0, 0, 1, 1], [], []>} : vector<16x64xbf16>, vector<64x32xbf16>, vector<16x32xf32> -> vector<16x32xf32>
        %352 = vector.shape_cast %351 : vector<16x32xf32> to vector<1x16x32xf32>
        %353 = arith.truncf %352 : vector<1x16x32xf32> to vector<1x16x32xbf16>
        %c0_180 = arith.constant 0 : index
        %c0_181 = arith.constant 0 : index
        %c0_182 = arith.constant 0 : index
        %354 = vector.load %arg40[%c0_180, %c0_181, %c0_182] : memref<1x16x32xbf16, #tpu.memory_space<vmem>>, vector<1x16x32xbf16>
        tpu.vector_store %arg40[%c0_180, %c0_181, %c0_182], %353 {strides = array<i32>} : memref<1x16x32xbf16, #tpu.memory_space<vmem>>, vector<1x16x32xbf16>,
        %c0_183 = arith.constant 0 : index
        %c0_184 = arith.constant 0 : index
        %c0_185 = arith.constant 0 : index
        %355 = vector.load %arg12[%c0_183, %c0_184, %c0_185] : memref<1x64x32xbf16, #tpu.memory_space<vmem>>, vector<1x64x32xbf16>
        %356 = vector.shape_cast %355 : vector<1x64x32xbf16> to vector<64x32xbf16>
        %cst_186 = arith.constant dense<0.000000e+00> : vector<16x32xf32>
        %357 = tpu.matmul %348, %356, %cst_186 {dimension_numbers = #tpu.dot_dimension_numbers<[1], [0], [0], [1], [0, 0, 1, 1], [], []>} : vector<16x64xbf16>, vector<64x32xbf16>, vector<16x32xf32> -> vector<16x32xf32>
        %358 = vector.shape_cast %357 : vector<16x32xf32> to vector<1x16x32xf32>
        %359 = arith.truncf %358 : vector<1x16x32xf32> to vector<1x16x32xbf16>
        %c0_187 = arith.constant 0 : index
        %c0_188 = arith.constant 0 : index
        %c0_189 = arith.constant 0 : index
        %360 = vector.load %arg41[%c0_187, %c0_188, %c0_189] : memref<1x16x32xbf16, #tpu.memory_space<vmem>>, vector<1x16x32xbf16>
        tpu.vector_store %arg41[%c0_187, %c0_188, %c0_189], %359 {strides = array<i32>} : memref<1x16x32xbf16, #tpu.memory_space<vmem>>, vector<1x16x32xbf16>,
      } else {
      }
      %c0_99 = arith.constant 0 : index
      %c0_100 = arith.constant 0 : index
      %223 = vector.load %arg38[%c0_99, %c0_100] : memref<8x32xf32, #tpu.memory_space<vmem>>, vector<8x32xf32>
      %c0_101 = arith.constant 0 : index
      %c0_102 = arith.constant 0 : index
      %c0_103 = arith.constant 0 : index
      %224 = vector.load %arg8[%c0_101, %c0_102, %c0_103] : memref<1x1x32xf32, #tpu.memory_space<vmem>>, vector<1x1x32xf32>
      %225 = vector.shape_cast %224 : vector<1x1x32xf32> to vector<1x32xf32>
      %c0_104 = arith.constant 0 : index
      %c0_105 = arith.constant 0 : index
      %c0_106 = arith.constant 0 : index
      %226 = vector.load %arg9[%c0_104, %c0_105, %c0_106] : memref<1x1x32xf32, #tpu.memory_space<vmem>>, vector<1x1x32xf32>
      %227 = vector.shape_cast %226 : vector<1x1x32xf32> to vector<1x32xf32>
      %cst_107 = arith.constant dense<0.000000e+00> : vector<8xf32>
      %228 = vector.multi_reduction <add>, %223, %cst_107 [1] : vector<8x32xf32> to vector<8xf32>
      %229 = vector.shape_cast %228 : vector<8xf32> to vector<8x1xf32>
      %cst_108 = arith.constant 3.200000e+01 : f32
      %230 = vector.broadcast %cst_108 : f32 to vector<8x1xf32>
      %231 = arith.divf %229, %230 : vector<8x1xf32>
      %232 = vector.broadcast %231 : vector<8x1xf32> to vector<8x32xf32>
      %233 = arith.subf %223, %232 : vector<8x32xf32>
      %234 = arith.mulf %233, %233 : vector<8x32xf32>
      %cst_109 = arith.constant dense<0.000000e+00> : vector<8xf32>
      %235 = vector.multi_reduction <add>, %234, %cst_109 [1] : vector<8x32xf32> to vector<8xf32>
      %236 = vector.shape_cast %235 : vector<8xf32> to vector<8x1xf32>
      %cst_110 = arith.constant 3.200000e+01 : f32
      %237 = vector.broadcast %cst_110 : f32 to vector<8x1xf32>
      %238 = arith.divf %236, %237 : vector<8x1xf32>
      %239 = vector.broadcast %231 : vector<8x1xf32> to vector<8x32xf32>
      %240 = arith.subf %223, %239 : vector<8x32xf32>
      %cst_111 = arith.constant 9.99999974E-6 : f32
      %241 = vector.broadcast %cst_111 : f32 to vector<8x1xf32>
      %242 = arith.addf %238, %241 : vector<8x1xf32>
      %243 = math.rsqrt %242 : vector<8x1xf32>
      %244 = vector.broadcast %243 : vector<8x1xf32> to vector<8x32xf32>
      %245 = arith.mulf %240, %244 : vector<8x32xf32>
      %246 = vector.broadcast %225 : vector<1x32xf32> to vector<8x32xf32>
      %247 = arith.mulf %245, %246 : vector<8x32xf32>
      %248 = vector.broadcast %227 : vector<1x32xf32> to vector<8x32xf32>
      %249 = arith.addf %247, %248 : vector<8x32xf32>
      %250 = arith.truncf %249 : vector<8x32xf32> to vector<8x32xbf16>
      %c0_112 = arith.constant 0 : index
      %c0_113 = arith.constant 0 : index
      %c0_114 = arith.constant 0 : index
      %251 = vector.load %arg10[%c0_112, %c0_113, %c0_114] : memref<1x32x32xbf16, #tpu.memory_space<vmem>>, vector<1x32x32xbf16>
      %252 = vector.shape_cast %251 : vector<1x32x32xbf16> to vector<32x32xbf16>
      %cst_115 = arith.constant dense<0.000000e+00> : vector<8x32xf32>
      %253 = tpu.matmul %250, %252, %cst_115 {dimension_numbers = #tpu.dot_dimension_numbers<[1], [0], [0], [1], [0, 0, 1, 1], [], []>} : vector<8x32xbf16>, vector<32x32xbf16>, vector<8x32xf32> -> vector<8x32xf32>
      %254 = vector.shape_cast %253 : vector<8x32xf32> to vector<1x8x32xf32>
      %255 = arith.truncf %254 : vector<1x8x32xf32> to vector<1x8x32xbf16>
      %c0_116 = arith.constant 0 : index
      %c0_117 = arith.constant 0 : index
      %c0_118 = arith.constant 0 : index
      %256 = vector.load %arg40[%c0_116, %c0_117, %c0_118] : memref<1x16x32xbf16, #tpu.memory_space<vmem>>, vector<1x16x32xbf16>
      "tpu.trace_start"() <{level = 10 : i32, message = "bld,bnd->bln"}> : () -> ()
      %cst_119 = arith.constant dense<0.000000e+00> : vector<1x8x16xf32>
      %257 = tpu.matmul %255, %256, %cst_119 {dimension_numbers = #tpu.dot_dimension_numbers<[2], [2], [1], [1], [0, 0, 0, 1, 1, 1], [0], [0]>} : vector<1x8x32xbf16>, vector<1x16x32xbf16>, vector<1x8x16xf32> -> vector<1x8x16xf32>
      "tpu.trace_stop"() : () -> ()
      %cst_120 = arith.constant 0.176776692 : f32
      %258 = vector.broadcast %cst_120 : f32 to vector<1x8x16xf32>
      %259 = arith.mulf %257, %258 : vector<1x8x16xf32>
      %c0_121 = arith.constant 0 : index
      %c0_122 = arith.constant 0 : index
      %c0_123 = arith.constant 0 : index
      %260 = vector.load %arg6[%c0_121, %c0_122, %c0_123] : memref<1x1x16xf32, #tpu.memory_space<vmem>>, vector<1x1x16xf32>
      %cst_124 = arith.constant 0.000000e+00 : f32
      %261 = vector.broadcast %cst_124 : f32 to vector<1x1x16xf32>
      %262 = arith.cmpf ogt, %260, %261 : vector<1x1x16xf32>
      %cst_125 = arith.constant -1.000000e+30 : f32
      %263 = vector.shape_cast %262 : vector<1x1x16xi1> to vector<1x1x16xi1>
      %264 = vector.broadcast %263 : vector<1x1x16xi1> to vector<1x8x16xi1>
      %265 = vector.broadcast %cst_125 : f32 to vector<1x8x16xf32>
      %266 = arith.select %264, %259, %265 : vector<1x8x16xi1>, vector<1x8x16xf32>
      %cst_126 = arith.constant dense<0xFF800000> : vector<1x8xf32>
      %267 = vector.multi_reduction <maximumf>, %266, %cst_126 [2] : vector<1x8x16xf32> to vector<1x8xf32>
      %268 = vector.shape_cast %267 : vector<1x8xf32> to vector<1x8x1xf32>
      %269 = vector.broadcast %268 : vector<1x8x1xf32> to vector<1x8x16xf32>
      %270 = arith.subf %266, %269 : vector<1x8x16xf32>
      %271 = math.exp %270 : vector<1x8x16xf32>
      %cst_127 = arith.constant dense<0.000000e+00> : vector<1x8xf32>
      %272 = vector.multi_reduction <add>, %271, %cst_127 [2] : vector<1x8x16xf32> to vector<1x8xf32>
      %273 = vector.shape_cast %272 : vector<1x8xf32> to vector<1x8x1xf32>
      %274 = tpu.reciprocal %273 {approx = true} : vector<1x8x1xf32> -> vector<1x8x1xf32>
      %275 = vector.broadcast %274 : vector<1x8x1xf32> to vector<1x8x16xf32>
      %276 = arith.mulf %271, %275 : vector<1x8x16xf32>
      %277 = arith.truncf %276 : vector<1x8x16xf32> to vector<1x8x16xbf16>
      %c0_128 = arith.constant 0 : index
      %c0_129 = arith.constant 0 : index
      %c0_130 = arith.constant 0 : index
      %278 = vector.load %arg41[%c0_128, %c0_129, %c0_130] : memref<1x16x32xbf16, #tpu.memory_space<vmem>>, vector<1x16x32xbf16>
      "tpu.trace_start"() <{level = 10 : i32, message = "bln,bnd->bld"}> : () -> ()
      %cst_131 = arith.constant dense<0.000000e+00> : vector<1x8x32xf32>
      %279 = tpu.matmul %277, %278, %cst_131 {dimension_numbers = #tpu.dot_dimension_numbers<[2], [1], [1], [2], [0, 0, 0, 1, 1, 2], [0], [0]>} : vector<1x8x16xbf16>, vector<1x16x32xbf16>, vector<1x8x32xf32> -> vector<1x8x32xf32>
      "tpu.trace_stop"() : () -> ()
      %280 = vector.shape_cast %279 : vector<1x8x32xf32> to vector<8x32xf32>
      %281 = arith.truncf %280 : vector<8x32xf32> to vector<8x32xbf16>
      %c0_132 = arith.constant 0 : index
      %c0_133 = arith.constant 0 : index
      %c0_134 = arith.constant 0 : index
      %282 = vector.load %arg13[%c0_132, %c0_133, %c0_134] : memref<1x32x32xbf16, #tpu.memory_space<vmem>>, vector<1x32x32xbf16>
      %283 = vector.shape_cast %282 : vector<1x32x32xbf16> to vector<32x32xbf16>
      %cst_135 = arith.constant dense<0.000000e+00> : vector<8x32xf32>
      %284 = tpu.matmul %281, %283, %cst_135 {dimension_numbers = #tpu.dot_dimension_numbers<[1], [0], [0], [1], [0, 0, 1, 1], [], []>} : vector<8x32xbf16>, vector<32x32xbf16>, vector<8x32xf32> -> vector<8x32xf32>
      %285 = arith.addf %223, %284 : vector<8x32xf32>
      %c0_136 = arith.constant 0 : index
      %c0_137 = arith.constant 0 : index
      %c0_138 = arith.constant 0 : index
      %286 = vector.load %arg14[%c0_136, %c0_137, %c0_138] : memref<1x1x32xf32, #tpu.memory_space<vmem>>, vector<1x1x32xf32>
      %287 = vector.shape_cast %286 : vector<1x1x32xf32> to vector<1x32xf32>
      %c0_139 = arith.constant 0 : index
      %c0_140 = arith.constant 0 : index
      %c0_141 = arith.constant 0 : index
      %288 = vector.load %arg15[%c0_139, %c0_140, %c0_141] : memref<1x1x32xf32, #tpu.memory_space<vmem>>, vector<1x1x32xf32>
      %289 = vector.shape_cast %288 : vector<1x1x32xf32> to vector<1x32xf32>
      %cst_142 = arith.constant dense<0.000000e+00> : vector<8xf32>
      %290 = vector.multi_reduction <add>, %285, %cst_142 [1] : vector<8x32xf32> to vector<8xf32>
      %291 = vector.shape_cast %290 : vector<8xf32> to vector<8x1xf32>
      %cst_143 = arith.constant 3.200000e+01 : f32
      %292 = vector.broadcast %cst_143 : f32 to vector<8x1xf32>
      %293 = arith.divf %291, %292 : vector<8x1xf32>
      %294 = vector.broadcast %293 : vector<8x1xf32> to vector<8x32xf32>
      %295 = arith.subf %285, %294 : vector<8x32xf32>
      %296 = arith.mulf %295, %295 : vector<8x32xf32>
      %cst_144 = arith.constant dense<0.000000e+00> : vector<8xf32>
      %297 = vector.multi_reduction <add>, %296, %cst_144 [1] : vector<8x32xf32> to vector<8xf32>
      %298 = vector.shape_cast %297 : vector<8xf32> to vector<8x1xf32>
      %cst_145 = arith.constant 3.200000e+01 : f32
      %299 = vector.broadcast %cst_145 : f32 to vector<8x1xf32>
      %300 = arith.divf %298, %299 : vector<8x1xf32>
      %301 = vector.broadcast %293 : vector<8x1xf32> to vector<8x32xf32>
      %302 = arith.subf %285, %301 : vector<8x32xf32>
      %cst_146 = arith.constant 9.99999974E-6 : f32
      %303 = vector.broadcast %cst_146 : f32 to vector<8x1xf32>
      %304 = arith.addf %300, %303 : vector<8x1xf32>
      %305 = math.rsqrt %304 : vector<8x1xf32>
      %306 = vector.broadcast %305 : vector<8x1xf32> to vector<8x32xf32>
      %307 = arith.mulf %302, %306 : vector<8x32xf32>
      %308 = vector.broadcast %287 : vector<1x32xf32> to vector<8x32xf32>
      %309 = arith.mulf %307, %308 : vector<8x32xf32>
      %310 = vector.broadcast %289 : vector<1x32xf32> to vector<8x32xf32>
      %311 = arith.addf %309, %310 : vector<8x32xf32>
      %312 = arith.truncf %311 : vector<8x32xf32> to vector<8x32xbf16>
      %c0_147 = arith.constant 0 : index
      %c0_148 = arith.constant 0 : index
      %c0_149 = arith.constant 0 : index
      %313 = vector.load %arg16[%c0_147, %c0_148, %c0_149] : memref<1x32x32xbf16, #tpu.memory_space<vmem>>, vector<1x32x32xbf16>
      %314 = vector.shape_cast %313 : vector<1x32x32xbf16> to vector<32x32xbf16>
      %cst_150 = arith.constant dense<0.000000e+00> : vector<8x32xf32>
      %315 = tpu.matmul %312, %314, %cst_150 {dimension_numbers = #tpu.dot_dimension_numbers<[1], [0], [0], [1], [0, 0, 1, 1], [], []>} : vector<8x32xbf16>, vector<32x32xbf16>, vector<8x32xf32> -> vector<8x32xf32>
      %c0_151 = arith.constant 0 : index
      %c0_152 = arith.constant 0 : index
      %c0_153 = arith.constant 0 : index
      %316 = vector.load %arg18[%c0_151, %c0_152, %c0_153] : memref<1x1x32xf32, #tpu.memory_space<vmem>>, vector<1x1x32xf32>
      %317 = vector.shape_cast %316 : vector<1x1x32xf32> to vector<1x32xf32>
      %318 = vector.broadcast %317 : vector<1x32xf32> to vector<8x32xf32>
      %319 = arith.addf %315, %318 : vector<8x32xf32>
      %c0_154 = arith.constant 0 : index
      %c0_155 = arith.constant 0 : index
      %c0_156 = arith.constant 0 : index
      %320 = vector.load %arg17[%c0_154, %c0_155, %c0_156] : memref<1x32x32xbf16, #tpu.memory_space<vmem>>, vector<1x32x32xbf16>
      %321 = vector.shape_cast %320 : vector<1x32x32xbf16> to vector<32x32xbf16>
      %cst_157 = arith.constant dense<0.000000e+00> : vector<8x32xf32>
      %322 = tpu.matmul %312, %321, %cst_157 {dimension_numbers = #tpu.dot_dimension_numbers<[1], [0], [0], [1], [0, 0, 1, 1], [], []>} : vector<8x32xbf16>, vector<32x32xbf16>, vector<8x32xf32> -> vector<8x32xf32>
      %c0_158 = arith.constant 0 : index
      %c0_159 = arith.constant 0 : index
      %c0_160 = arith.constant 0 : index
      %323 = vector.load %arg19[%c0_158, %c0_159, %c0_160] : memref<1x1x32xf32, #tpu.memory_space<vmem>>, vector<1x1x32xf32>
      %324 = vector.shape_cast %323 : vector<1x1x32xf32> to vector<1x32xf32>
      %325 = vector.broadcast %324 : vector<1x32xf32> to vector<8x32xf32>
      %326 = arith.addf %322, %325 : vector<8x32xf32>
      %cst_161 = arith.constant 5.000000e-01 : f32
      %327 = vector.broadcast %cst_161 : f32 to vector<8x32xf32>
      %328 = arith.mulf %327, %326 : vector<8x32xf32>
      %cst_162 = arith.constant 1.41421354 : f32
      %329 = vector.broadcast %cst_162 : f32 to vector<8x32xf32>
      %330 = arith.divf %326, %329 : vector<8x32xf32>
      %331 = math.erf %330 : vector<8x32xf32>
      %cst_163 = arith.constant 1.000000e+00 : f32
      %332 = vector.broadcast %cst_163 : f32 to vector<8x32xf32>
      %333 = arith.addf %332, %331 : vector<8x32xf32>
      %334 = arith.mulf %328, %333 : vector<8x32xf32>
      %335 = arith.mulf %319, %334 : vector<8x32xf32>
      %336 = arith.truncf %335 : vector<8x32xf32> to vector<8x32xbf16>
      %c0_164 = arith.constant 0 : index
      %c0_165 = arith.constant 0 : index
      %c0_166 = arith.constant 0 : index
      %337 = vector.load %arg20[%c0_164, %c0_165, %c0_166] : memref<1x32x32xbf16, #tpu.memory_space<vmem>>, vector<1x32x32xbf16>
      %338 = vector.shape_cast %337 : vector<1x32x32xbf16> to vector<32x32xbf16>
      %cst_167 = arith.constant dense<0.000000e+00> : vector<8x32xf32>
      %339 = tpu.matmul %336, %338, %cst_167 {dimension_numbers = #tpu.dot_dimension_numbers<[1], [0], [0], [1], [0, 0, 1, 1], [], []>} : vector<8x32xbf16>, vector<32x32xbf16>, vector<8x32xf32> -> vector<8x32xf32>
      %c0_168 = arith.constant 0 : index
      %c0_169 = arith.constant 0 : index
      %c0_170 = arith.constant 0 : index
      %340 = vector.load %arg21[%c0_168, %c0_169, %c0_170] : memref<1x1x32xf32, #tpu.memory_space<vmem>>, vector<1x1x32xf32>
      %341 = vector.shape_cast %340 : vector<1x1x32xf32> to vector<1x32xf32>
      %342 = vector.broadcast %341 : vector<1x32xf32> to vector<8x32xf32>
      %343 = arith.addf %339, %342 : vector<8x32xf32>
      %344 = arith.addf %285, %343 : vector<8x32xf32>
      %c0_171 = arith.constant 0 : index
      %c0_172 = arith.constant 0 : index
      %345 = vector.load %arg38[%c0_171, %c0_172] : memref<8x32xf32, #tpu.memory_space<vmem>>, vector<8x32xf32>
      tpu.vector_store %arg38[%c0_171, %c0_172], %344 {strides = array<i32>} : memref<8x32xf32, #tpu.memory_space<vmem>>, vector<8x32xf32>,
    } else {
    }
    %c0 = arith.constant 0 : index
    %c0_5 = arith.constant 0 : index
    %11 = vector.load %arg38[%c0, %c0_5] : memref<8x32xf32, #tpu.memory_space<vmem>>, vector<8x32xf32>
    %c0_6 = arith.constant 0 : index
    %c0_7 = arith.constant 0 : index
    %c0_8 = arith.constant 0 : index
    %12 = vector.load %arg22[%c0_6, %c0_7, %c0_8] : memref<1x1x32xf32, #tpu.memory_space<vmem>>, vector<1x1x32xf32>
    %13 = vector.shape_cast %12 : vector<1x1x32xf32> to vector<1x32xf32>
    %c0_9 = arith.constant 0 : index
    %c0_10 = arith.constant 0 : index
    %c0_11 = arith.constant 0 : index
    %14 = vector.load %arg23[%c0_9, %c0_10, %c0_11] : memref<1x1x32xf32, #tpu.memory_space<vmem>>, vector<1x1x32xf32>
    %15 = vector.shape_cast %14 : vector<1x1x32xf32> to vector<1x32xf32>
    %cst = arith.constant dense<0.000000e+00> : vector<8xf32>
    %16 = vector.multi_reduction <add>, %11, %cst [1] : vector<8x32xf32> to vector<8xf32>
    %17 = vector.shape_cast %16 : vector<8xf32> to vector<8x1xf32>
    %cst_12 = arith.constant 3.200000e+01 : f32
    %18 = vector.broadcast %cst_12 : f32 to vector<8x1xf32>
    %19 = arith.divf %17, %18 : vector<8x1xf32>
    %20 = vector.broadcast %19 : vector<8x1xf32> to vector<8x32xf32>
    %21 = arith.subf %11, %20 : vector<8x32xf32>
    %22 = arith.mulf %21, %21 : vector<8x32xf32>
    %cst_13 = arith.constant dense<0.000000e+00> : vector<8xf32>
    %23 = vector.multi_reduction <add>, %22, %cst_13 [1] : vector<8x32xf32> to vector<8xf32>
    %24 = vector.shape_cast %23 : vector<8xf32> to vector<8x1xf32>
    %cst_14 = arith.constant 3.200000e+01 : f32
    %25 = vector.broadcast %cst_14 : f32 to vector<8x1xf32>
    %26 = arith.divf %24, %25 : vector<8x1xf32>
    %27 = vector.broadcast %19 : vector<8x1xf32> to vector<8x32xf32>
    %28 = arith.subf %11, %27 : vector<8x32xf32>
    %cst_15 = arith.constant 9.99999974E-6 : f32
    %29 = vector.broadcast %cst_15 : f32 to vector<8x1xf32>
    %30 = arith.addf %26, %29 : vector<8x1xf32>
    %31 = math.rsqrt %30 : vector<8x1xf32>
    %32 = vector.broadcast %31 : vector<8x1xf32> to vector<8x32xf32>
    %33 = arith.mulf %28, %32 : vector<8x32xf32>
    %34 = vector.broadcast %13 : vector<1x32xf32> to vector<8x32xf32>
    %35 = arith.mulf %33, %34 : vector<8x32xf32>
    %36 = vector.broadcast %15 : vector<1x32xf32> to vector<8x32xf32>
    %37 = arith.addf %35, %36 : vector<8x32xf32>
    %38 = arith.truncf %37 : vector<8x32xf32> to vector<8x32xbf16>
    %c0_16 = arith.constant 0 : index
    %c0_17 = arith.constant 0 : index
    %c0_18 = arith.constant 0 : index
    %39 = vector.load %arg24[%c0_16, %c0_17, %c0_18] : memref<1x32x32xbf16, #tpu.memory_space<vmem>>, vector<1x32x32xbf16>
    %40 = vector.shape_cast %39 : vector<1x32x32xbf16> to vector<32x32xbf16>
    %cst_19 = arith.constant dense<0.000000e+00> : vector<8x32xf32>
    %41 = tpu.matmul %38, %40, %cst_19 {dimension_numbers = #tpu.dot_dimension_numbers<[1], [0], [0], [1], [0, 0, 1, 1], [], []>} : vector<8x32xbf16>, vector<32x32xbf16>, vector<8x32xf32> -> vector<8x32xf32>
    %c0_20 = arith.constant 0 : index
    %c0_21 = arith.constant 0 : index
    %c0_22 = arith.constant 0 : index
    %42 = vector.load %arg25[%c0_20, %c0_21, %c0_22] : memref<1x32x32xbf16, #tpu.memory_space<vmem>>, vector<1x32x32xbf16>
    %43 = vector.shape_cast %42 : vector<1x32x32xbf16> to vector<32x32xbf16>
    %cst_23 = arith.constant dense<0.000000e+00> : vector<8x32xf32>
    %44 = tpu.matmul %38, %43, %cst_23 {dimension_numbers = #tpu.dot_dimension_numbers<[1], [0], [0], [1], [0, 0, 1, 1], [], []>} : vector<8x32xbf16>, vector<32x32xbf16>, vector<8x32xf32> -> vector<8x32xf32>
    %c0_24 = arith.constant 0 : index
    %c0_25 = arith.constant 0 : index
    %c0_26 = arith.constant 0 : index
    %45 = vector.load %arg26[%c0_24, %c0_25, %c0_26] : memref<1x32x32xbf16, #tpu.memory_space<vmem>>, vector<1x32x32xbf16>
    %46 = vector.shape_cast %45 : vector<1x32x32xbf16> to vector<32x32xbf16>
    %cst_27 = arith.constant dense<0.000000e+00> : vector<8x32xf32>
    %47 = tpu.matmul %38, %46, %cst_27 {dimension_numbers = #tpu.dot_dimension_numbers<[1], [0], [0], [1], [0, 0, 1, 1], [], []>} : vector<8x32xbf16>, vector<32x32xbf16>, vector<8x32xf32> -> vector<8x32xf32>
    %48 = vector.extract_strided_slice %41 {offsets = [0, 0], sizes = [8, 8], strides = [1, 1]} : vector<8x32xf32> to vector<8x8xf32>
    %49 = vector.shape_cast %48 : vector<8x8xf32> to vector<1x8x8xf32>
    %50 = arith.truncf %49 : vector<1x8x8xf32> to vector<1x8x8xbf16>
    %51 = vector.extract_strided_slice %44 {offsets = [0, 0], sizes = [8, 8], strides = [1, 1]} : vector<8x32xf32> to vector<8x8xf32>
    %52 = vector.shape_cast %51 : vector<8x8xf32> to vector<1x8x8xf32>
    %53 = arith.truncf %52 : vector<1x8x8xf32> to vector<1x8x8xbf16>
    %54 = vector.extract_strided_slice %47 {offsets = [0, 0], sizes = [8, 8], strides = [1, 1]} : vector<8x32xf32> to vector<8x8xf32>
    %55 = vector.shape_cast %54 : vector<8x8xf32> to vector<1x8x8xf32>
    %56 = arith.truncf %55 : vector<1x8x8xf32> to vector<1x8x8xbf16>
    "tpu.trace_start"() <{level = 10 : i32, message = "bqd,bkd->bqk"}> : () -> ()
    %cst_28 = arith.constant dense<0.000000e+00> : vector<1x8x8xf32>
    %57 = tpu.matmul %50, %53, %cst_28 {dimension_numbers = #tpu.dot_dimension_numbers<[2], [2], [1], [1], [0, 0, 0, 1, 1, 1], [0], [0]>} : vector<1x8x8xbf16>, vector<1x8x8xbf16>, vector<1x8x8xf32> -> vector<1x8x8xf32>
    "tpu.trace_stop"() : () -> ()
    %cst_29 = arith.constant 0.353553385 : f32
    %58 = vector.broadcast %cst_29 : f32 to vector<1x8x8xf32>
    %59 = arith.mulf %57, %58 : vector<1x8x8xf32>
    %cst_30 = arith.constant dense<0xFF800000> : vector<1x8xf32>
    %60 = vector.multi_reduction <maximumf>, %59, %cst_30 [2] : vector<1x8x8xf32> to vector<1x8xf32>
    %61 = vector.shape_cast %60 : vector<1x8xf32> to vector<1x8x1xf32>
    %62 = vector.broadcast %61 : vector<1x8x1xf32> to vector<1x8x8xf32>
    %63 = arith.subf %59, %62 : vector<1x8x8xf32>
    %64 = math.exp %63 : vector<1x8x8xf32>
    %cst_31 = arith.constant dense<0.000000e+00> : vector<1x8xf32>
    %65 = vector.multi_reduction <add>, %64, %cst_31 [2] : vector<1x8x8xf32> to vector<1x8xf32>
    %66 = vector.shape_cast %65 : vector<1x8xf32> to vector<1x8x1xf32>
    %67 = tpu.reciprocal %66 {approx = true} : vector<1x8x1xf32> -> vector<1x8x1xf32>
    %68 = vector.broadcast %67 : vector<1x8x1xf32> to vector<1x8x8xf32>
    %69 = arith.mulf %64, %68 : vector<1x8x8xf32>
    %70 = arith.truncf %69 : vector<1x8x8xf32> to vector<1x8x8xbf16>
    "tpu.trace_start"() <{level = 10 : i32, message = "bqk,bkd->bqd"}> : () -> ()
    %cst_32 = arith.constant dense<0.000000e+00> : vector<1x8x8xf32>
    %71 = tpu.matmul %70, %56, %cst_32 {dimension_numbers = #tpu.dot_dimension_numbers<[2], [1], [1], [2], [0, 0, 0, 1, 1, 2], [0], [0]>} : vector<1x8x8xbf16>, vector<1x8x8xbf16>, vector<1x8x8xf32> -> vector<1x8x8xf32>
    "tpu.trace_stop"() : () -> ()
    %72 = vector.shape_cast %71 : vector<1x8x8xf32> to vector<8x8xf32>
    %c0_33 = arith.constant 0 : index
    %c0_34 = arith.constant 0 : index
    %73 = vector.load %arg39[%c0_33, %c0_34] : memref<8x32xf32, #tpu.memory_space<vmem>>, vector<8x8xf32>
    tpu.vector_store %arg39[%c0_33, %c0_34], %72 {strides = array<i32>} : memref<8x32xf32, #tpu.memory_space<vmem>>, vector<8x8xf32>,
    %74 = vector.extract_strided_slice %41 {offsets = [0, 8], sizes = [8, 8], strides = [1, 1]} : vector<8x32xf32> to vector<8x8xf32>
    %75 = vector.shape_cast %74 : vector<8x8xf32> to vector<1x8x8xf32>
    %76 = arith.truncf %75 : vector<1x8x8xf32> to vector<1x8x8xbf16>
    %77 = vector.extract_strided_slice %44 {offsets = [0, 8], sizes = [8, 8], strides = [1, 1]} : vector<8x32xf32> to vector<8x8xf32>
    %78 = vector.shape_cast %77 : vector<8x8xf32> to vector<1x8x8xf32>
    %79 = arith.truncf %78 : vector<1x8x8xf32> to vector<1x8x8xbf16>
    %80 = vector.extract_strided_slice %47 {offsets = [0, 8], sizes = [8, 8], strides = [1, 1]} : vector<8x32xf32> to vector<8x8xf32>
    %81 = vector.shape_cast %80 : vector<8x8xf32> to vector<1x8x8xf32>
    %82 = arith.truncf %81 : vector<1x8x8xf32> to vector<1x8x8xbf16>
    "tpu.trace_start"() <{level = 10 : i32, message = "bqd,bkd->bqk"}> : () -> ()
    %cst_35 = arith.constant dense<0.000000e+00> : vector<1x8x8xf32>
    %83 = tpu.matmul %76, %79, %cst_35 {dimension_numbers = #tpu.dot_dimension_numbers<[2], [2], [1], [1], [0, 0, 0, 1, 1, 1], [0], [0]>} : vector<1x8x8xbf16>, vector<1x8x8xbf16>, vector<1x8x8xf32> -> vector<1x8x8xf32>
    "tpu.trace_stop"() : () -> ()
    %cst_36 = arith.constant 0.353553385 : f32
    %84 = vector.broadcast %cst_36 : f32 to vector<1x8x8xf32>
    %85 = arith.mulf %83, %84 : vector<1x8x8xf32>
    %cst_37 = arith.constant dense<0xFF800000> : vector<1x8xf32>
    %86 = vector.multi_reduction <maximumf>, %85, %cst_37 [2] : vector<1x8x8xf32> to vector<1x8xf32>
    %87 = vector.shape_cast %86 : vector<1x8xf32> to vector<1x8x1xf32>
    %88 = vector.broadcast %87 : vector<1x8x1xf32> to vector<1x8x8xf32>
    %89 = arith.subf %85, %88 : vector<1x8x8xf32>
    %90 = math.exp %89 : vector<1x8x8xf32>
    %cst_38 = arith.constant dense<0.000000e+00> : vector<1x8xf32>
    %91 = vector.multi_reduction <add>, %90, %cst_38 [2] : vector<1x8x8xf32> to vector<1x8xf32>
    %92 = vector.shape_cast %91 : vector<1x8xf32> to vector<1x8x1xf32>
    %93 = tpu.reciprocal %92 {approx = true} : vector<1x8x1xf32> -> vector<1x8x1xf32>
    %94 = vector.broadcast %93 : vector<1x8x1xf32> to vector<1x8x8xf32>
    %95 = arith.mulf %90, %94 : vector<1x8x8xf32>
    %96 = arith.truncf %95 : vector<1x8x8xf32> to vector<1x8x8xbf16>
    "tpu.trace_start"() <{level = 10 : i32, message = "bqk,bkd->bqd"}> : () -> ()
    %cst_39 = arith.constant dense<0.000000e+00> : vector<1x8x8xf32>
    %97 = tpu.matmul %96, %82, %cst_39 {dimension_numbers = #tpu.dot_dimension_numbers<[2], [1], [1], [2], [0, 0, 0, 1, 1, 2], [0], [0]>} : vector<1x8x8xbf16>, vector<1x8x8xbf16>, vector<1x8x8xf32> -> vector<1x8x8xf32>
    "tpu.trace_stop"() : () -> ()
    %98 = vector.shape_cast %97 : vector<1x8x8xf32> to vector<8x8xf32>
    %c0_40 = arith.constant 0 : index
    %c8 = arith.constant 8 : index
    %99 = vector.load %arg39[%c0_40, %c8] : memref<8x32xf32, #tpu.memory_space<vmem>>, vector<8x8xf32>
    tpu.vector_store %arg39[%c0_40, %c8], %98 {strides = array<i32>} : memref<8x32xf32, #tpu.memory_space<vmem>>, vector<8x8xf32>,
    %100 = vector.extract_strided_slice %41 {offsets = [0, 16], sizes = [8, 8], strides = [1, 1]} : vector<8x32xf32> to vector<8x8xf32>
    %101 = vector.shape_cast %100 : vector<8x8xf32> to vector<1x8x8xf32>
    %102 = arith.truncf %101 : vector<1x8x8xf32> to vector<1x8x8xbf16>
    %103 = vector.extract_strided_slice %44 {offsets = [0, 16], sizes = [8, 8], strides = [1, 1]} : vector<8x32xf32> to vector<8x8xf32>
    %104 = vector.shape_cast %103 : vector<8x8xf32> to vector<1x8x8xf32>
    %105 = arith.truncf %104 : vector<1x8x8xf32> to vector<1x8x8xbf16>
    %106 = vector.extract_strided_slice %47 {offsets = [0, 16], sizes = [8, 8], strides = [1, 1]} : vector<8x32xf32> to vector<8x8xf32>
    %107 = vector.shape_cast %106 : vector<8x8xf32> to vector<1x8x8xf32>
    %108 = arith.truncf %107 : vector<1x8x8xf32> to vector<1x8x8xbf16>
    "tpu.trace_start"() <{level = 10 : i32, message = "bqd,bkd->bqk"}> : () -> ()
    %cst_41 = arith.constant dense<0.000000e+00> : vector<1x8x8xf32>
    %109 = tpu.matmul %102, %105, %cst_41 {dimension_numbers = #tpu.dot_dimension_numbers<[2], [2], [1], [1], [0, 0, 0, 1, 1, 1], [0], [0]>} : vector<1x8x8xbf16>, vector<1x8x8xbf16>, vector<1x8x8xf32> -> vector<1x8x8xf32>
    "tpu.trace_stop"() : () -> ()
    %cst_42 = arith.constant 0.353553385 : f32
    %110 = vector.broadcast %cst_42 : f32 to vector<1x8x8xf32>
    %111 = arith.mulf %109, %110 : vector<1x8x8xf32>
    %cst_43 = arith.constant dense<0xFF800000> : vector<1x8xf32>
    %112 = vector.multi_reduction <maximumf>, %111, %cst_43 [2] : vector<1x8x8xf32> to vector<1x8xf32>
    %113 = vector.shape_cast %112 : vector<1x8xf32> to vector<1x8x1xf32>
    %114 = vector.broadcast %113 : vector<1x8x1xf32> to vector<1x8x8xf32>
    %115 = arith.subf %111, %114 : vector<1x8x8xf32>
    %116 = math.exp %115 : vector<1x8x8xf32>
    %cst_44 = arith.constant dense<0.000000e+00> : vector<1x8xf32>
    %117 = vector.multi_reduction <add>, %116, %cst_44 [2] : vector<1x8x8xf32> to vector<1x8xf32>
    %118 = vector.shape_cast %117 : vector<1x8xf32> to vector<1x8x1xf32>
    %119 = tpu.reciprocal %118 {approx = true} : vector<1x8x1xf32> -> vector<1x8x1xf32>
    %120 = vector.broadcast %119 : vector<1x8x1xf32> to vector<1x8x8xf32>
    %121 = arith.mulf %116, %120 : vector<1x8x8xf32>
    %122 = arith.truncf %121 : vector<1x8x8xf32> to vector<1x8x8xbf16>
    "tpu.trace_start"() <{level = 10 : i32, message = "bqk,bkd->bqd"}> : () -> ()
    %cst_45 = arith.constant dense<0.000000e+00> : vector<1x8x8xf32>
    %123 = tpu.matmul %122, %108, %cst_45 {dimension_numbers = #tpu.dot_dimension_numbers<[2], [1], [1], [2], [0, 0, 0, 1, 1, 2], [0], [0]>} : vector<1x8x8xbf16>, vector<1x8x8xbf16>, vector<1x8x8xf32> -> vector<1x8x8xf32>
    "tpu.trace_stop"() : () -> ()
    %124 = vector.shape_cast %123 : vector<1x8x8xf32> to vector<8x8xf32>
    %c0_46 = arith.constant 0 : index
    %c16 = arith.constant 16 : index
    %125 = vector.load %arg39[%c0_46, %c16] : memref<8x32xf32, #tpu.memory_space<vmem>>, vector<8x8xf32>
    tpu.vector_store %arg39[%c0_46, %c16], %124 {strides = array<i32>} : memref<8x32xf32, #tpu.memory_space<vmem>>, vector<8x8xf32>,
    %126 = vector.extract_strided_slice %41 {offsets = [0, 24], sizes = [8, 8], strides = [1, 1]} : vector<8x32xf32> to vector<8x8xf32>
    %127 = vector.shape_cast %126 : vector<8x8xf32> to vector<1x8x8xf32>
    %128 = arith.truncf %127 : vector<1x8x8xf32> to vector<1x8x8xbf16>
    %129 = vector.extract_strided_slice %44 {offsets = [0, 24], sizes = [8, 8], strides = [1, 1]} : vector<8x32xf32> to vector<8x8xf32>
    %130 = vector.shape_cast %129 : vector<8x8xf32> to vector<1x8x8xf32>
    %131 = arith.truncf %130 : vector<1x8x8xf32> to vector<1x8x8xbf16>
    %132 = vector.extract_strided_slice %47 {offsets = [0, 24], sizes = [8, 8], strides = [1, 1]} : vector<8x32xf32> to vector<8x8xf32>
    %133 = vector.shape_cast %132 : vector<8x8xf32> to vector<1x8x8xf32>
    %134 = arith.truncf %133 : vector<1x8x8xf32> to vector<1x8x8xbf16>
    "tpu.trace_start"() <{level = 10 : i32, message = "bqd,bkd->bqk"}> : () -> ()
    %cst_47 = arith.constant dense<0.000000e+00> : vector<1x8x8xf32>
    %135 = tpu.matmul %128, %131, %cst_47 {dimension_numbers = #tpu.dot_dimension_numbers<[2], [2], [1], [1], [0, 0, 0, 1, 1, 1], [0], [0]>} : vector<1x8x8xbf16>, vector<1x8x8xbf16>, vector<1x8x8xf32> -> vector<1x8x8xf32>
    "tpu.trace_stop"() : () -> ()
    %cst_48 = arith.constant 0.353553385 : f32
    %136 = vector.broadcast %cst_48 : f32 to vector<1x8x8xf32>
    %137 = arith.mulf %135, %136 : vector<1x8x8xf32>
    %cst_49 = arith.constant dense<0xFF800000> : vector<1x8xf32>
    %138 = vector.multi_reduction <maximumf>, %137, %cst_49 [2] : vector<1x8x8xf32> to vector<1x8xf32>
    %139 = vector.shape_cast %138 : vector<1x8xf32> to vector<1x8x1xf32>
    %140 = vector.broadcast %139 : vector<1x8x1xf32> to vector<1x8x8xf32>
    %141 = arith.subf %137, %140 : vector<1x8x8xf32>
    %142 = math.exp %141 : vector<1x8x8xf32>
    %cst_50 = arith.constant dense<0.000000e+00> : vector<1x8xf32>
    %143 = vector.multi_reduction <add>, %142, %cst_50 [2] : vector<1x8x8xf32> to vector<1x8xf32>
    %144 = vector.shape_cast %143 : vector<1x8xf32> to vector<1x8x1xf32>
    %145 = tpu.reciprocal %144 {approx = true} : vector<1x8x1xf32> -> vector<1x8x1xf32>
    %146 = vector.broadcast %145 : vector<1x8x1xf32> to vector<1x8x8xf32>
    %147 = arith.mulf %142, %146 : vector<1x8x8xf32>
    %148 = arith.truncf %147 : vector<1x8x8xf32> to vector<1x8x8xbf16>
    "tpu.trace_start"() <{level = 10 : i32, message = "bqk,bkd->bqd"}> : () -> ()
    %cst_51 = arith.constant dense<0.000000e+00> : vector<1x8x8xf32>
    %149 = tpu.matmul %148, %134, %cst_51 {dimension_numbers = #tpu.dot_dimension_numbers<[2], [1], [1], [2], [0, 0, 0, 1, 1, 2], [0], [0]>} : vector<1x8x8xbf16>, vector<1x8x8xbf16>, vector<1x8x8xf32> -> vector<1x8x8xf32>
    "tpu.trace_stop"() : () -> ()
    %150 = vector.shape_cast %149 : vector<1x8x8xf32> to vector<8x8xf32>
    %c0_52 = arith.constant 0 : index
    %c24 = arith.constant 24 : index
    %151 = vector.load %arg39[%c0_52, %c24] : memref<8x32xf32, #tpu.memory_space<vmem>>, vector<8x8xf32>
    tpu.vector_store %arg39[%c0_52, %c24], %150 {strides = array<i32>} : memref<8x32xf32, #tpu.memory_space<vmem>>, vector<8x8xf32>,
    %c0_53 = arith.constant 0 : index
    %c0_54 = arith.constant 0 : index
    %152 = vector.load %arg39[%c0_53, %c0_54] : memref<8x32xf32, #tpu.memory_space<vmem>>, vector<8x32xf32>
    %153 = arith.truncf %152 : vector<8x32xf32> to vector<8x32xbf16>
    %c0_55 = arith.constant 0 : index
    %c0_56 = arith.constant 0 : index
    %c0_57 = arith.constant 0 : index
    %154 = vector.load %arg27[%c0_55, %c0_56, %c0_57] : memref<1x32x32xbf16, #tpu.memory_space<vmem>>, vector<1x32x32xbf16>
    %155 = vector.shape_cast %154 : vector<1x32x32xbf16> to vector<32x32xbf16>
    %cst_58 = arith.constant dense<0.000000e+00> : vector<8x32xf32>
    %156 = tpu.matmul %153, %155, %cst_58 {dimension_numbers = #tpu.dot_dimension_numbers<[1], [0], [0], [1], [0, 0, 1, 1], [], []>} : vector<8x32xbf16>, vector<32x32xbf16>, vector<8x32xf32> -> vector<8x32xf32>
    %157 = arith.addf %11, %156 : vector<8x32xf32>
    %c0_59 = arith.constant 0 : index
    %c0_60 = arith.constant 0 : index
    %c0_61 = arith.constant 0 : index
    %158 = vector.load %arg28[%c0_59, %c0_60, %c0_61] : memref<1x1x32xf32, #tpu.memory_space<vmem>>, vector<1x1x32xf32>
    %159 = vector.shape_cast %158 : vector<1x1x32xf32> to vector<1x32xf32>
    %c0_62 = arith.constant 0 : index
    %c0_63 = arith.constant 0 : index
    %c0_64 = arith.constant 0 : index
    %160 = vector.load %arg29[%c0_62, %c0_63, %c0_64] : memref<1x1x32xf32, #tpu.memory_space<vmem>>, vector<1x1x32xf32>
    %161 = vector.shape_cast %160 : vector<1x1x32xf32> to vector<1x32xf32>
    %cst_65 = arith.constant dense<0.000000e+00> : vector<8xf32>
    %162 = vector.multi_reduction <add>, %157, %cst_65 [1] : vector<8x32xf32> to vector<8xf32>
    %163 = vector.shape_cast %162 : vector<8xf32> to vector<8x1xf32>
    %cst_66 = arith.constant 3.200000e+01 : f32
    %164 = vector.broadcast %cst_66 : f32 to vector<8x1xf32>
    %165 = arith.divf %163, %164 : vector<8x1xf32>
    %166 = vector.broadcast %165 : vector<8x1xf32> to vector<8x32xf32>
    %167 = arith.subf %157, %166 : vector<8x32xf32>
    %168 = arith.mulf %167, %167 : vector<8x32xf32>
    %cst_67 = arith.constant dense<0.000000e+00> : vector<8xf32>
    %169 = vector.multi_reduction <add>, %168, %cst_67 [1] : vector<8x32xf32> to vector<8xf32>
    %170 = vector.shape_cast %169 : vector<8xf32> to vector<8x1xf32>
    %cst_68 = arith.constant 3.200000e+01 : f32
    %171 = vector.broadcast %cst_68 : f32 to vector<8x1xf32>
    %172 = arith.divf %170, %171 : vector<8x1xf32>
    %173 = vector.broadcast %165 : vector<8x1xf32> to vector<8x32xf32>
    %174 = arith.subf %157, %173 : vector<8x32xf32>
    %cst_69 = arith.constant 9.99999974E-6 : f32
    %175 = vector.broadcast %cst_69 : f32 to vector<8x1xf32>
    %176 = arith.addf %172, %175 : vector<8x1xf32>
    %177 = math.rsqrt %176 : vector<8x1xf32>
    %178 = vector.broadcast %177 : vector<8x1xf32> to vector<8x32xf32>
    %179 = arith.mulf %174, %178 : vector<8x32xf32>
    %180 = vector.broadcast %159 : vector<1x32xf32> to vector<8x32xf32>
    %181 = arith.mulf %179, %180 : vector<8x32xf32>
    %182 = vector.broadcast %161 : vector<1x32xf32> to vector<8x32xf32>
    %183 = arith.addf %181, %182 : vector<8x32xf32>
    %184 = arith.truncf %183 : vector<8x32xf32> to vector<8x32xbf16>
    %c0_70 = arith.constant 0 : index
    %c0_71 = arith.constant 0 : index
    %c0_72 = arith.constant 0 : index
    %185 = vector.load %arg30[%c0_70, %c0_71, %c0_72] : memref<1x32x32xbf16, #tpu.memory_space<vmem>>, vector<1x32x32xbf16>
    %186 = vector.shape_cast %185 : vector<1x32x32xbf16> to vector<32x32xbf16>
    %cst_73 = arith.constant dense<0.000000e+00> : vector<8x32xf32>
    %187 = tpu.matmul %184, %186, %cst_73 {dimension_numbers = #tpu.dot_dimension_numbers<[1], [0], [0], [1], [0, 0, 1, 1], [], []>} : vector<8x32xbf16>, vector<32x32xbf16>, vector<8x32xf32> -> vector<8x32xf32>
    %c0_74 = arith.constant 0 : index
    %c0_75 = arith.constant 0 : index
    %c0_76 = arith.constant 0 : index
    %188 = vector.load %arg32[%c0_74, %c0_75, %c0_76] : memref<1x1x32xf32, #tpu.memory_space<vmem>>, vector<1x1x32xf32>
    %189 = vector.shape_cast %188 : vector<1x1x32xf32> to vector<1x32xf32>
    %190 = vector.broadcast %189 : vector<1x32xf32> to vector<8x32xf32>
    %191 = arith.addf %187, %190 : vector<8x32xf32>
    %c0_77 = arith.constant 0 : index
    %c0_78 = arith.constant 0 : index
    %c0_79 = arith.constant 0 : index
    %192 = vector.load %arg31[%c0_77, %c0_78, %c0_79] : memref<1x32x32xbf16, #tpu.memory_space<vmem>>, vector<1x32x32xbf16>
    %193 = vector.shape_cast %192 : vector<1x32x32xbf16> to vector<32x32xbf16>
    %cst_80 = arith.constant dense<0.000000e+00> : vector<8x32xf32>
    %194 = tpu.matmul %184, %193, %cst_80 {dimension_numbers = #tpu.dot_dimension_numbers<[1], [0], [0], [1], [0, 0, 1, 1], [], []>} : vector<8x32xbf16>, vector<32x32xbf16>, vector<8x32xf32> -> vector<8x32xf32>
    %c0_81 = arith.constant 0 : index
    %c0_82 = arith.constant 0 : index
    %c0_83 = arith.constant 0 : index
    %195 = vector.load %arg33[%c0_81, %c0_82, %c0_83] : memref<1x1x32xf32, #tpu.memory_space<vmem>>, vector<1x1x32xf32>
    %196 = vector.shape_cast %195 : vector<1x1x32xf32> to vector<1x32xf32>
    %197 = vector.broadcast %196 : vector<1x32xf32> to vector<8x32xf32>
    %198 = arith.addf %194, %197 : vector<8x32xf32>
    %cst_84 = arith.constant 5.000000e-01 : f32
    %199 = vector.broadcast %cst_84 : f32 to vector<8x32xf32>
    %200 = arith.mulf %199, %198 : vector<8x32xf32>
    %cst_85 = arith.constant 1.41421354 : f32
    %201 = vector.broadcast %cst_85 : f32 to vector<8x32xf32>
    %202 = arith.divf %198, %201 : vector<8x32xf32>
    %203 = math.erf %202 : vector<8x32xf32>
    %cst_86 = arith.constant 1.000000e+00 : f32
    %204 = vector.broadcast %cst_86 : f32 to vector<8x32xf32>
    %205 = arith.addf %204, %203 : vector<8x32xf32>
    %206 = arith.mulf %200, %205 : vector<8x32xf32>
    %207 = arith.mulf %191, %206 : vector<8x32xf32>
    %208 = arith.truncf %207 : vector<8x32xf32> to vector<8x32xbf16>
    %c0_87 = arith.constant 0 : index
    %c0_88 = arith.constant 0 : index
    %c0_89 = arith.constant 0 : index
    %209 = vector.load %arg34[%c0_87, %c0_88, %c0_89] : memref<1x32x32xbf16, #tpu.memory_space<vmem>>, vector<1x32x32xbf16>
    %210 = vector.shape_cast %209 : vector<1x32x32xbf16> to vector<32x32xbf16>
    %cst_90 = arith.constant dense<0.000000e+00> : vector<8x32xf32>
    %211 = tpu.matmul %208, %210, %cst_90 {dimension_numbers = #tpu.dot_dimension_numbers<[1], [0], [0], [1], [0, 0, 1, 1], [], []>} : vector<8x32xbf16>, vector<32x32xbf16>, vector<8x32xf32> -> vector<8x32xf32>
    %c0_91 = arith.constant 0 : index
    %c0_92 = arith.constant 0 : index
    %c0_93 = arith.constant 0 : index
    %212 = vector.load %arg35[%c0_91, %c0_92, %c0_93] : memref<1x1x32xf32, #tpu.memory_space<vmem>>, vector<1x1x32xf32>
    %213 = vector.shape_cast %212 : vector<1x1x32xf32> to vector<1x32xf32>
    %214 = vector.broadcast %213 : vector<1x32xf32> to vector<8x32xf32>
    %215 = arith.addf %211, %214 : vector<8x32xf32>
    %216 = arith.addf %157, %215 : vector<8x32xf32>
    %c0_94 = arith.constant 0 : index
    %c0_95 = arith.constant 0 : index
    %217 = vector.load %arg38[%c0_94, %c0_95] : memref<8x32xf32, #tpu.memory_space<vmem>>, vector<8x32xf32>
    tpu.vector_store %arg38[%c0_94, %c0_95], %216 {strides = array<i32>} : memref<8x32xf32, #tpu.memory_space<vmem>>, vector<8x32xf32>,
    %218 = arith.extui %2 : i1 to i32
    %c0_i32_96 = arith.constant 0 : i32
    %219 = arith.cmpi ne, %218, %c0_i32_96 : i32
    scf.if %219 {
      %c0_97 = arith.constant 0 : index
      %c0_98 = arith.constant 0 : index
      %220 = vector.load %arg38[%c0_97, %c0_98] : memref<8x32xf32, #tpu.memory_space<vmem>>, vector<8x32xf32>
      %221 = vector.shape_cast %220 : vector<8x32xf32> to vector<1x8x32xf32>
      %c0_99 = arith.constant 0 : index
      %c0_100 = arith.constant 0 : index
      %c0_101 = arith.constant 0 : index
      %222 = vector.load %arg36[%c0_99, %c0_100, %c0_101] : memref<1x8x32xf32, #tpu.memory_space<vmem>>, vector<1x8x32xf32>
      tpu.vector_store %arg36[%c0_99, %c0_100, %c0_101], %221 {strides = array<i32>} : memref<1x8x32xf32, #tpu.memory_space<vmem>>, vector<1x8x32xf32>,
      %cst_102 = arith.constant dense<0.000000e+00> : vector<1x32xf32>
      %223 = vector.multi_reduction <add>, %221, %cst_102 [1] : vector<1x8x32xf32> to vector<1x32xf32>
      %224 = vector.shape_cast %223 : vector<1x32xf32> to vector<1x1x32xf32>
      %cst_103 = arith.constant 8.000000e+00 : f32
      %225 = vector.broadcast %cst_103 : f32 to vector<1x1x32xf32>
      %226 = arith.divf %224, %225 : vector<1x1x32xf32>
      %c0_104 = arith.constant 0 : index
      %c0_105 = arith.constant 0 : index
      %c0_106 = arith.constant 0 : index
      %227 = vector.load %arg37[%c0_104, %c0_105, %c0_106] : memref<1x1x32xf32, #tpu.memory_space<vmem>>, vector<1x1x32xf32>
      tpu.vector_store %arg37[%c0_104, %c0_105, %c0_106], %226 {strides = array<i32>} : memref<1x1x32xf32, #tpu.memory_space<vmem>>, vector<1x1x32xf32>,
    } else {
    }
    return
  }
  func.func @transform_0(%arg0: i32, %arg1: i32, %arg2: i32, %arg3: memref<2xi32, #tpu.memory_space<smem>>, %arg4: memref<2xi32, #tpu.memory_space<smem>>) -> (i32, i32, i32) {
    %c0_i32 = arith.constant 0 : i32
    %c0_i32_0 = arith.constant 0 : i32
    %c0_i32_1 = arith.constant 0 : i32
    return %arg0, %c0_i32, %c0_i32_0 : i32, i32, i32
  }
  func.func @transform_1(%arg0: i32, %arg1: i32, %arg2: i32, %arg3: memref<2xi32, #tpu.memory_space<smem>>, %arg4: memref<2xi32, #tpu.memory_space<smem>>) -> (i32, i32, i32) {
    %c0_i32 = arith.constant 0 : i32
    %c0_i32_0 = arith.constant 0 : i32
    %c0_i32_1 = arith.constant 0 : i32
    return %arg0, %c0_i32, %c0_i32_0 : i32, i32, i32
  }
  func.func @transform_2(%arg0: i32, %arg1: i32, %arg2: i32, %arg3: memref<2xi32, #tpu.memory_space<smem>>, %arg4: memref<2xi32, #tpu.memory_space<smem>>) -> (i32, i32) {
    %c0_i32 = arith.constant 0 : i32
    %c0_i32_0 = arith.constant 0 : i32
    %c0_i32_1 = arith.constant 0 : i32
    return %c0_i32, %c0_i32_0 : i32, i32
  }
  func.func @transform_3(%arg0: i32, %arg1: i32, %arg2: i32, %arg3: memref<2xi32, #tpu.memory_space<smem>>, %arg4: memref<2xi32, #tpu.memory_space<smem>>) -> (i32, i32, i32) {
    %0 = arith.index_cast %arg1 : i32 to index
    %1 = memref.load %arg3[%0] : memref<2xi32, #tpu.memory_space<smem>>
    %c0_i32 = arith.constant 0 : i32
    %c0_i32_0 = arith.constant 0 : i32
    %c0_i32_1 = arith.constant 0 : i32
    return %1, %c0_i32, %c0_i32_0 : i32, i32, i32
  }
  func.func @transform_4(%arg0: i32, %arg1: i32, %arg2: i32, %arg3: memref<2xi32, #tpu.memory_space<smem>>, %arg4: memref<2xi32, #tpu.memory_space<smem>>) -> (i32, i32, i32) {
    %0 = arith.index_cast %arg1 : i32 to index
    %1 = memref.load %arg3[%0] : memref<2xi32, #tpu.memory_space<smem>>
    %c0_i32 = arith.constant 0 : i32
    %c0_i32_0 = arith.constant 0 : i32
    %c0_i32_1 = arith.constant 0 : i32
    return %1, %c0_i32, %c0_i32_0 : i32, i32, i32
  }
  func.func @transform_5(%arg0: i32, %arg1: i32, %arg2: i32, %arg3: memref<2xi32, #tpu.memory_space<smem>>, %arg4: memref<2xi32, #tpu.memory_space<smem>>) -> (i32, i32, i32) {
    %0 = arith.index_cast %arg1 : i32 to index
    %1 = memref.load %arg3[%0] : memref<2xi32, #tpu.memory_space<smem>>
    %c0_i32 = arith.constant 0 : i32
    %c0_i32_0 = arith.constant 0 : i32
    %c0_i32_1 = arith.constant 0 : i32
    return %1, %c0_i32, %c0_i32_0 : i32, i32, i32
  }
  func.func @transform_6(%arg0: i32, %arg1: i32, %arg2: i32, %arg3: memref<2xi32, #tpu.memory_space<smem>>, %arg4: memref<2xi32, #tpu.memory_space<smem>>) -> (i32, i32, i32) {
    %0 = arith.index_cast %arg1 : i32 to index
    %1 = memref.load %arg3[%0] : memref<2xi32, #tpu.memory_space<smem>>
    %c0_i32 = arith.constant 0 : i32
    %c0_i32_0 = arith.constant 0 : i32
    %c0_i32_1 = arith.constant 0 : i32
    return %1, %c0_i32, %c0_i32_0 : i32, i32, i32
  }
  func.func @transform_7(%arg0: i32, %arg1: i32, %arg2: i32, %arg3: memref<2xi32, #tpu.memory_space<smem>>, %arg4: memref<2xi32, #tpu.memory_space<smem>>) -> (i32, i32, i32) {
    %0 = arith.index_cast %arg1 : i32 to index
    %1 = memref.load %arg3[%0] : memref<2xi32, #tpu.memory_space<smem>>
    %c0_i32 = arith.constant 0 : i32
    %c0_i32_0 = arith.constant 0 : i32
    %c0_i32_1 = arith.constant 0 : i32
    return %1, %c0_i32, %c0_i32_0 : i32, i32, i32
  }
  func.func @transform_8(%arg0: i32, %arg1: i32, %arg2: i32, %arg3: memref<2xi32, #tpu.memory_space<smem>>, %arg4: memref<2xi32, #tpu.memory_space<smem>>) -> (i32, i32, i32) {
    %0 = arith.index_cast %arg1 : i32 to index
    %1 = memref.load %arg3[%0] : memref<2xi32, #tpu.memory_space<smem>>
    %c0_i32 = arith.constant 0 : i32
    %c0_i32_0 = arith.constant 0 : i32
    %c0_i32_1 = arith.constant 0 : i32
    return %1, %c0_i32, %c0_i32_0 : i32, i32, i32
  }
  func.func @transform_9(%arg0: i32, %arg1: i32, %arg2: i32, %arg3: memref<2xi32, #tpu.memory_space<smem>>, %arg4: memref<2xi32, #tpu.memory_space<smem>>) -> (i32, i32, i32) {
    %0 = arith.index_cast %arg1 : i32 to index
    %1 = memref.load %arg3[%0] : memref<2xi32, #tpu.memory_space<smem>>
    %c0_i32 = arith.constant 0 : i32
    %c0_i32_0 = arith.constant 0 : i32
    %c0_i32_1 = arith.constant 0 : i32
    return %1, %c0_i32, %c0_i32_0 : i32, i32, i32
  }
  func.func @transform_10(%arg0: i32, %arg1: i32, %arg2: i32, %arg3: memref<2xi32, #tpu.memory_space<smem>>, %arg4: memref<2xi32, #tpu.memory_space<smem>>) -> (i32, i32, i32) {
    %0 = arith.index_cast %arg1 : i32 to index
    %1 = memref.load %arg3[%0] : memref<2xi32, #tpu.memory_space<smem>>
    %c0_i32 = arith.constant 0 : i32
    %c0_i32_0 = arith.constant 0 : i32
    %c0_i32_1 = arith.constant 0 : i32
    return %1, %c0_i32, %c0_i32_0 : i32, i32, i32
  }
  func.func @transform_11(%arg0: i32, %arg1: i32, %arg2: i32, %arg3: memref<2xi32, #tpu.memory_space<smem>>, %arg4: memref<2xi32, #tpu.memory_space<smem>>) -> (i32, i32, i32) {
    %0 = arith.index_cast %arg1 : i32 to index
    %1 = memref.load %arg3[%0] : memref<2xi32, #tpu.memory_space<smem>>
    %c0_i32 = arith.constant 0 : i32
    %c0_i32_0 = arith.constant 0 : i32
    %c0_i32_1 = arith.constant 0 : i32
    return %1, %c0_i32, %c0_i32_0 : i32, i32, i32
  }
  func.func @transform_12(%arg0: i32, %arg1: i32, %arg2: i32, %arg3: memref<2xi32, #tpu.memory_space<smem>>, %arg4: memref<2xi32, #tpu.memory_space<smem>>) -> (i32, i32, i32) {
    %0 = arith.index_cast %arg1 : i32 to index
    %1 = memref.load %arg3[%0] : memref<2xi32, #tpu.memory_space<smem>>
    %c0_i32 = arith.constant 0 : i32
    %c0_i32_0 = arith.constant 0 : i32
    %c0_i32_1 = arith.constant 0 : i32
    return %1, %c0_i32, %c0_i32_0 : i32, i32, i32
  }
  func.func @transform_13(%arg0: i32, %arg1: i32, %arg2: i32, %arg3: memref<2xi32, #tpu.memory_space<smem>>, %arg4: memref<2xi32, #tpu.memory_space<smem>>) -> (i32, i32, i32) {
    %0 = arith.index_cast %arg1 : i32 to index
    %1 = memref.load %arg3[%0] : memref<2xi32, #tpu.memory_space<smem>>
    %c0_i32 = arith.constant 0 : i32
    %c0_i32_0 = arith.constant 0 : i32
    %c0_i32_1 = arith.constant 0 : i32
    return %1, %c0_i32, %c0_i32_0 : i32, i32, i32
  }
  func.func @transform_14(%arg0: i32, %arg1: i32, %arg2: i32, %arg3: memref<2xi32, #tpu.memory_space<smem>>, %arg4: memref<2xi32, #tpu.memory_space<smem>>) -> (i32, i32, i32) {
    %0 = arith.index_cast %arg1 : i32 to index
    %1 = memref.load %arg3[%0] : memref<2xi32, #tpu.memory_space<smem>>
    %c0_i32 = arith.constant 0 : i32
    %c0_i32_0 = arith.constant 0 : i32
    %c0_i32_1 = arith.constant 0 : i32
    return %1, %c0_i32, %c0_i32_0 : i32, i32, i32
  }
  func.func @transform_15(%arg0: i32, %arg1: i32, %arg2: i32, %arg3: memref<2xi32, #tpu.memory_space<smem>>, %arg4: memref<2xi32, #tpu.memory_space<smem>>) -> (i32, i32, i32) {
    %0 = arith.index_cast %arg1 : i32 to index
    %1 = memref.load %arg3[%0] : memref<2xi32, #tpu.memory_space<smem>>
    %c0_i32 = arith.constant 0 : i32
    %c0_i32_0 = arith.constant 0 : i32
    %c0_i32_1 = arith.constant 0 : i32
    return %1, %c0_i32, %c0_i32_0 : i32, i32, i32
  }
  func.func @transform_16(%arg0: i32, %arg1: i32, %arg2: i32, %arg3: memref<2xi32, #tpu.memory_space<smem>>, %arg4: memref<2xi32, #tpu.memory_space<smem>>) -> (i32, i32, i32) {
    %0 = arith.index_cast %arg1 : i32 to index
    %1 = memref.load %arg3[%0] : memref<2xi32, #tpu.memory_space<smem>>
    %c0_i32 = arith.constant 0 : i32
    %c0_i32_0 = arith.constant 0 : i32
    %c0_i32_1 = arith.constant 0 : i32
    return %1, %c0_i32, %c0_i32_0 : i32, i32, i32
  }
  func.func @transform_17(%arg0: i32, %arg1: i32, %arg2: i32, %arg3: memref<2xi32, #tpu.memory_space<smem>>, %arg4: memref<2xi32, #tpu.memory_space<smem>>) -> (i32, i32, i32) {
    %0 = arith.index_cast %arg1 : i32 to index
    %1 = memref.load %arg4[%0] : memref<2xi32, #tpu.memory_space<smem>>
    %c2_i32 = arith.constant 2 : i32
    %2 = arith.muli %1, %c2_i32 : i32
    %3 = arith.addi %2, %arg2 : i32
    %c0_i32 = arith.constant 0 : i32
    %c0_i32_0 = arith.constant 0 : i32
    %c0_i32_1 = arith.constant 0 : i32
    return %3, %c0_i32, %c0_i32_0 : i32, i32, i32
  }
  func.func @transform_18(%arg0: i32, %arg1: i32, %arg2: i32, %arg3: memref<2xi32, #tpu.memory_space<smem>>, %arg4: memref<2xi32, #tpu.memory_space<smem>>) -> (i32, i32, i32) {
    %0 = arith.index_cast %arg1 : i32 to index
    %1 = memref.load %arg4[%0] : memref<2xi32, #tpu.memory_space<smem>>
    %c2_i32 = arith.constant 2 : i32
    %2 = arith.muli %1, %c2_i32 : i32
    %3 = arith.addi %2, %arg2 : i32
    %c0_i32 = arith.constant 0 : i32
    %c0_i32_0 = arith.constant 0 : i32
    %c0_i32_1 = arith.constant 0 : i32
    return %3, %c0_i32, %c0_i32_0 : i32, i32, i32
  }
  func.func @transform_19(%arg0: i32, %arg1: i32, %arg2: i32, %arg3: memref<2xi32, #tpu.memory_space<smem>>, %arg4: memref<2xi32, #tpu.memory_space<smem>>) -> (i32, i32, i32) {
    %0 = arith.index_cast %arg1 : i32 to index
    %1 = memref.load %arg4[%0] : memref<2xi32, #tpu.memory_space<smem>>
    %c2_i32 = arith.constant 2 : i32
    %2 = arith.muli %1, %c2_i32 : i32
    %3 = arith.addi %2, %arg2 : i32
    %c0_i32 = arith.constant 0 : i32
    %c0_i32_0 = arith.constant 0 : i32
    %c0_i32_1 = arith.constant 0 : i32
    return %3, %c0_i32, %c0_i32_0 : i32, i32, i32
  }
  func.func @transform_20(%arg0: i32, %arg1: i32, %arg2: i32, %arg3: memref<2xi32, #tpu.memory_space<smem>>, %arg4: memref<2xi32, #tpu.memory_space<smem>>) -> (i32, i32, i32) {
    %0 = arith.index_cast %arg1 : i32 to index
    %1 = memref.load %arg4[%0] : memref<2xi32, #tpu.memory_space<smem>>
    %c2_i32 = arith.constant 2 : i32
    %2 = arith.muli %1, %c2_i32 : i32
    %3 = arith.addi %2, %arg2 : i32
    %c0_i32 = arith.constant 0 : i32
    %c0_i32_0 = arith.constant 0 : i32
    %c0_i32_1 = arith.constant 0 : i32
    return %3, %c0_i32, %c0_i32_0 : i32, i32, i32
  }
  func.func @transform_21(%arg0: i32, %arg1: i32, %arg2: i32, %arg3: memref<2xi32, #tpu.memory_space<smem>>, %arg4: memref<2xi32, #tpu.memory_space<smem>>) -> (i32, i32, i32) {
    %0 = arith.index_cast %arg1 : i32 to index
    %1 = memref.load %arg4[%0] : memref<2xi32, #tpu.memory_space<smem>>
    %c2_i32 = arith.constant 2 : i32
    %2 = arith.muli %1, %c2_i32 : i32
    %3 = arith.addi %2, %arg2 : i32
    %c0_i32 = arith.constant 0 : i32
    %c0_i32_0 = arith.constant 0 : i32
    %c0_i32_1 = arith.constant 0 : i32
    return %3, %c0_i32, %c0_i32_0 : i32, i32, i32
  }
  func.func @transform_22(%arg0: i32, %arg1: i32, %arg2: i32, %arg3: memref<2xi32, #tpu.memory_space<smem>>, %arg4: memref<2xi32, #tpu.memory_space<smem>>) -> (i32, i32, i32) {
    %0 = arith.index_cast %arg1 : i32 to index
    %1 = memref.load %arg4[%0] : memref<2xi32, #tpu.memory_space<smem>>
    %c2_i32 = arith.constant 2 : i32
    %2 = arith.muli %1, %c2_i32 : i32
    %3 = arith.addi %2, %arg2 : i32
    %c0_i32 = arith.constant 0 : i32
    %c0_i32_0 = arith.constant 0 : i32
    %c0_i32_1 = arith.constant 0 : i32
    return %3, %c0_i32, %c0_i32_0 : i32, i32, i32
  }
  func.func @transform_23(%arg0: i32, %arg1: i32, %arg2: i32, %arg3: memref<2xi32, #tpu.memory_space<smem>>, %arg4: memref<2xi32, #tpu.memory_space<smem>>) -> (i32, i32, i32) {
    %0 = arith.index_cast %arg1 : i32 to index
    %1 = memref.load %arg4[%0] : memref<2xi32, #tpu.memory_space<smem>>
    %c2_i32 = arith.constant 2 : i32
    %2 = arith.muli %1, %c2_i32 : i32
    %3 = arith.addi %2, %arg2 : i32
    %c0_i32 = arith.constant 0 : i32
    %c0_i32_0 = arith.constant 0 : i32
    %c0_i32_1 = arith.constant 0 : i32
    return %3, %c0_i32, %c0_i32_0 : i32, i32, i32
  }
  func.func @transform_24(%arg0: i32, %arg1: i32, %arg2: i32, %arg3: memref<2xi32, #tpu.memory_space<smem>>, %arg4: memref<2xi32, #tpu.memory_space<smem>>) -> (i32, i32, i32) {
    %0 = arith.index_cast %arg1 : i32 to index
    %1 = memref.load %arg4[%0] : memref<2xi32, #tpu.memory_space<smem>>
    %c2_i32 = arith.constant 2 : i32
    %2 = arith.muli %1, %c2_i32 : i32
    %3 = arith.addi %2, %arg2 : i32
    %c0_i32 = arith.constant 0 : i32
    %c0_i32_0 = arith.constant 0 : i32
    %c0_i32_1 = arith.constant 0 : i32
    return %3, %c0_i32, %c0_i32_0 : i32, i32, i32
  }
  func.func @transform_25(%arg0: i32, %arg1: i32, %arg2: i32, %arg3: memref<2xi32, #tpu.memory_space<smem>>, %arg4: memref<2xi32, #tpu.memory_space<smem>>) -> (i32, i32, i32) {
    %0 = arith.index_cast %arg1 : i32 to index
    %1 = memref.load %arg4[%0] : memref<2xi32, #tpu.memory_space<smem>>
    %c2_i32 = arith.constant 2 : i32
    %2 = arith.muli %1, %c2_i32 : i32
    %3 = arith.addi %2, %arg2 : i32
    %c0_i32 = arith.constant 0 : i32
    %c0_i32_0 = arith.constant 0 : i32
    %c0_i32_1 = arith.constant 0 : i32
    return %3, %c0_i32, %c0_i32_0 : i32, i32, i32
  }
  func.func @transform_26(%arg0: i32, %arg1: i32, %arg2: i32, %arg3: memref<2xi32, #tpu.memory_space<smem>>, %arg4: memref<2xi32, #tpu.memory_space<smem>>) -> (i32, i32, i32) {
    %0 = arith.index_cast %arg1 : i32 to index
    %1 = memref.load %arg4[%0] : memref<2xi32, #tpu.memory_space<smem>>
    %c2_i32 = arith.constant 2 : i32
    %2 = arith.muli %1, %c2_i32 : i32
    %3 = arith.addi %2, %arg2 : i32
    %c0_i32 = arith.constant 0 : i32
    %c0_i32_0 = arith.constant 0 : i32
    %c0_i32_1 = arith.constant 0 : i32
    return %3, %c0_i32, %c0_i32_0 : i32, i32, i32
  }
  func.func @transform_27(%arg0: i32, %arg1: i32, %arg2: i32, %arg3: memref<2xi32, #tpu.memory_space<smem>>, %arg4: memref<2xi32, #tpu.memory_space<smem>>) -> (i32, i32, i32) {
    %0 = arith.index_cast %arg1 : i32 to index
    %1 = memref.load %arg4[%0] : memref<2xi32, #tpu.memory_space<smem>>
    %c2_i32 = arith.constant 2 : i32
    %2 = arith.muli %1, %c2_i32 : i32
    %3 = arith.addi %2, %arg2 : i32
    %c0_i32 = arith.constant 0 : i32
    %c0_i32_0 = arith.constant 0 : i32
    %c0_i32_1 = arith.constant 0 : i32
    return %3, %c0_i32, %c0_i32_0 : i32, i32, i32
  }
  func.func @transform_28(%arg0: i32, %arg1: i32, %arg2: i32, %arg3: memref<2xi32, #tpu.memory_space<smem>>, %arg4: memref<2xi32, #tpu.memory_space<smem>>) -> (i32, i32, i32) {
    %0 = arith.index_cast %arg1 : i32 to index
    %1 = memref.load %arg4[%0] : memref<2xi32, #tpu.memory_space<smem>>
    %c2_i32 = arith.constant 2 : i32
    %2 = arith.muli %1, %c2_i32 : i32
    %3 = arith.addi %2, %arg2 : i32
    %c0_i32 = arith.constant 0 : i32
    %c0_i32_0 = arith.constant 0 : i32
    %c0_i32_1 = arith.constant 0 : i32
    return %3, %c0_i32, %c0_i32_0 : i32, i32, i32
  }
  func.func @transform_29(%arg0: i32, %arg1: i32, %arg2: i32, %arg3: memref<2xi32, #tpu.memory_space<smem>>, %arg4: memref<2xi32, #tpu.memory_space<smem>>) -> (i32, i32, i32) {
    %0 = arith.index_cast %arg1 : i32 to index
    %1 = memref.load %arg4[%0] : memref<2xi32, #tpu.memory_space<smem>>
    %c2_i32 = arith.constant 2 : i32
    %2 = arith.muli %1, %c2_i32 : i32
    %3 = arith.addi %2, %arg2 : i32
    %c0_i32 = arith.constant 0 : i32
    %c0_i32_0 = arith.constant 0 : i32
    %c0_i32_1 = arith.constant 0 : i32
    return %3, %c0_i32, %c0_i32_0 : i32, i32, i32
  }
  func.func @transform_30(%arg0: i32, %arg1: i32, %arg2: i32, %arg3: memref<2xi32, #tpu.memory_space<smem>>, %arg4: memref<2xi32, #tpu.memory_space<smem>>) -> (i32, i32, i32) {
    %0 = arith.index_cast %arg1 : i32 to index
    %1 = memref.load %arg4[%0] : memref<2xi32, #tpu.memory_space<smem>>
    %c2_i32 = arith.constant 2 : i32
    %2 = arith.muli %1, %c2_i32 : i32
    %3 = arith.addi %2, %arg2 : i32
    %c0_i32 = arith.constant 0 : i32
    %c0_i32_0 = arith.constant 0 : i32
    %c0_i32_1 = arith.constant 0 : i32
    return %3, %c0_i32, %c0_i32_0 : i32, i32, i32
  }
  func.func @transform_31(%arg0: i32, %arg1: i32, %arg2: i32, %arg3: memref<2xi32, #tpu.memory_space<smem>>, %arg4: memref<2xi32, #tpu.memory_space<smem>>) -> (i32, i32, i32) {
    %c0_i32 = arith.constant 0 : i32
    %c0_i32_0 = arith.constant 0 : i32
    %c0_i32_1 = arith.constant 0 : i32
    return %arg0, %c0_i32, %c0_i32_0 : i32, i32, i32
  }
  func.func @transform_32(%arg0: i32, %arg1: i32, %arg2: i32, %arg3: memref<2xi32, #tpu.memory_space<smem>>, %arg4: memref<2xi32, #tpu.memory_space<smem>>) -> (i32, i32, i32) {
    %c0_i32 = arith.constant 0 : i32
    %c0_i32_0 = arith.constant 0 : i32
    %c0_i32_1 = arith.constant 0 : i32
    return %arg0, %c0_i32, %c0_i32_0 : i32, i32, i32
  }
}

</mosaic_0001>

<bundles_post_ra>
// kernel: perceiver_forward.1
= control target key start
LH: loop header
LB: loop body
LE: loop exit
PB: predicated region body
PF: predicated region fallthrough
CT: control target
= control target key end

     0   :  { %s6399_s6 = smov 2   ;;  %s6400_s10 = smov 3   ;;  %s8515_s0 = inlined_call_operand.smem [shape: u32[35], index: -1, kind: input, shape index: {}] }
   0x1   :  { %s6475_s5 = sld [smem:[%s8515_s0]]   ;;  %s6401_s14 = smov 4  }
   0x2   :  { %s6480_s9 = sld [smem:[%s8515_s0 + %s6399_s6]]   ;;  %s6402_s18 = smov 5  }
   0x3   :  { %s6485_s13 = sld [smem:[%s8515_s0 + %s6400_s10]]   ;;  %s6403_s22 = smov 6  }
   0x4   :  { %s6490_s17 = sld [smem:[%s8515_s0 + %s6401_s14]]   ;;  %s6404_s26 = smov 7  }
   0x5   :  { %s6495_s21 = sld [smem:[%s8515_s0 + %s6402_s18]]   ;;  %s6405_s30 = smov 8  }
   0x6   :  { %s6500_s25 = sld [smem:[%s8515_s0 + %s6403_s22]]   ;;  %s6406_s4 = smov 9  }
   0x7   :  { %s6505_s29 = sld [smem:[%s8515_s0 + %s6404_s26]]   ;;  %s6407_s10 = smov 10  }
   0x8   :  { %8707 = sst [smem:[#allocation68_spill]] %s6480_s9  ;;  %s6408_s15 = smov 11  }
   0x9   :  { %8708 = sst [smem:[#allocation69_spill]] %s6485_s13  ;;  %s6409_s20 = smov 12  }
   0xa   :  { %8709 = sst [smem:[#allocation70_spill]] %s6490_s17  ;;  %s6410_s26 = smov 13  }
   0xb   :  { %8710 = sst [smem:[#allocation71_spill]] %s6495_s21  ;;  %s6411_s1 = smov 14  }
   0xc   :  { %8711 = sst [smem:[#allocation72_spill]] %s6500_s25  ;;  %s6412_s7 = smov 15  }
   0xd   :  { %8712 = sst [smem:[#allocation73_spill]] %s6505_s29  ;;  %s6414_s22 = smov 17  }
   0xe   :  { %s6510_s3 = sld [smem:[%s8515_s0 + %s6405_s30]]   ;;  %s6415_s28 = smov 18  }
   0xf   :  { %s6515_s8 = sld [smem:[%s8515_s0 + %s6406_s4]]   ;;  %s75_s29 = sshll.u32 %s6475_s5, 4  ;;  %s76_s29 = int_to_ptr.vmem [resolvable:$true] %s75_s29 }
  0x10   :  { %s6520_s14 = sld [smem:[%s8515_s0 + %s6407_s10]]   ;;  %p5418_p1 = scmp.lt.s32.totalorder %s76_s29, %s76_s29 }
  0x11   :  { %s6525_s19 = sld [smem:[%s8515_s0 + %s6408_s15]]   ;;  %s6413_s15 = smov 16  }
  0x12   :  { %s6530_s24 = sld [smem:[%s8515_s0 + %s6409_s20]]  }
  0x13   :  { %s6535_s30 = sld [smem:[%s8515_s0 + %s6410_s26]]  }
  0x14   :  { %8713 = sst [smem:[#allocation74_spill]] %s6510_s3  ;;  %s6431_s3 = smov 34  }
  0x15   :  { %8714 = sst [smem:[#allocation75_spill]] %s6515_s8  ;;  %s6430_s8 = smov 33  }
  0x16   :  { %8715 = sst [smem:[#allocation76_spill]] %s6520_s14  ;;  %s6429_s14 = smov 32  }
  0x17   :  { %8716 = sst [smem:[#allocation77_spill]] %s6525_s19 }
  0x18   :  { %8717 = sst [smem:[#allocation78_spill]] %s6530_s24 }
  0x19   :  { %8718 = sst [smem:[#allocation79_spill]] %s6535_s30 }
  0x1a   :  { %s6540_s6 = sld [smem:[%s8515_s0 + %s6411_s1]]  }
  0x1b   :  { %s6545_s12 = sld [smem:[%s8515_s0 + %s6412_s7]]   ;;  %s6416_s7 = smov 19  }
  0x1c   :  { %s6550_s20 = sld [smem:[%s8515_s0 + %s6413_s15]]   ;;  %s6417_s15 = smov 20  }
  0x1d   :  { %s6555_s27 = sld [smem:[%s8515_s0 + %s6414_s22]]   ;;  %s6418_s22 = smov 21  }
  0x1e   :  { %s6560_s4 = sld [smem:[%s8515_s0 + %s6415_s28]]   ;;  %s6419_s28 = smov 22  }
  0x1f   :  { %s6630_s21 = sld [smem:[%s8515_s0 + %s6429_s14]]  }
  0x20   :  { %8719 = sst [smem:[#allocation80_spill]] %s6540_s6 }
  0x21   :  { %8720 = sst [smem:[#allocation81_spill]] %s6545_s12 }
  0x22   :  { %8721 = sst [smem:[#allocation82_spill]] %s6550_s20 }
  0x23   :  { %8722 = sst [smem:[#allocation83_spill]] %s6555_s27 }
  0x24   :  { %8723 = sst [smem:[#allocation84_spill]] %s6560_s4 }
  0x25   :  { %s6565_s12 = sld [smem:[%s8515_s0 + %s6416_s7]]   ;;  %s6420_s7 = smov 23  }
  0x26   :  { %s6570_s20 = sld [smem:[%s8515_s0 + %s6417_s15]]   ;;  %s6421_s15 = smov 24  }
  0x27   :  { %s6575_s27 = sld [smem:[%s8515_s0 + %s6418_s22]]   ;;  %s6422_s22 = smov 25  }
  0x28   :  { %s6580_s4 = sld [smem:[%s8515_s0 + %s6419_s28]]   ;;  %s6423_s28 = smov 26  }
  0x29   :  { %s6585_s6 = sld [smem:[%s8515_s0 + %s6420_s7]]   ;;  %s6424_s7 = smov 27  }
  0x2a   :  { %s6590_s30 = sld [smem:[%s8515_s0 + %s6421_s15]]   ;;  %s6425_s15 = smov 28  }
  0x2b   :  { %8724 = sst [smem:[#allocation85_spill]] %s6565_s12 }
  0x2c   :  { %8725 = sst [smem:[#allocation86_spill]] %s6570_s20 }
  0x2d   :  { %8726 = sst [smem:[#allocation87_spill]] %s6575_s27 }
  0x2e   :  { %8727 = sst [smem:[#allocation88_spill]] %s6580_s4 }
  0x2f   :  { %8728 = sst [smem:[#allocation89_spill]] %s6585_s6 }
  0x30   :  { %8729 = sst [smem:[#allocation90_spill]] %s6590_s30 }
  0x31   :  { %s6595_s24 = sld [smem:[%s8515_s0 + %s6422_s22]]   ;;  %s6426_s22 = smov 29  }
  0x32   :  { %s6600_s19 = sld [smem:[%s8515_s0 + %s6423_s28]]   ;;  %s6427_s28 = smov 30  }
  0x33   :  { %s6605_s16 = sld [smem:[%s8515_s0 + %s6424_s7]]   ;;  %s6428_s7 = smov 31  }
  0x34   :  { %s6610_s23 = sld [smem:[%s8515_s0 + %s6425_s15]]  }
  0x35   :  { %s6615_s1 = sld [smem:[%s8515_s0 + %s6426_s22]]  }
  0x36   :  { %s6620_s10 = sld [smem:[%s8515_s0 + %s6427_s28]]  }
  0x37   :  { %8730 = sst [smem:[#allocation91_spill]] %s6595_s24 }
  0x38   :  { %8731 = sst [smem:[#allocation92_spill]] %s6600_s19 }
  0x39   :  { %8732 = sst [smem:[#allocation93_spill]] %s6605_s16 }
  0x3a   :  { %8733 = sst [smem:[#allocation94_spill]] %s6610_s23 }
  0x3b   :  { %8734 = sst [smem:[#allocation95_spill]] %s6615_s1 }
  0x3c   :  { %8735 = sst [smem:[#allocation96_spill]] %s6620_s10 }
  0x3d   :  { %s6625_s25 = sld [smem:[%s8515_s0 + %s6428_s7]]   ;;  %s5413_s7 = scalar_lea.vmem %s76_s29, 16 }
  0x3e   :  { %8737 = sst [smem:[#allocation98_spill]] %s6630_s21  ;;  %p5414_p0 = scmp.ne.s32.totalorder %s76_s29, %s5413_s7 }
  0x3f   :  { %s6635_s9 = sld [smem:[%s8515_s0 + %s6430_s8]]   ;;  %p5419_p2 = scmp.lt.s32.totalorder %s5413_s7, %s5413_s7 }
  0x40   :  { %s6640_s13 = sld [smem:[%s8515_s0 + %s6431_s3]]  }
  0x41   :  { %p5420_p3 = por %p5419_p2, %p5418_p1 }
  0x43   :  { %8736 = sst [smem:[#allocation97_spill]] %s6625_s25  ;;  %p5421_p4 = pnand %p5420_p3, %p5414_p0 }
  0x45   :  { %8738 = sst [smem:[#allocation99_spill]] %s6635_s9 }
  0x46   :  { %8739 = sst [smem:[#allocation100_spill]] %s6640_s13 }
  0x47   :  { %5424 = shalt.err (!%p5421_p4)  }
  0x48   :  { %s6432_s11 = smov [#allocation7]   ;;  %s6433_s14 = smov 1  }
  0x49   :  { %78 = dma.vmem_to_smem %s76_s29, 16, %s6432_s11, [#allocation6] }
  0x4a   :  { %s4330_s8 = sld [smem:[%s8515_s0 + %s6433_s14]]  }
  0x50   :  { %s79_s22 = sshll.u32 %s4330_s8, 4  ;;  %s80_s22 = int_to_ptr.vmem [resolvable:$true] %s79_s22 }
  0x51   :  { %s5425_s26 = scalar_lea.vmem %s80_s22, 16  ;;  %p5430_p6 = scmp.lt.s32.totalorder %s80_s22, %s80_s22 }
  0x52   :  { %p5426_p5 = scmp.ne.s32.totalorder %s80_s22, %s5425_s26  ;;  %p5431_p7 = scmp.lt.s32.totalorder %s5425_s26, %s5425_s26 }
  0x54   :  { %p5432_p8 = por %p5431_p7, %p5430_p6 }
  0x56   :  { %p5433_p9 = pnand %p5432_p8, %p5426_p5 }
  0x58   :  { %5436 = shalt.err (!%p5433_p9)  }
  0x59   :  { %s6434_s5 = smov [#allocation8]  }
  0x5a   :  { %82 = dma.vmem_to_smem %s80_s22, 16, %s6434_s5, [#allocation6] }
  0x5b   :  { %6121 = dma.done.wait [#allocation6], 32 }
  0x5c   :  { %6122 = vsyncadd [#allocation6], 4294967264 }
  0x5d   :  { %84 = sfence }
  0x5e   :  { %85 = vsyncpa [#allocation10], 0 }
  0x5f   :  { %86 = vsyncpa [#allocation13], 0 }
  0x60   :  { %88 = vsyncpa [#allocation13 + $0x1], 0 }
  0x61   :  { %89 = vsyncpa [#allocation16], 0 }
  0x62   :  { %91 = vsyncpa [#allocation16 + $0x1], 0 }
  0x63   :  { %92 = vsyncpa [#allocation19], 0 }
  0x64   :  { %94 = vsyncpa [#allocation19 + $0x1], 0 }
  0x65   :  { %95 = vsyncpa [#allocation22], 0 }
  0x66   :  { %97 = vsyncpa [#allocation22 + $0x1], 0 }
  0x67   :  { %98 = vsyncpa [#allocation25], 0 }
  0x68   :  { %100 = vsyncpa [#allocation25 + $0x1], 0 }
  0x69   :  { %101 = vsyncpa [#allocation28], 0 }
  0x6a   :  { %103 = vsyncpa [#allocation28 + $0x1], 0 }
  0x6b   :  { %104 = vsyncpa [#allocation31], 0 }
  0x6c   :  { %106 = vsyncpa [#allocation31 + $0x1], 0 }
  0x6d   :  { %107 = vsyncpa [#allocation11], 0 }
  0x6e   :  { %109 = vsyncpa [#allocation11 + $0x1], 0 }
  0x6f   :  { %110 = vsyncpa [#allocation35], 0 }
  0x70   :  { %112 = vsyncpa [#allocation35 + $0x1], 0  ;;  %s6646_s0 = smov 0   ;;  %s6648_s3 = smov 0  }
  0x71   :  { %8740 = sst [smem:[#allocation101_spill]] %s6646_s0  ;;  %s6650_s28 = smov 0  }
  0x72   :  { %s6652_s2 = smov 0   ;;  %s6654_s29 = smov 0  }
  0x73   :  { %s6656_s7 = smov 0   ;;  %s6658_s11 = smov 0  }
  0x74   :  { %s6660_s14 = smov 0   ;;  %s6662_s15 = smov 0  }
  0x75   :  { %s6664_s18 = smov 0   ;;  %s6666_s8 = smov 0  }
  0x76   :  { %8741 = sst [smem:[#allocation102_spill]] %s6664_s18  ;;  %s6668_s22 = smov 0  }
  0x77   :  { %8742 = sst [smem:[#allocation103_spill]] %s6666_s8  ;;  %s6670_s26 = smov 0  }
  0x78   :  { %8743 = sst [smem:[#allocation104_spill]] %s6668_s22  ;;  %s6672_s5 = smov 0  }
  0x79   :  { %8744 = sst [smem:[#allocation105_spill]] %s6670_s26  ;;  %s6674_s13 = smov 0  }
  0x7a   :  { %8745 = sst [smem:[#allocation106_spill]] %s6672_s5  ;;  %s6676_s9 = smov 0  }
  0x7b   :  { %8746 = sst [smem:[#allocation107_spill]] %s6674_s13  ;;  %s6678_s21 = smov 0  }
  0x7c   :  { %8747 = sst [smem:[#allocation108_spill]] %s6676_s9  ;;  %s6680_s10 = smov 0  }
  0x7d   :  { %8748 = sst [smem:[#allocation109_spill]] %s6678_s21  ;;  %s6682_s23 = smov 0  }
  0x7e   :  { %8749 = sst [smem:[#allocation110_spill]] %s6680_s10  ;;  %s6684_s19 = smov 0  }
  0x7f   :  { %8750 = sst [smem:[#allocation111_spill]] %s6682_s23  ;;  %s6686_s30 = smov 0  }
  0x80   :  { %8751 = sst [smem:[#allocation112_spill]] %s6684_s19  ;;  %s6688_s4 = smov 0  }
  0x81   :  { %8752 = sst [smem:[#allocation113_spill]] %s6686_s30  ;;  %s6690_s20 = smov 0  }
  0x82   :  { %8753 = sst [smem:[#allocation114_spill]] %s6688_s4  ;;  %s6692_s25 = smov 0  }
  0x83   :  { %8754 = sst [smem:[#allocation115_spill]] %s6690_s20  ;;  %s6694_s1 = smov 0  }
  0x84   :  { %8755 = sst [smem:[#allocation116_spill]] %s6692_s25  ;;  %s6696_s16 = smov 0  }
  0x85   :  { %8756 = sst [smem:[#allocation117_spill]] %s6694_s1  ;;  %s6698_s24 = smov 0  }
  0x86   :  { %8757 = sst [smem:[#allocation118_spill]] %s6696_s16  ;;  %s6700_s6 = smov 0  }
  0x87   :  { %8758 = sst [smem:[#allocation119_spill]] %s6698_s24  ;;  %s6702_s27 = smov 0  }
  0x88   :  { %8759 = sst [smem:[#allocation120_spill]] %s6700_s6  ;;  %s6704_s12 = smov 0  }
  0x89   :  { %8760 = sst [smem:[#allocation121_spill]] %s6702_s27  ;;  %s6706_s17 = smov 0  }
  0x8a   :  { %8761 = sst [smem:[#allocation122_spill]] %s6704_s12  ;;  %s6708_s30 = smov 0  }
  0x8b   :  { %8762 = sst [smem:[#allocation123_spill]] %s6706_s17  ;;  %s6710_s4 = smov 0  }
  0x8c   :  { %8763 = sst [smem:[#allocation124_spill]] %s6708_s30  ;;  %s6712_s20 = smov 0  }
  0x8d   :  { %8764 = sst [smem:[#allocation125_spill]] %s6710_s4  ;;  %s6714_s25 = smov 0  }
  0x8e   :  { %8765 = sst [smem:[#allocation126_spill]] %s6712_s20  ;;  %s6716_s1 = smov 0  }
  0x8f   :  { %8766 = sst [smem:[#allocation127_spill]] %s6714_s25  ;;  %s6718_s16 = smov 0  }
  0x90   :  { %8767 = sst [smem:[#allocation128_spill]] %s6716_s1  ;;  %s6720_s24 = smov 0  }
  0x91   :  { %8768 = sst [smem:[#allocation129_spill]] %s6718_s16  ;;  %s6722_s6 = smov 0  }
  0x92   :  { %8769 = sst [smem:[#allocation130_spill]] %s6720_s24  ;;  %s6724_s27 = smov 0  }
  0x93   :  { %8770 = sst [smem:[#allocation131_spill]] %s6722_s6  ;;  %s6726_s12 = smov 0  }
  0x94   :  { %8771 = sst [smem:[#allocation132_spill]] %s6724_s27  ;;  %s6728_s17 = smov 0  }
  0x95   :  { %8772 = sst [smem:[#allocation133_spill]] %s6726_s12  ;;  %s6730_s30 = smov 0  }
  0x96   :  { %s6732_s4 = smov 0   ;;  %s6734_s20 = smov 0  }
  0x97   :  { %s6736_s25 = smov 0   ;;  %s6738_s1 = smov 0  }
  0x98   :  { %s6740_s16 = smov 0   ;;  %s6742_s24 = smov 0  }
  0x99   :  { %8773 = sst [smem:[#allocation134_spill]] %s6742_s24  ;;  %s6744_s6 = smov 0  }
  0x9a   :  { %8774 = sst [smem:[#allocation135_spill]] %s6744_s6  ;;  %s6746_s27 = smov 0  }
  0x9b   :  { %8775 = sst [smem:[#allocation136_spill]] %s6746_s27  ;;  %s6748_s12 = smov 0  }
  0x9c   :  { %8776 = sst [smem:[#allocation137_spill]] %s6748_s12 }
  0x9d LB: > { %s8814_s0 = sld [smem:[#allocation101_spill]]  ;;  %s8815_s18 = sld [smem:[#allocation102_spill]]  ;;  %s6381_s16 = sphi %s6740_s16, %s9317_s16   ;;  %s6377_s1 = sphi %s6738_s1, %s9315_s1   ;;  %s6373_s25 = sphi %s6736_s25, %s9313_s25   ;;  %s6369_s20 = sphi %s6734_s20, %s9311_s20   ;;  %s6365_s4 = sphi %s6732_s4, %s9332_s4   ;;  %s6361_s30 = sphi %s6730_s30, %s9307_s30   ;;  %s6357_s17 = sphi %s6728_s17, %s9305_s17   ;;  %s6225_s15 = sphi %s6662_s15, %s9251_s15   ;;  %s6221_s14 = sphi %s6660_s14, %s9250_s14   ;;  %s6217_s11 = sphi %s6658_s11, %s9249_s11   ;;  %s6213_s7 = sphi %s6656_s7, %s9248_s7   ;;  %s6209_s29 = sphi %s6654_s29, %s9247_s29   ;;  %s6205_s2 = sphi %s6652_s2, %s9246_s2   ;;  %s6201_s28 = sphi %s6650_s28, %s9264_s28   ;;  %s6197_s3 = sphi %s6648_s3, %s9244_s3  }
  0x9e   : > { %s8816_s8 = sld [smem:[#allocation103_spill]]  ;;  %s8817_s22 = sld [smem:[#allocation104_spill]] }
  0x9f   : > { %s8818_s26 = sld [smem:[#allocation105_spill]]  ;;  %s8819_s5 = sld [smem:[#allocation106_spill]] }
  0xa0   : > { %s8820_s13 = sld [smem:[#allocation107_spill]]  ;;  %s8821_s9 = sld [smem:[#allocation108_spill]] }
  0xa1   : > { %s8823_s21 = sld [smem:[#allocation109_spill]]  ;;  %8824 = sst [smem:[#allocation102_spill]] %s6197_s3 }
  0xa2   : > { %s8825_s10 = sld [smem:[#allocation110_spill]]  ;;  %8826 = sst [smem:[#allocation103_spill]] %s6201_s28 }
  0xa3   : > { %8822 = sst [smem:[#allocation101_spill]] %s8814_s0  ;;  %s8827_s23 = sld [smem:[#allocation111_spill]] }
  0xa4   : > { %8828 = sst [smem:[#allocation104_spill]] %s6205_s2  ;;  %s8831_s12 = sld [smem:[#allocation113_spill]] }
  0xa5   : > { %s8829_s19 = sld [smem:[#allocation112_spill]]  ;;  %8830 = sst [smem:[#allocation105_spill]] %s6209_s29 }
  0xa6   : > { %8832 = sst [smem:[#allocation106_spill]] %s6213_s7  ;;  %s8835_s6 = sld [smem:[#allocation115_spill]] }
  0xa7   : > { %s8833_s27 = sld [smem:[#allocation114_spill]]  ;;  %8834 = sst [smem:[#allocation107_spill]] %s6217_s11 }
  0xa8   : > { %8836 = sst [smem:[#allocation108_spill]] %s6221_s14  ;;  %s8839_s3 = sld [smem:[#allocation117_spill]] }
  0xa9   : > { %s8837_s0 = sld [smem:[#allocation116_spill]]  ;;  %8838 = sst [smem:[#allocation109_spill]] %s6225_s15 }
  0xaa   : > { %8840 = sst [smem:[#allocation110_spill]] %s8815_s18  ;;  %s8843_s2 = sld [smem:[#allocation119_spill]] }
  0xab   : > { %s8841_s28 = sld [smem:[#allocation118_spill]]  ;;  %8842 = sst [smem:[#allocation111_spill]] %s8816_s8 }
  0xac   : > { %8844 = sst [smem:[#allocation112_spill]] %s8817_s22  ;;  %s8847_s7 = sld [smem:[#allocation121_spill]] }
  0xad   : > { %s8845_s29 = sld [smem:[#allocation120_spill]]  ;;  %8846 = sst [smem:[#allocation113_spill]] %s8818_s26 }
  0xae   : > { %8848 = sst [smem:[#allocation114_spill]] %s8819_s5  ;;  %s8851_s14 = sld [smem:[#allocation123_spill]] }
  0xaf   : > { %s8849_s11 = sld [smem:[#allocation122_spill]]  ;;  %8850 = sst [smem:[#allocation115_spill]] %s8820_s13 }
  0xb0   : > { %8852 = sst [smem:[#allocation116_spill]] %s8821_s9  ;;  %s8855_s18 = sld [smem:[#allocation125_spill]] }
  0xb1   : > { %s8853_s15 = sld [smem:[#allocation124_spill]]  ;;  %8854 = sst [smem:[#allocation117_spill]] %s8823_s21 }
  0xb2   : > { %8856 = sst [smem:[#allocation118_spill]] %s8825_s10  ;;  %s8859_s22 = sld [smem:[#allocation127_spill]] }
  0xb3   : > { %s8857_s8 = sld [smem:[#allocation126_spill]]  ;;  %8858 = sst [smem:[#allocation119_spill]] %s8827_s23 }
  0xb4   : > { %8860 = sst [smem:[#allocation120_spill]] %s8829_s19  ;;  %s8863_s5 = sld [smem:[#allocation129_spill]] }
  0xb5   : > { %s8861_s26 = sld [smem:[#allocation128_spill]]  ;;  %8862 = sst [smem:[#allocation121_spill]] %s8831_s12 }
  0xb6   : > { %8864 = sst [smem:[#allocation122_spill]] %s8833_s27  ;;  %s8867_s9 = sld [smem:[#allocation131_spill]] }
  0xb7   : > { %s8865_s13 = sld [smem:[#allocation130_spill]]  ;;  %8866 = sst [smem:[#allocation123_spill]] %s8835_s6 }
  0xb8   : > { %8868 = sst [smem:[#allocation131_spill]] %s8837_s0  ;;  %s8869_s24 = sld [smem:[#allocation132_spill]] }
  0xb9   : > { %s8870_s10 = sld [smem:[#allocation133_spill]]  ;;  %8872 = sst [smem:[#allocation132_spill]] %s8843_s2 }
  0xba   : > { %8871 = sst [smem:[#allocation133_spill]] %s8841_s28  ;;  %s8877_s0 = sld [smem:[#allocation134_spill]] }
  0xbb   : > { %8873 = sst [smem:[#allocation124_spill]] %s8847_s7  ;;  %s8878_s28 = sld [smem:[#allocation135_spill]] }
  0xbc   : > { %8874 = sst [smem:[#allocation125_spill]] %s8849_s11  ;;  %s8880_s23 = smov %s8859_s22 }
  0xbd   : > { %8875 = sst [smem:[#allocation126_spill]] %s8853_s15  ;;  %s8881_s2 = sld [smem:[#allocation136_spill]] }
  0xbe   : > { %8876 = sst [smem:[#allocation127_spill]] %s8855_s18  ;;  %s8883_s19 = smov %s8861_s26 }
  0xbf   : > { %8879 = sst [smem:[#allocation135_spill]] %s8859_s22  ;;  %s8884_s7 = sld [smem:[#allocation137_spill]] }
  0xc0   : > { %8882 = sst [smem:[#allocation136_spill]] %s8861_s26  ;;  %s8889_s6 = smov %s8870_s10 }
  0xc1   : > { %8885 = sst [smem:[#allocation137_spill]] %s8865_s13  ;;  %s8897_s12 = smov %s8877_s0 }
  0xc2   : > { %8886 = sst [smem:[#allocation134_spill]] %s8867_s9  ;;  %s8899_s27 = smov %s8878_s28 }
  0xc3   : > { %8887 = sst [smem:[#allocation128_spill]] %s8869_s24  ;;  %s8901_s24 = smov %s8881_s2 }
  0xc4   : > { %8888 = sst [smem:[#allocation129_spill]] %s8870_s10  ;;  %s130_s10 = sadd.s32 1, %s8897_s12 }
  0xc5   : > { %8890 = sst [smem:[#allocation130_spill]] %s6357_s17  ;;  %s133_s11 = sadd.s32 1, %s8899_s27 }
  0xc6   : > { %8891 = sst [smem:[#allocation138_spill]] %s6365_s4  ;;  %p131_p10 = scmp.ge.s32.totalorder %s130_s10, 2 }
  0xc7   : > { %8892 = sst [smem:[#allocation139_spill]] %s6369_s20  ;;  %s137_s15 = sadd.s32 1, %s8901_s24 }
  0xc8   : > { %8893 = sst [smem:[#allocation140_spill]] %s6373_s25  ;;  %s8903_s25 = smov %s8884_s7 }
  0xc9   : > { %8894 = sst [smem:[#allocation141_spill]] %s6377_s1  ;;  %s6907_s9 = sadd.s32 4294967295, %s8903_s25  }
  0xca   : > { %8895 = sst [smem:[#allocation142_spill]] %s6381_s16  ;;  %s9339_s10 = smov (%p131_p10, %s130_s10), 0 }
  0xcb   : > { %8896 = sst [smem:[#allocation143_spill]] %s8877_s0  ;;  %s8905_s1 = smov %s9339_s10 }
  0xcc   : > { %8898 = sst [smem:[#allocation144_spill]] %s8878_s28  ;;  %s9341_s11 = smov (!%p131_p10, %s133_s11), %s8899_s27 }
  0xcd   : > { %8900 = sst [smem:[#allocation145_spill]] %s8881_s2  ;;  %p622_p11 = scmp.ne.s32.totalorder %s6369_s20, %s6365_s4 }
  0xce   : > { %8902 = sst [smem:[#allocation146_spill]] %s8884_s7  ;;  %p623_p12 = scmp.eq.s32.totalorder %s8903_s25, 0 }
  0xcf   : > { %s606_s18 = sld [smem:[#allocation8 + %s8899_s27]]  ;;  %p135_p13 = scmp.ge.s32.totalorder %s9341_s11, 2 }
  0xd0   : > { %8904 = sst [smem:[#allocation147_spill]] %s9339_s10  ;;  %p628_p0 = scmp.ne.s32.totalorder %s6365_s4, %s6361_s30 }
  0xd1   : > { %s8906_s26 = sld [smem:[#allocation128_spill]]  ;;  %p6925_p1 = por %p623_p12, %p622_p11 }
  0xd2   : > { %p8587_p2 = scmp.eq.s32.totalorder %s6907_s9, 0  ;;  %s9343_s11 = smov (%p135_p13, %s9341_s11), 0 }
  0xd3   : > { %s8907_s0 = scalar_select %p6925_p1, 1, 0 }
  0xd4   : > { %8909 = sst [smem:[#allocation148_spill]] %s9343_s11  ;;  %s8910_s13 = smov %s9343_s11 }
  0xd5   : > { %8908 = sst [smem:[#allocation128_spill]] %s8907_s0  ;;  %s9345_s15 = smov (!%p135_p13, %s137_s15), %s8901_s24 }
  0xd6   : > { %s4366_s28 = sshll.u32 %s606_s18, 1  ;;  %s609_s2 = sld [smem:[#allocation8 + %s8910_s13]] }
  0xd7   : > { %p139_p3 = scmp.ge.s32.totalorder %s9345_s15, 2  ;;  %s608_s7 = sadd.s32 %s8897_s12, %s4366_s28 }
  0xd8   : > { %p6937_p4 = por %p8587_p2, %p628_p0  ;;  %s638_s10 = sld [smem:[#allocation8 + %s8899_s27]] }
  0xd9   : > { %s9347_s15 = smov (%p139_p3, %s9345_s15), 0  ;;  %s641_s11 = sld [smem:[#allocation8 + %s8910_s13]] }
  0xda   : > { %s8911_s30 = scalar_select %p6937_p4, 1, 0 }
  0xdb   : > { %8913 = sst [smem:[#allocation150_spill]] %s9347_s15  ;;  %s647_s16 = sadd.s32 1, %s6357_s17 }
  0xdc   : > { %8912 = sst [smem:[#allocation149_spill]] %s8911_s30  ;;  %p654_p5 = scmp.ne.s32.totalorder %s6357_s17, %s8889_s6 }
  0xdd   : > { %p660_p6 = scmp.ne.s32.totalorder %s8889_s6, %s8906_s26  ;;  %s4367_s18 = sshll.u32 %s609_s2, 1 }
  0xde   : > { %s670_s28 = sld [smem:[#allocation8 + %s8899_s27]]  ;;  %s611_s0 = sadd.s32 %s4367_s18, %s8905_s1 }
  0xdf   : > { %s8914_s4 = sld [smem:[#allocation134_spill]]  ;;  %s8915_s24 = sld [smem:[#allocation137_spill]] }
  0xe0   : > { %p6954_p7 = por %p654_p5, %p623_p12  ;;  %s612_s15 = ssub.s32 %s608_s7, %s611_s0 }
  0xe1   : > { %s4368_s22 = sshll.u32 %s638_s10, 1  ;;  %p613_p8 = scmp.eq.s32.totalorder %s612_s15, 0 }
  0xe2   : > { %s8916_s30 = scalar_select %p6954_p7, 1, 0 }
  0xe3   : > { %s640_s26 = sadd.s32 %s8897_s12, %s4368_s22  ;;  %s4369_s2 = sshll.u32 %s641_s11, 1 }
  0xe4   : > { %8917 = sst [smem:[#allocation151_spill]] %s8916_s30  ;;  %p6961_p9 = por %p660_p6, %p8587_p2 }
  0xe5   : > { %s8920_s6 = sadd.s32 1, %s6369_s20  ;;  %s643_s0 = sadd.s32 %s4369_s2, %s8905_s1 }
  0xe6   : > { %s8918_s18 = scalar_select %p6961_p9, 1, 0 }
  0xe7   : > { %s6968_s30 = scalar_select %p613_p8, %s6369_s20, %s8920_s6  }
  0xe8   : > { %8919 = sst [smem:[#allocation152_spill]] %s8918_s18  ;;  %s4370_s7 = sshll.u32 %s670_s28, 1 }
  0xe9   : > { %8921 = sst [smem:[#allocation153_spill]] %s6968_s30  ;;  %s644_s10 = ssub.s32 %s640_s26, %s643_s0 }
  0xea   : > { %s672_s22 = sadd.s32 %s8897_s12, %s4370_s7  ;;  %p645_p10 = scmp.eq.s32.totalorder %s644_s10, 0 }
  0xeb   : > { %s673_s11 = sld [smem:[#allocation8 + %s8910_s13]]  ;;  %s679_s15 = sadd.s32 1, %s8914_s4 }
  0xec   : > { %p686_p11 = scmp.ne.s32.totalorder %s8914_s4, %s8915_s24  ;;  %p692_p0 = scmp.ne.s32.totalorder %s8915_s24, %s8863_s5 }
  0xed   : > { %s6977_s18 = scalar_select %p645_p10, %s6357_s17, %s647_s16  }
  0xee   : > { %p6981_p13 = por %p686_p11, %p623_p12  ;;  %s702_s28 = sld [smem:[#allocation8 + %s8899_s27]] }
  0xef   : > { %8922 = sst [smem:[#allocation154_spill]] %s6977_s18  ;;  %p6991_p3 = por %p692_p0, %p8587_p2 }
  0xf0   : > { %s8923_s6 = scalar_select %p6981_p13, 1, 0 }
  0xf1   : > { %s705_s26 = sld [smem:[#allocation8 + %s8910_s13]]  ;;  %s711_s0 = sadd.s32 1, %s8883_s19 }
  0xf2   : > { %s8924_s2 = scalar_select %p6991_p3, 1, 0 }
  0xf3   : > { %s4371_s16 = sshll.u32 %s673_s11, 1  ;;  %p718_p5 = scmp.ne.s32.totalorder %s8883_s19, %s8880_s23 }
  0xf4   : > { %8925 = sst [smem:[#allocation155_spill]] %s8924_s2  ;;  %s8926_s18 = sld [smem:[#allocation127_spill]] }
  0xf5   : > { %s675_s7 = sadd.s32 %s4371_s16, %s8905_s1  ;;  %s8927_s10 = sld [smem:[#allocation126_spill]] }
  0xf6   : > { %p724_p6 = scmp.ne.s32.totalorder %s8880_s23, %s8857_s8  ;;  %s676_s24 = ssub.s32 %s672_s22, %s675_s7 }
  0xf7   : > { %p7003_p8 = por %p718_p5, %p623_p12  ;;  %p677_p10 = scmp.eq.s32.totalorder %s676_s24, 0 }
  0xf8   : > { %p7009_p11 = por %p724_p6, %p8587_p2  ;;  %s4372_s16 = sshll.u32 %s702_s28, 1 }
  0xf9   : > { %s8928_s5 = scalar_select %p7003_p8, 1, 0 }
  0xfa   : > { %s8930_s11 = scalar_select %p7009_p11, 1, 0 }
  0xfb   : > { %8929 = sst [smem:[#allocation156_spill]] %s8928_s5  ;;  %s4373_s8 = sshll.u32 %s705_s26, 1 }
  0xfc   : > { %8931 = sst [smem:[#allocation157_spill]] %s8930_s11  ;;  %s9349_s4 = smov (!%p677_p10, %s8914_s4), %s679_s15 }
  0xfd   : > { %8932 = sst [smem:[#allocation158_spill]] %s9349_s4  ;;  %s704_s22 = sadd.s32 %s8897_s12, %s4372_s16 }
  0xfe   : > { %s707_s7 = sadd.s32 %s4373_s8, %s8905_s1  ;;  %s8933_s21 = sld [smem:[#allocation125_spill]] }
  0xff   : > { %s708_s30 = ssub.s32 %s704_s22, %s707_s7  ;;  %s734_s23 = sld [smem:[#allocation8 + %s8899_s27]] }
 0x100   : > { %p709_p0 = scmp.eq.s32.totalorder %s708_s30, 0  ;;  %s8934_s24 = sld [smem:[#allocation124_spill]] }
 0x101   : > { %s737_s2 = sld [smem:[#allocation8 + %s8910_s13]]  ;;  %s743_s5 = sadd.s32 1, %s8926_s18 }
 0x102   : > { %p750_p5 = scmp.ne.s32.totalorder %s8926_s18, %s8927_s10  ;;  %p756_p10 = scmp.ne.s32.totalorder %s8927_s10, %s8851_s14 }
 0x103   : > { %s7024_s28 = scalar_select %p709_p0, %s8883_s19, %s711_s0  }
 0x104   : > { %p7028_p6 = por %p750_p5, %p623_p12  ;;  %s766_s26 = sld [smem:[#allocation8 + %s8899_s27]] }
 0x105   : > { %8935 = sst [smem:[#allocation159_spill]] %s7024_s28  ;;  %s4374_s16 = sshll.u32 %s734_s23, 1 }
 0x106   : > { %s8936_s15 = scalar_select %p7028_p6, 1, 0 }
 0x107   : > { %s769_s30 = sld [smem:[#allocation8 + %s8910_s13]]  ;;  %p7038_p11 = por %p756_p10, %p8587_p2 }
 0x108   : > { %s736_s0 = sadd.s32 %s8897_s12, %s4374_s16  ;;  %s4375_s22 = sshll.u32 %s737_s2, 1 }
 0x109   : > { %s8937_s8 = scalar_select %p7038_p11, 1, 0 }
 0x10a   : > { %s739_s7 = sadd.s32 %s4375_s22, %s8905_s1  ;;  %s775_s28 = sadd.s32 1, %s8933_s21 }
 0x10b   : > { %8938 = sst [smem:[#allocation160_spill]] %s8937_s8  ;;  %s740_s14 = ssub.s32 %s736_s0, %s739_s7 }
 0x10c   : > { %s8939_s10 = sld [smem:[#allocation132_spill]]  ;;  %p782_p0 = scmp.ne.s32.totalorder %s8933_s21, %s8934_s24 }
 0x10d   : > { %s8940_s4 = sld [smem:[#allocation133_spill]]  ;;  %p741_p5 = scmp.eq.s32.totalorder %s740_s14, 0 }
 0x10e   : > { %p788_p10 = scmp.ne.s32.totalorder %s8934_s24, %s8845_s29  ;;  %s4376_s23 = sshll.u32 %s766_s26, 1 }
 0x10f   : > { %s4377_s16 = sshll.u32 %s769_s30, 1  ;;  %s9351_s18 = smov (!%p741_p5, %s8926_s18), %s743_s5 }
 0x110   : > { %8941 = sst [smem:[#allocation161_spill]] %s9351_s18  ;;  %s768_s2 = sadd.s32 %s8897_s12, %s4376_s23 }
 0x111   : > { %s8942_s22 = sld [smem:[#allocation131_spill]]  ;;  %s771_s8 = sadd.s32 %s4377_s16, %s8905_s1 }
 0x112   : > { %s772_s0 = ssub.s32 %s768_s2, %s771_s8  ;;  %p7056_p2 = por %p782_p0, %p623_p12 }
 0x113   : > { %p773_p11 = scmp.eq.s32.totalorder %s772_s0, 0  ;;  %p8945_p3 = scmp.eq.s32.totalorder %s6907_s9, 0 }
 0x114   : > { %s8943_s7 = scalar_select %p7056_p2, 1, 0 }
 0x115   : > { %p7062_p9 = por %p788_p10, %p8945_p3  ;;  %s798_s5 = sld [smem:[#allocation8 + %s8899_s27]] }
 0x116   : > { %8944 = sst [smem:[#allocation162_spill]] %s8943_s7  ;;  %s8948_s18 = sld [smem:[#allocation123_spill]] }
 0x117   : > { %s8946_s29 = scalar_select %p7062_p9, 1, 0 }
 0x118   : > { %s801_s24 = sld [smem:[#allocation8 + %s8910_s13]]  ;;  %s9353_s21 = smov (!%p773_p11, %s8933_s21), %s775_s28 }
 0x119   : > { %8947 = sst [smem:[#allocation163_spill]] %s8946_s29  ;;  %s807_s26 = sadd.s32 1, %s8939_s10 }
 0x11a   : > { %8949 = sst [smem:[#allocation164_spill]] %s9353_s21  ;;  %p814_p0 = scmp.ne.s32.totalorder %s8939_s10, %s8940_s4 }
 0x11b   : > { %p820_p5 = scmp.ne.s32.totalorder %s8940_s4, %s8839_s3  ;;  %s830_s30 = sld [smem:[#allocation8 + %s8899_s27]] }
 0x11c   : > { %p7079_p4 = por %p814_p0, %p623_p12  ;;  %s833_s14 = sld [smem:[#allocation8 + %s8910_s13]] }
 0x11d   : > { %p7086_p10 = por %p820_p5, %p8945_p3  ;;  %s8953_s28 = sld [smem:[#allocation122_spill]] }
 0x11e   : > { %s8950_s8 = scalar_select %p7079_p4, 1, 0 }
 0x11f   : > { %s8951_s23 = scalar_select %p7086_p10, 1, 0 }
 0x120   : > { %s839_s16 = sadd.s32 1, %s8942_s22  ;;  %s4378_s2 = sshll.u32 %s798_s5, 1 }
 0x121   : > { %8952 = sst [smem:[#allocation165_spill]] %s8951_s23  ;;  %s4379_s4 = sshll.u32 %s801_s24, 1 }
 0x122   : > { %s800_s3 = sadd.s32 %s8897_s12, %s4378_s2  ;;  %s803_s0 = sadd.s32 %s4379_s4, %s8905_s1 }
 0x123   : > { %s804_s17 = ssub.s32 %s800_s3, %s803_s0  ;;  %s8954_s21 = sld [smem:[#allocation121_spill]] }
 0x124   : > { %p846_p11 = scmp.ne.s32.totalorder %s8942_s22, %s8948_s18  ;;  %s8955_s29 = sld [smem:[#allocation120_spill]] }
 0x125   : > { %p805_p0 = scmp.eq.s32.totalorder %s804_s17, 0  ;;  %s8956_s11 = sld [smem:[#allocation119_spill]] }
 0x126   : > { %s4380_s23 = sshll.u32 %s830_s30, 1  ;;  %s4381_s5 = sshll.u32 %s833_s14, 1 }
 0x127   : > { %s832_s7 = sadd.s32 %s8897_s12, %s4380_s23  ;;  %s9355_s10 = smov (!%p805_p0, %s8939_s10), %s807_s26 }
 0x128   : > { %8957 = sst [smem:[#allocation119_spill]] %s9355_s10  ;;  %s835_s24 = sadd.s32 %s4381_s5, %s8905_s1 }
 0x129   : > { %p7102_p5 = por %p846_p11, %p623_p12  ;;  %s836_s4 = ssub.s32 %s832_s7, %s835_s24 }
 0x12a   : > { %p852_p3 = scmp.ne.s32.totalorder %s8948_s18, %s8953_s28  ;;  %p837_p10 = scmp.eq.s32.totalorder %s836_s4, 0 }
 0x12b   : > { %s8958_s2 = scalar_select %p7102_p5, 1, 0 }
 0x12c   : > { %s8960_s17 = sld [smem:[#allocation118_spill]]  ;;  %p8961_p9 = scmp.eq.s32.totalorder %s6907_s9, 0 }
 0x12d   : > { %8959 = sst [smem:[#allocation122_spill]] %s8958_s2  ;;  %s8964_s26 = sld [smem:[#allocation117_spill]] }
 0x12e   : > { %s862_s30 = sld [smem:[#allocation8 + %s8899_s27]]  ;;  %p7111_p2 = por %p852_p3, %p8961_p9 }
 0x12f   : > { %s865_s23 = sld [smem:[#allocation8 + %s8910_s13]]  ;;  %s9357_s22 = smov (!%p837_p10, %s8942_s22), %s839_s16 }
 0x130   : > { %s8962_s14 = scalar_select %p7111_p2, 1, 0 }
 0x131   : > { %8965 = sst [smem:[#allocation167_spill]] %s9357_s22  ;;  %s871_s3 = sadd.s32 1, %s8954_s21 }
 0x132   : > { %8963 = sst [smem:[#allocation166_spill]] %s8962_s14  ;;  %p878_p11 = scmp.ne.s32.totalorder %s8954_s21, %s8955_s29 }
 0x133   : > { %p884_p0 = scmp.ne.s32.totalorder %s8955_s29, %s8956_s11  ;;  %s894_s7 = sld [smem:[#allocation8 + %s8899_s27]] }
 0x134   : > { %p7127_p5 = por %p878_p11, %p623_p12  ;;  %s897_s28 = sld [smem:[#allocation8 + %s8910_s13]] }
 0x135   : > { %s4382_s0 = sshll.u32 %s862_s30, 1  ;;  %s8968_s5 = sld [smem:[#allocation116_spill]] }
 0x136   : > { %s8966_s18 = scalar_select %p7127_p5, 1, 0 }
 0x137   : > { %p7134_p10 = por %p884_p0, %p8961_p9  ;;  %s864_s24 = sadd.s32 %s8897_s12, %s4382_s0 }
 0x138   : > { %8967 = sst [smem:[#allocation168_spill]] %s8966_s18  ;;  %s4383_s11 = sshll.u32 %s865_s23, 1 }
 0x139   : > { %s8969_s16 = scalar_select %p7134_p10, 1, 0 }
 0x13a   : > { %s867_s29 = sadd.s32 %s4383_s11, %s8905_s1  ;;  %s903_s4 = sadd.s32 1, %s8960_s17 }
 0x13b   : > { %8970 = sst [smem:[#allocation116_spill]] %s8969_s16  ;;  %s868_s10 = ssub.s32 %s864_s24, %s867_s29 }
 0x13c   : > { %s8971_s22 = sld [smem:[#allocation115_spill]]  ;;  %p910_p3 = scmp.ne.s32.totalorder %s8960_s17, %s8964_s26 }
 0x13d   : > { %s8972_s14 = sld [smem:[#allocation114_spill]]  ;;  %p869_p11 = scmp.eq.s32.totalorder %s868_s10, 0 }
 0x13e   : > { %s8973_s30 = sld [smem:[#allocation113_spill]]  ;;  %s4384_s2 = sshll.u32 %s894_s7, 1 }
 0x13f   : > { %s896_s19 = sadd.s32 %s8897_s12, %s4384_s2  ;;  %s4385_s0 = sshll.u32 %s897_s28, 1 }
 0x140   : > { %s9359_s21 = smov (!%p869_p11, %s8954_s21), %s871_s3  ;;  %s899_s23 = sadd.s32 %s4385_s0, %s8905_s1 }
 0x141   : > { %8974 = sst [smem:[#allocation113_spill]] %s9359_s21  ;;  %p7150_p0 = por %p910_p3, %p623_p12 }
 0x142   : > { %s900_s11 = ssub.s32 %s896_s19, %s899_s23  ;;  %p916_p9 = scmp.ne.s32.totalorder %s8964_s26, %s8968_s5 }
 0x143   : > { %s8975_s24 = scalar_select %p7150_p0, 1, 0 }
 0x144   : > { %p901_p10 = scmp.eq.s32.totalorder %s900_s11, 0  ;;  %s8977_s10 = sld [smem:[#allocation112_spill]] }
 0x145   : > { %8976 = sst [smem:[#allocation169_spill]] %s8975_s24  ;;  %p8978_p2 = scmp.eq.s32.totalorder %s6907_s9, 0 }
 0x146   : > { %s926_s7 = sld [smem:[#allocation8 + %s8899_s27]]  ;;  %s9361_s17 = smov (!%p901_p10, %s8960_s17), %s903_s4 }
 0x147   : > { %p7159_p8 = por %p916_p9, %p8978_p2  ;;  %s8981_s3 = sld [smem:[#allocation111_spill]] }
 0x148   : > { %s929_s28 = sld [smem:[#allocation8 + %s8910_s13]]  ;;  %s935_s29 = sadd.s32 1, %s8971_s22 }
 0x149   : > { %s8979_s2 = scalar_select %p7159_p8, 1, 0 }
 0x14a   : > { %8982 = sst [smem:[#allocation171_spill]] %s9361_s17  ;;  %p942_p3 = scmp.ne.s32.totalorder %s8971_s22, %s8972_s14 }
 0x14b   : > { %8980 = sst [smem:[#allocation170_spill]] %s8979_s2  ;;  %p948_p11 = scmp.ne.s32.totalorder %s8972_s14, %s8973_s30 }
 0x14c   : > { %s958_s19 = sld [smem:[#allocation8 + %s8899_s27]]  ;;  %p7175_p0 = por %p942_p3, %p623_p12 }
 0x14d   : > { %s961_s5 = sld [smem:[#allocation8 + %s8910_s13]]  ;;  %s4386_s0 = sshll.u32 %s926_s7, 1 }
 0x14e   : > { %s8983_s26 = scalar_select %p7175_p0, 1, 0 }
 0x14f   : > { %s8985_s23 = sld [smem:[#allocation110_spill]]  ;;  %p7182_p10 = por %p948_p11, %p8978_p2 }
 0x150   : > { %8984 = sst [smem:[#allocation172_spill]] %s8983_s26  ;;  %s928_s11 = sadd.s32 %s8897_s12, %s4386_s0 }
 0x151   : > { %s8986_s4 = scalar_select %p7182_p10, 1, 0 }
 0x152   : > { %s4387_s14 = sshll.u32 %s929_s28, 1  ;;  %s967_s21 = sadd.s32 1, %s8977_s10 }
 0x153   : > { %8987 = sst [smem:[#allocation110_spill]] %s8986_s4  ;;  %s931_s30 = sadd.s32 %s4387_s14, %s8905_s1 }
 0x154   : > { %s932_s17 = ssub.s32 %s928_s11, %s931_s30  ;;  %s8988_s2 = sld [smem:[#allocation109_spill]] }
 0x155   : > { %p974_p9 = scmp.ne.s32.totalorder %s8977_s10, %s8981_s3  ;;  %s8989_s16 = sld [smem:[#allocation108_spill]] }
 0x156   : > { %p933_p3 = scmp.eq.s32.totalorder %s932_s17, 0  ;;  %s8990_s7 = sld [smem:[#allocation107_spill]] }
 0x157   : > { %s4388_s24 = sshll.u32 %s958_s19, 1  ;;  %s4389_s0 = sshll.u32 %s961_s5, 1 }
 0x158   : > { %s960_s26 = sadd.s32 %s8897_s12, %s4388_s24  ;;  %s9363_s22 = smov (!%p933_p3, %s8971_s22), %s935_s29 }
 0x159   : > { %8991 = sst [smem:[#allocation107_spill]] %s9363_s22  ;;  %s963_s28 = sadd.s32 %s4389_s0, %s8905_s1 }
 0x15a   : > { %p7198_p11 = por %p974_p9, %p623_p12  ;;  %s964_s14 = ssub.s32 %s960_s26, %s963_s28 }
 0x15b   : > { %p980_p2 = scmp.ne.s32.totalorder %s8981_s3, %s8985_s23  ;;  %p965_p10 = scmp.eq.s32.totalorder %s964_s14, 0 }
 0x15c   : > { %s8992_s11 = scalar_select %p7198_p11, 1, 0 }
 0x15d   : > { %s8994_s17 = sld [smem:[#allocation106_spill]]  ;;  %p8995_p8 = scmp.eq.s32.totalorder %s6907_s9, 0 }
 0x15e   : > { %8993 = sst [smem:[#allocation173_spill]] %s8992_s11  ;;  %s9365_s10 = smov (!%p965_p10, %s8977_s10), %s967_s21 }
 0x15f   : > { %s990_s19 = sld [smem:[#allocation8 + %s8899_s27]]  ;;  %p7207_p7 = por %p980_p2, %p8995_p8 }
 0x160   : > { %s8998_s29 = sld [smem:[#allocation105_spill]]  ;;  %8999 = sst [smem:[#allocation175_spill]] %s9365_s10 }
 0x161   : > { %s8996_s24 = scalar_select %p7207_p7, 1, 0 }
 0x162   : > { %s993_s5 = sld [smem:[#allocation8 + %s8910_s13]]  ;;  %s999_s30 = sadd.s32 1, %s8988_s2 }
 0x163   : > { %8997 = sst [smem:[#allocation174_spill]] %s8996_s24  ;;  %p1006_p9 = scmp.ne.s32.totalorder %s8988_s2, %s8989_s16 }
 0x164   : > { %p1012_p3 = scmp.ne.s32.totalorder %s8989_s16, %s8990_s7  ;;  %s1022_s3 = sld [smem:[#allocation8 + %s8899_s27]] }
 0x165   : > { %p7223_p11 = por %p1006_p9, %p623_p12  ;;  %s1025_s23 = sld [smem:[#allocation8 + %s8910_s13]] }
 0x166   : > { %s4390_s0 = sshll.u32 %s990_s19, 1  ;;  %s9002_s28 = sld [smem:[#allocation104_spill]] }
 0x167   : > { %s9000_s26 = scalar_select %p7223_p11, 1, 0 }
 0x168   : > { %p7230_p10 = por %p1012_p3, %p8995_p8  ;;  %s992_s14 = sadd.s32 %s8897_s12, %s4390_s0 }
 0x169   : > { %9001 = sst [smem:[#allocation176_spill]] %s9000_s26  ;;  %s9005_s16 = sld [smem:[#allocation150_spill]] }
 0x16a   : > { %s9003_s21 = scalar_select %p7230_p10, 1, 0 }
 0x16b   : > { %s9006_s7 = sld [smem:[#allocation145_spill]]  ;;  %s4391_s22 = sshll.u32 %s993_s5, 1 }
 0x16c   : > { %9004 = sst [smem:[#allocation104_spill]] %s9003_s21  ;;  %s995_s10 = sadd.s32 %s4391_s22, %s8905_s1 }
 0x16d   : > { %s1031_s24 = sadd.s32 1, %s8994_s17  ;;  %s996_s4 = ssub.s32 %s992_s14, %s995_s10 }
 0x16e   : > { %s9007_s11 = sld [smem:[#allocation103_spill]]  ;;  %p1038_p2 = scmp.ne.s32.totalorder %s8994_s17, %s8998_s29 }
 0x16f   : > { %s9008_s13 = sld [smem:[#allocation102_spill]]  ;;  %p997_p9 = scmp.eq.s32.totalorder %s996_s4, 0 }
 0x170   : > { %s4392_s19 = sshll.u32 %s1022_s3, 1  ;;  %s9009_s18 = sld [smem:[#allocation101_spill]] }
 0x171   : > { %s1024_s26 = sadd.s32 %s8897_s12, %s4392_s19  ;;  %s4393_s0 = sshll.u32 %s1025_s23, 1 }
 0x172   : > { %s9367_s2 = smov (!%p997_p9, %s8988_s2), %s999_s30  ;;  %s1027_s22 = sadd.s32 %s4393_s0, %s8905_s1 }
 0x173   : > { %9010 = sst [smem:[#allocation177_spill]] %s9367_s2  ;;  %p7246_p3 = por %p1038_p2, %p623_p12 }
 0x174   : > { %s1028_s5 = ssub.s32 %s1024_s26, %s1027_s22  ;;  %p1044_p8 = scmp.ne.s32.totalorder %s8998_s29, %s9002_s28 }
 0x175   : > { %s9011_s10 = scalar_select %p7246_p3, 1, 0 }
 0x176   : > { %p1029_p10 = scmp.eq.s32.totalorder %s1028_s5, 0  ;;  %s1054_s4 = ssub.s32 %s9006_s7, %s9005_s16 }
 0x177   : > { %p9012_p7 = scmp.eq.s32.totalorder %s6907_s9, 0  ;;  %p1055_p0 = scmp.eq.s32.totalorder %s1054_s4, 0 }
 0x178   : > { %s9369_s17 = smov (!%p1029_p10, %s8994_s17), %s1031_s24  ;;  %s1057_s30 = sadd.s32 1, %s9007_s11 }
 0x179   : > { %p7256_p11 = por %p1044_p8, %p9012_p7  ;;  %9014 = sst [smem:[#allocation178_spill]] %s9369_s17 }
 0x17a   : > { %s9015_s23 = sld [smem:[#allocation70_spill]]  ;;  %p1067_p12 = scmp.ne.s32.totalorder %s9007_s11, %s9008_s13 }
 0x17b   : > { %s9013_s3 = scalar_select %p7256_p11, 1, 0 }
 0x17c   : > { %s9371_s11 = smov (!%p1055_p0, %s9007_s11), %s1057_s30  ;;  %p1068_p2 = scmp.eq.s32.totalorder %s6907_s9, 7 }
 0x17d   : > { %9017 = sst [smem:[#allocation179_spill]] %s9371_s11  ;;  %p1073_p9 = scmp.ne.s32.totalorder %s9008_s13, %s9009_s18 }
 0x17e   : > { %s9018_s29 = sadd.s32 4294967294, %s8903_s25   ;;  %p4394_p5 = scmp.ge.s32.totalorder %s8903_s25, 1 }
 0x17f   : > { %p1074_p3 = scmp.eq.s32.totalorder %s9018_s29, 7  ;;  %p7275_p7 = por %p1068_p2, %p1067_p12 }
 0x180   : > { %s9016_s21 = smov %s9015_s23  ;;  %p1107_p8 = scmp.lt.s32.totalorder %s8903_s25, 9 }
 0x181   : > { %s9019_s26 = scalar_select %p7275_p7, 1, 0 }
 0x182   : > { %p7280_p10 = por %p1074_p3, %p1073_p9  ;;  %p7284_p11 = pnand %p4394_p5, %p1107_p8 }
 0x183   : > { %9020 = sst [smem:[#allocation180_spill]] %s9019_s26  ;;  %s6435_s14 = smov [#allocation9]  }
 0x184   : > { %s9021_s24 = scalar_select %p7280_p10, 1, 0 }
 0x185   : > { %s9023_s28 = scalar_select %p7284_p11, 1, 0 }
 0x186   : > { %9022 = sst [smem:[#allocation181_spill]] %s9021_s24  ;;  %s1120_s13 = sshll.u32 %s6435_s14, 4  ;;  %s1121_s13 = int_to_ptr.vmem [resolvable:$true] %s1120_s13 }
 0x187   : > { %p4867_p0 = pneg %p7284_p11  ;;  %p9024_p4 = scmp.eq.s32.totalorder %s6907_s9, 0 }
 0x188   : > { %s5437_s16 = scalar_lea.hbm %s9015_s23, 128 }
 0x189   : > { %p7292_p12 = pnand %p4867_p0, %p9024_p4  ;;  %p5438_p3 = scmp.ne.s32.totalorder %s9016_s21, %s5437_s16 }
 0x18a   : > { %p5444_p8 = scmp.lt.u32.totalorder %s5437_s16, %s9016_s21 }
 0x18b   : > { %p5439_p2 = pneg %p7292_p12 }
 0x18d   : > { %p5440_p5 = pnand %p5439_p2, %p5438_p3 }
 0x18f   : > { %p5441_p9 = pneg %p5440_p5 }
 0x191   : > { %p5446_p10 = pnand %p5444_p8, %p5441_p9 }
 0x193   : > { %5449 = shalt.err (!%p5446_p10)
}
 0x194   : > { %s5450_s7 = scalar_lea.vmem %s1121_s13, 128  ;;  %p5458_p13 = scmp.lt.s32.totalorder %s1121_s13, %s1121_s13 }
 0x195   : > { %p5451_p7 = scmp.ne.s32.totalorder %s1121_s13, %s5450_s7  ;;  %p5459_p1 = scmp.lt.s32.totalorder %s5450_s7, %s5450_s7 }
 0x197   : > { %p5453_p6 = pnand %p5451_p7, %p5439_p2  ;;  %p5460_p4 = por %p5459_p1, %p5458_p13 }
 0x199   : > { %p5454_p11 = pneg %p5453_p6 }
 0x19b   : > { %p5461_p0 = pnand %p5460_p4, %p5454_p11 }
 0x19d   : > { %5464 = shalt.err (!%p5461_p0)
}
 0x19e   : > { %4870 = dma.hbm_to_vmem [thread:$0]  (!%p7292_p12), %s9016_s21, 128, %s1121_s13, [#allocation10]  }
 0x19f   : > { %p4396_p3 = scmp.ge.s32.totalorder %s8903_s25, 8 }
 0x1a0   : > { %s9026_s19 = sld [smem:[#allocation128_spill]] (!%p4396_p3)  ;;  %s9027_s0 = sld [smem:[#allocation134_spill]] (!%p4396_p3) }
 0x1a1   : > { %1127 = sbr.rel (%p4396_p3) target bundleno = 884 (0x374), region = 20  ;;  %s1273_s22 = sand.u32 (!%p4396_p3), 1, %s6369_s20  }
 0x1a2   : > { %s9028_s5 = sld [smem:[#allocation85_spill]] (!%p4396_p3)  ;;  %s7307_s4 = sand.u32 (!%p4396_p3), 1, %s8903_s25  }
 0x1a3   : > { %s9031_s30 = sld [smem:[#allocation127_spill]] (!%p4396_p3)  ;;  %s1274_s14 = scalar_lea.vmem (!%p4396_p3), [#allocation12], %s1273_s22 }
 0x1a4   : > { %s1284_s13 = sshll.u32 (!%p4396_p3), %s1274_s14, 4  ;;  %p9032_p13 = scmp.ne.s32.totalorder (!%p4396_p3), %s8923_s6, 0  ;;  %s7315_s13 = int_to_ptr.vmem [resolvable:$true] %s1284_s13 }
 0x1a6   : > { %p9030_p1 = scmp.ne.s32.totalorder (!%p4396_p3), %s9026_s19, 0  ;;  %s1313_s16 = sand.u32 (!%p4396_p3), 1, %s9027_s0  }
 0x1a7   : > { %s7317_s7 = sshll.u32 (!%p4396_p3), %s1313_s16, 4 }
 0x1a8   : > { %s9029_s24 = smov %s9028_s5 }
 0x1a9   : > { %s4805_s23 = scalar_select %p9030_p1, [#allocation8], [#allocation36] }
 0x1aa   : > { %s4806_s29 = scalar_select %p9030_p1, %s8899_s27, 0 }
 0x1ab   : > { %s4811_s21 = scalar_select %p9032_p13, [#allocation8], [#allocation38] }
 0x1ac   : > { %s1275_s18 = sld [smem:[%s4805_s23 + %s4806_s29]]  ;;  %s8658_s23 = scalar_lea.sflag [#allocation13], %s7307_s4 }
 0x1ad   : > { %s4812_s1 = scalar_select %p9032_p13, %s8899_s27, 0 }
 0x1ae   : > { %s5469_s14 = scalar_lea.hbm %s9029_s24, 32 }
 0x1af   : > { %s7325_s17 = sld [smem:[%s4811_s21 + %s4812_s1]] }
 0x1b2   : > { %s4397_s20 = sshll.u32 %s1275_s18, 1 }
 0x1b3   : > { %s1277_s2 = sadd.s32 %s8897_s12, %s4397_s20 }
 0x1b4   : > { %s4398_s11 = sshll.u32 %s1277_s2, 4 }
 0x1b5   : > { %s7328_s22 = scalar_lea.hbm %s9028_s5, %s4398_s11 }
 0x1b6   : > { %s5465_s29 = scalar_lea.hbm %s7328_s22, 16  ;;  %p5470_p10 = scmp.lt.u32.totalorder %s7328_s22, %s9029_s24 }
 0x1b7   : > { %p5466_p6 = scmp.ne.s32.totalorder %s7328_s22, %s5465_s29  ;;  %p5471_p12 = scmp.lt.u32.totalorder %s5469_s14, %s5465_s29 }
 0x1b8   : > { %p5473_p5 = scmp.lt.u32.totalorder %s5465_s29, %s7328_s22 }
 0x1b9   : > { %p5467_p11 = pnand %p5466_p6, %p9030_p1  ;;  %p5472_p2 = por %p5471_p12, %p5470_p10 }
 0x1bb   : > { %p5468_p7 = pneg %p5467_p11  ;;  %p5474_p9 = por %p5473_p5, %p5472_p2 }
 0x1bd   : > { %p5475_p8 = pnand %p5474_p9, %p5468_p7 }
 0x1bf   : > { %5478 = shalt.err (!%p5475_p8)
}
 0x1c0   : > { %s5479_s20 = scalar_lea.vmem %s7315_s13, 16  ;;  %s6436_s1 = smov [#allocation12]  }
 0x1c1   : > { %p5480_p4 = scmp.ne.s32.totalorder %s7315_s13, %s5479_s20  ;;  %s5483_s2 = sshll.u32 %s6436_s1, 4  ;;  %s5484_s2 = int_to_ptr.vmem [resolvable:$false] %s5483_s2 }
 0x1c2   : > { %s5485_s11 = scalar_lea.vmem %s5484_s2, 32  ;;  %p5486_p6 = scmp.lt.s32.totalorder %s7315_s13, %s5484_s2 }
 0x1c3   : > { %p5481_p0 = pnand %p5480_p4, %p9030_p1  ;;  %p5487_p11 = scmp.lt.s32.totalorder %s5485_s11, %s5479_s20 }
 0x1c5   : > { %p5482_p3 = pneg %p5481_p0  ;;  %p5488_p10 = por %p5487_p11, %p5486_p6 }
 0x1c7   : > { %p5489_p12 = pnand %p5488_p10, %p5482_p3 }
 0x1c9   : > { %5492 = shalt.err (!%p5489_p12)
}
 0x1ca   : > { %s9033_s21 = sld [smem:[#allocation132_spill]]  ;;  %s9034_s5 = sld [smem:[#allocation87_spill]] }
 0x1cb   : > { %4807 = dma.hbm_to_vmem [thread:$0]  (%p9030_p1), %s7328_s22, 16, %s7315_s13, %s8658_s23  }
 0x1cc   : > { %s1315_s18 = scalar_lea.vmem [#allocation15], %s7317_s7  ;;  %s9036_s29 = sand.u32 1, %s9031_s30  }
 0x1cd   : > { %s1325_s16 = sshll.u32 %s1315_s18, 4  ;;  %s4409_s14 = sshll.u32 %s9036_s29, 4  ;;  %s7357_s16 = int_to_ptr.vmem [resolvable:$true] %s1325_s16 }
 0x1ce   : > { %s4402_s19 = sshll.u32 %s7325_s17, 1  ;;  %s1363_s11 = scalar_lea.vmem [#allocation18], %s4409_s14 }
 0x1cf   : > { %s1318_s1 = sadd.s32 %s8897_s12, %s4402_s19  ;;  %s7359_s24 = sshll.u32 %s1363_s11, 4  ;;  %s7401_s24 = int_to_ptr.vmem [resolvable:$true] %s7359_s24 }
 0x1d0   : > { %s9035_s0 = smov %s9034_s5  ;;  %s1409_s20 = sand.u32 1, %s9033_s21  }
 0x1d1   : > { %s4542_s2 = sshll.u32 %s1318_s1, 8  ;;  %s8660_s13 = scalar_lea.sflag [#allocation16], %s7307_s4 }
 0x1d2   : > { %s7362_s25 = scalar_lea.hbm %s9034_s5, %s4542_s2  ;;  %s5497_s17 = scalar_lea.hbm %s9035_s0, 512 }
 0x1d3   : > { %s5493_s7 = scalar_lea.hbm %s7362_s25, 256  ;;  %p5498_p5 = scmp.lt.u32.totalorder %s7362_s25, %s9035_s0 }
 0x1d4   : > { %p5494_p1 = scmp.ne.s32.totalorder %s7362_s25, %s5493_s7  ;;  %p5499_p9 = scmp.lt.u32.totalorder %s5497_s17, %s5493_s7 }
 0x1d5   : > { %p5501_p4 = scmp.lt.u32.totalorder %s5493_s7, %s7362_s25 }
 0x1d6   : > { %p5495_p7 = pnand %p5494_p1, %p9032_p13  ;;  %p5500_p8 = por %p5499_p9, %p5498_p5 }
 0x1d8   : > { %p5496_p2 = pneg %p5495_p7  ;;  %p5502_p0 = por %p5501_p4, %p5500_p8 }
 0x1da   : > { %p5503_p3 = pnand %p5502_p0, %p5496_p2 }
 0x1dc   : > { %5506 = shalt.err (!%p5503_p3)
}
 0x1dd   : > { %s5507_s30 = scalar_lea.vmem %s7357_s16, 256  ;;  %s6437_s22 = smov [#allocation15]  }
 0x1de   : > { %p5508_p6 = scmp.ne.s32.totalorder %s7357_s16, %s5507_s30  ;;  %s5511_s5 = sshll.u32 %s6437_s22, 4  ;;  %s5512_s5 = int_to_ptr.vmem [resolvable:$false] %s5511_s5 }
 0x1df   : > { %s5513_s18 = scalar_lea.vmem %s5512_s5, 512  ;;  %p5514_p12 = scmp.lt.s32.totalorder %s7357_s16, %s5512_s5 }
 0x1e0   : > { %p5509_p11 = pnand %p5508_p6, %p9032_p13  ;;  %p5515_p1 = scmp.lt.s32.totalorder %s5513_s18, %s5507_s30 }
 0x1e2   : > { %p5510_p10 = pneg %p5509_p11  ;;  %p5516_p7 = por %p5515_p1, %p5514_p12 }
 0x1e4   : > { %p5517_p5 = pnand %p5516_p7, %p5510_p10 }
 0x1e6   : > { %5520 = shalt.err (!%p5517_p5)
}
 0x1e7   : > { %s8662_s29 = smov 64   ;;  %s9037_s14 = sld [smem:[#allocation121_spill]] }
 0x1e8   : > { %s9038_s19 = sld [smem:[#allocation168_spill]]  ;;  %s8664_s1 = smov 4  }
 0x1e9   : > { %4813 = dma.hbm_to_vmem [thread:$0]  (%p9032_p13), %s7362_s25, 256, %s7357_s16, %s8660_s13, %s8662_s29, %s8662_s29, %s8664_s1  }
 0x1ea   : > { %p9039_p2 = scmp.ne.s32.totalorder %s8936_s15, 0  ;;  %s9040_s11 = sld [smem:[#allocation115_spill]] }
 0x1eb   : > { %p9041_p9 = scmp.ne.s32.totalorder %s8950_s8, 0  ;;  %s9042_s17 = sld [smem:[#allocation89_spill]] }
 0x1ec   : > { %s4817_s2 = scalar_select %p9039_p2, [#allocation8], [#allocation40] }
 0x1ed   : > { %s4818_s7 = scalar_select %p9039_p2, %s8899_s27, 0 }
 0x1ee   : > { %s4823_s30 = scalar_select %p9041_p9, [#allocation8], [#allocation42] }
 0x1ef   : > { %s1364_s5 = sld [smem:[%s4817_s2 + %s4818_s7]]  ;;  %s1410_s18 = scalar_lea.vmem [#allocation21], %s1409_s20 }
 0x1f0   : > { %s1420_s23 = sshll.u32 %s1410_s18, 4  ;;  %s1449_s0 = sand.u32 1, %s9037_s14   ;;  %s7405_s23 = int_to_ptr.vmem [resolvable:$true] %s1420_s23 }
 0x1f1   : > { %s9043_s22 = smov %s9042_s17  ;;  %s7407_s16 = sshll.u32 %s1449_s0, 4 }
 0x1f2   : > { %s4824_s6 = scalar_select %p9041_p9, %s8899_s27, 0 }
 0x1f3   : > { %s5525_s0 = scalar_lea.hbm %s9043_s22, 512 }
 0x1f4   : > { %s7403_s25 = sld [smem:[%s4823_s30 + %s4824_s6]]  ;;  %s8661_s30 = scalar_lea.sflag [#allocation19], %s7307_s4 }
 0x1f5   : > { %s4410_s2 = sshll.u32 %s1364_s5, 1 }
 0x1f6   : > { %s1366_s20 = sadd.s32 %s8897_s12, %s4410_s2 }
 0x1f7   : > { %s4544_s7 = sshll.u32 %s1366_s20, 8 }
 0x1f8   : > { %s7414_s13 = scalar_lea.hbm %s9042_s17, %s4544_s7 }
 0x1f9   : > { %s5521_s6 = scalar_lea.hbm %s7414_s13, 256  ;;  %p5526_p3 = scmp.lt.u32.totalorder %s7414_s13, %s9043_s22 }
 0x1fa   : > { %s4417_s14 = sshll.u32 %s7403_s25, 1  ;;  %p5522_p8 = scmp.ne.s32.totalorder %s7414_s13, %s5521_s6 }
 0x1fb   : > { %p5527_p6 = scmp.lt.u32.totalorder %s5525_s0, %s5521_s6  ;;  %p5529_p10 = scmp.lt.u32.totalorder %s5521_s6, %s7414_s13 }
 0x1fc   : > { %p5523_p4 = pnand %p5522_p8, %p9039_p2 }
 0x1fd   : > { %p5528_p11 = por %p5527_p6, %p5526_p3 }
 0x1fe   : > { %p5524_p0 = pneg %p5523_p4 }
 0x1ff   : > { %p5530_p12 = por %p5529_p10, %p5528_p11 }
 0x201   : > { %p5531_p1 = pnand %p5530_p12, %p5524_p0 }
 0x203   : > { %5534 = shalt.err (!%p5531_p1)
}
 0x204   : > { %s5535_s17 = scalar_lea.vmem %s7401_s24, 256  ;;  %s6440_s5 = smov [#allocation18]  }
 0x205   : > { %p5536_p7 = scmp.ne.s32.totalorder %s7401_s24, %s5535_s17  ;;  %s5539_s2 = sshll.u32 %s6440_s5, 4  ;;  %s5540_s2 = int_to_ptr.vmem [resolvable:$false] %s5539_s2 }
 0x206   : > { %s5541_s20 = scalar_lea.vmem %s5540_s2, 512  ;;  %p5542_p8 = scmp.lt.s32.totalorder %s7401_s24, %s5540_s2 }
 0x207   : > { %p5537_p5 = pnand %p5536_p7, %p9039_p2  ;;  %p5543_p4 = scmp.lt.s32.totalorder %s5541_s20, %s5535_s17 }
 0x209   : > { %p5538_p13 = pneg %p5537_p5  ;;  %p5544_p3 = por %p5543_p4, %p5542_p8 }
 0x20b   : > { %p5545_p6 = pnand %p5544_p3, %p5538_p13 }
 0x20d   : > { %5548 = shalt.err (!%p5545_p6)
}
 0x20e   : > { %s9045_s7 = sld [smem:[#allocation91_spill]]  ;;  %s1413_s0 = sadd.s32 %s8897_s12, %s4417_s14 }
 0x20f   : > { %4819 = dma.hbm_to_vmem [thread:$0]  (%p9039_p2), %s7414_s13, 256, %s7401_s24, %s8661_s30, %s8662_s29, %s8662_s29, %s8664_s1  }
 0x210   : > { %s4418_s17 = sshll.u32 %s1413_s0, 4  ;;  %s1451_s15 = scalar_lea.vmem [#allocation24], %s7407_s16 }
 0x211   : > { %s7444_s5 = sshll.u32 %s1451_s15, 4  ;;  %s8666_s20 = scalar_lea.sflag [#allocation22], %s7307_s4  ;;  %s7476_s5 = int_to_ptr.vmem [resolvable:$true] %s7444_s5 }
 0x214   : > { %s9046_s6 = smov %s9045_s7  ;;  %s1418_s2 = scalar_lea.hbm %s9045_s7, %s4418_s17 }
 0x215   : > { %s5549_s18 = scalar_lea.hbm %s1418_s2, 16  ;;  %s5553_s21 = scalar_lea.hbm %s9046_s6, 32 }
 0x216   : > { %p5550_p13 = scmp.ne.s32.totalorder %s1418_s2, %s5549_s18  ;;  %p5554_p10 = scmp.lt.u32.totalorder %s1418_s2, %s9046_s6 }
 0x217   : > { %p5555_p12 = scmp.lt.u32.totalorder %s5553_s21, %s5549_s18  ;;  %p5557_p7 = scmp.lt.u32.totalorder %s5549_s18, %s1418_s2 }
 0x218   : > { %p5551_p0 = pnand %p5550_p13, %p9041_p9 }
 0x219   : > { %p5556_p1 = por %p5555_p12, %p5554_p10 }
 0x21a   : > { %p5552_p11 = pneg %p5551_p0 }
 0x21b   : > { %p5558_p5 = por %p5557_p7, %p5556_p1 }
 0x21d   : > { %p5559_p2 = pnand %p5558_p5, %p5552_p11 }
 0x21f   : > { %5562 = shalt.err (!%p5559_p2)
}
 0x220   : > { %s5563_s24 = scalar_lea.vmem %s7405_s23, 16  ;;  %s6441_s13 = smov [#allocation21]  }
 0x221   : > { %p5564_p8 = scmp.ne.s32.totalorder %s7405_s23, %s5563_s24  ;;  %s5567_s25 = sshll.u32 %s6441_s13, 4  ;;  %s5568_s25 = int_to_ptr.vmem [resolvable:$false] %s5567_s25 }
 0x222   : > { %s5569_s16 = scalar_lea.vmem %s5568_s25, 32  ;;  %p5570_p6 = scmp.lt.s32.totalorder %s7405_s23, %s5568_s25 }
 0x223   : > { %p5565_p4 = pnand %p5564_p8, %p9041_p9  ;;  %p5571_p13 = scmp.lt.s32.totalorder %s5569_s16, %s5563_s24 }
 0x225   : > { %p5566_p3 = pneg %p5565_p4  ;;  %p5572_p0 = por %p5571_p13, %p5570_p6 }
 0x227   : > { %p5573_p10 = pnand %p5572_p0, %p5566_p3 }
 0x229   : > { %5576 = shalt.err (!%p5573_p10)
}
 0x22a   : > { %s9047_s21 = sld [smem:[#allocation172_spill]]  ;;  %s9048_s18 = sld [smem:[#allocation109_spill]] }
 0x22b   : > { %s9049_s14 = sld [smem:[#allocation130_spill]]  ;;  %s9050_s7 = sld [smem:[#allocation176_spill]] }
 0x22c   : > { %4825 = dma.hbm_to_vmem [thread:$0]  (%p9041_p9), %s1418_s2, 16, %s7405_s23, %s8666_s20  }
 0x22d   : > { %p9051_p11 = scmp.ne.s32.totalorder %s9038_s19, 0  ;;  %s9053_s8 = sld [smem:[#allocation93_spill]] }
 0x22e   : > { %s9056_s25 = sand.u32 1, %s9040_s11  }
 0x22f   : > { %s4830_s0 = scalar_select %p9051_p11, %s8899_s27, 0 }
 0x230   : > { %p9052_p12 = scmp.ne.s32.totalorder %s9047_s21, 0  ;;  %s1498_s16 = scalar_lea.vmem [#allocation27], %s9056_s25 }
 0x231   : > { %s9055_s15 = scalar_select %p9051_p11, [#allocation8], [#allocation44] }
 0x232   : > { %s4835_s17 = scalar_select %p9052_p12, [#allocation8], [#allocation46] }
 0x233   : > { %s9054_s24 = smov %s9053_s8  ;;  %s1452_s13 = sld [smem:[%s9055_s15 + %s4830_s0]] }
 0x234   : > { %s1508_s30 = sshll.u32 %s1498_s16, 4  ;;  %s1537_s1 = sand.u32 1, %s9048_s18   ;;  %s7481_s30 = int_to_ptr.vmem [resolvable:$true] %s1508_s30 }
 0x235   : > { %s4836_s29 = scalar_select %p9052_p12, %s8899_s27, 0 }
 0x236   : > { %s7483_s2 = sshll.u32 %s1537_s1, 4  ;;  %s8670_s18 = scalar_lea.sflag [#allocation25], %s7307_s4 }
 0x237   : > { %s7479_s23 = sld [smem:[%s4835_s17 + %s4836_s29]]  ;;  %s5581_s1 = scalar_lea.hbm %s9054_s24, 512 }
 0x239   : > { %s4422_s15 = sshll.u32 %s1452_s13, 1 }
 0x23a   : > { %s1454_s25 = sadd.s32 %s8897_s12, %s4422_s15 }
 0x23b   : > { %s4546_s16 = sshll.u32 %s1454_s25, 8 }
 0x23c   : > { %s7490_s20 = scalar_lea.hbm %s9053_s8, %s4546_s16 }
 0x23d   : > { %s4429_s29 = sshll.u32 %s7479_s23, 1  ;;  %s5577_s17 = scalar_lea.hbm %s7490_s20, 256 }
 0x23e   : > { %p5578_p1 = scmp.ne.s32.totalorder %s7490_s20, %s5577_s17  ;;  %p5582_p2 = scmp.lt.u32.totalorder %s7490_s20, %s9054_s24 }
 0x23f   : > { %p5583_p8 = scmp.lt.u32.totalorder %s5581_s1, %s5577_s17  ;;  %p5585_p3 = scmp.lt.u32.totalorder %s5577_s17, %s7490_s20 }
 0x240   : > { %p5579_p7 = pnand %p5578_p1, %p9051_p11 }
 0x241   : > { %p5584_p4 = por %p5583_p8, %p5582_p2 }
 0x242   : > { %p5580_p5 = pneg %p5579_p7 }
 0x243   : > { %p5586_p6 = por %p5585_p3, %p5584_p4 }
 0x245   : > { %p5587_p13 = pnand %p5586_p6, %p5580_p5 }
 0x247   : > { %5590 = shalt.err (!%p5587_p13)
}
 0x248   : > { %s5591_s8 = scalar_lea.vmem %s7476_s5, 256  ;;  %s6442_s13 = smov [#allocation24]  }
 0x249   : > { %p5592_p0 = scmp.ne.s32.totalorder %s7476_s5, %s5591_s8  ;;  %s5595_s15 = sshll.u32 %s6442_s13, 4  ;;  %s5596_s15 = int_to_ptr.vmem [resolvable:$false] %s5595_s15 }
 0x24a   : > { %s5597_s25 = scalar_lea.vmem %s5596_s15, 512  ;;  %p5598_p1 = scmp.lt.s32.totalorder %s7476_s5, %s5596_s15 }
 0x24b   : > { %p5593_p10 = pnand %p5592_p0, %p9051_p11  ;;  %p5599_p7 = scmp.lt.s32.totalorder %s5597_s25, %s5591_s8 }
 0x24d   : > { %p5594_p9 = pneg %p5593_p10  ;;  %p5600_p2 = por %p5599_p7, %p5598_p1 }
 0x24f   : > { %p5601_p8 = pnand %p5600_p2, %p5594_p9 }
 0x251   : > { %5604 = shalt.err (!%p5601_p8)
}
 0x252   : > { %s9058_s16 = smov 4   ;;  %s9059_s17 = smov 64  }
 0x253   : > { %s9060_s1 = sld [smem:[#allocation136_spill]]  ;;  %s9061_s13 = sld [smem:[#allocation95_spill]] }
 0x254   : > { %4831 = dma.hbm_to_vmem [thread:$0]  (%p9051_p11), %s7490_s20, 256, %s7476_s5, %s8670_s18, %s9059_s17, %s9059_s17, %s9058_s16  }
 0x255   : > { %s1501_s8 = sadd.s32 %s8897_s12, %s4429_s29  ;;  %s1539_s19 = scalar_lea.vmem [#allocation30], %s7483_s2 }
 0x256   : > { %s7520_s15 = sshll.u32 %s1539_s19, 4  ;;  %s4430_s25 = sshll.u32 %s1501_s8, 4  ;;  %s7569_s15 = int_to_ptr.vmem [resolvable:$true] %s7520_s15 }
 0x257   : > { %s8672_s22 = scalar_lea.sflag [#allocation28], %s7307_s4 }
 0x259   : > { %s1337_s0 = sand.u32 1, %s9060_s1   ;;  %s7524_s11 = scalar_lea.hbm %s9061_s13, %s4430_s25 }
 0x25a   : > { %s7526_s6 = sshll.u32 %s1337_s0, 4  ;;  %s5605_s24 = scalar_lea.hbm %s7524_s11, 16 }
 0x25b   : > { %p5606_p9 = scmp.ne.s32.totalorder %s7524_s11, %s5605_s24  ;;  %s5609_s5 = scalar_lea.hbm %s9061_s13, 32 }
 0x25c   : > { %p5610_p4 = scmp.lt.u32.totalorder %s7524_s11, %s9061_s13  ;;  %p5611_p3 = scmp.lt.u32.totalorder %s5609_s5, %s5605_s24 }
 0x25d   : > { %p5607_p11 = pnand %p5606_p9, %p9052_p12  ;;  %p5613_p13 = scmp.lt.u32.totalorder %s5605_s24, %s7524_s11 }
 0x25e   : > { %p5612_p6 = por %p5611_p3, %p5610_p4 }
 0x25f   : > { %p5608_p5 = pneg %p5607_p11 }
 0x260   : > { %p5614_p0 = por %p5613_p13, %p5612_p6 }
 0x262   : > { %p5615_p10 = pnand %p5614_p0, %p5608_p5 }
 0x264   : > { %5618 = shalt.err (!%p5615_p10)
}
 0x265   : > { %s5619_s20 = scalar_lea.vmem %s7481_s30, 16  ;;  %s6443_s23 = smov [#allocation27]  }
 0x266   : > { %p5620_p1 = scmp.ne.s32.totalorder %s7481_s30, %s5619_s20  ;;  %s5623_s2 = sshll.u32 %s6443_s23, 4  ;;  %s5624_s2 = int_to_ptr.vmem [resolvable:$false] %s5623_s2 }
 0x267   : > { %s5625_s0 = scalar_lea.vmem %s5624_s2, 32  ;;  %p5626_p8 = scmp.lt.s32.totalorder %s7481_s30, %s5624_s2 }
 0x268   : > { %p5621_p7 = pnand %p5620_p1, %p9052_p12  ;;  %p5627_p9 = scmp.lt.s32.totalorder %s5625_s0, %s5619_s20 }
 0x26a   : > { %p5622_p2 = pneg %p5621_p7  ;;  %p5628_p11 = por %p5627_p9, %p5626_p8 }
 0x26c   : > { %p5629_p4 = pnand %p5628_p11, %p5622_p2 }
 0x26e   : > { %5632 = shalt.err (!%p5629_p4)
}
 0x26f   : > { %s9062_s24 = sld [smem:[#allocation151_spill]]  ;;  %s9063_s29 = sld [smem:[#allocation156_spill]] }
 0x270   : > { %4837 = dma.hbm_to_vmem [thread:$0]  (%p9052_p12), %s7524_s11, 16, %s7481_s30, %s8672_s22  }
 0x271   : > { %p9064_p5 = scmp.ne.s32.totalorder %s9050_s7, 0  ;;  %s9067_s25 = sld [smem:[#allocation97_spill]] }
 0x272   : > { %s9070_s2 = sand.u32 1, %s9049_s14   ;;  %s1339_s11 = scalar_lea.vmem [#allocation17], %s7526_s6 }
 0x273   : > { %s4842_s21 = scalar_select %p9064_p5, %s8899_s27, 0 }
 0x274   : > { %s9066_s8 = scalar_select %p9064_p5, [#allocation8], [#allocation48] }
 0x275   : > { %p9065_p3 = scmp.ne.s32.totalorder %s9062_s24, 0  ;;  %p9069_p6 = scmp.ne.s32.totalorder %s9063_s29, 0 }
 0x276   : > { %s1540_s19 = sld [smem:[%s9066_s8 + %s4842_s21]]  ;;  %s1294_s18 = scalar_lea.vmem [#allocation14], %s9070_s2 }
 0x277   : > { %s4808_s1 = scalar_select %p9065_p3, [#allocation8], [#allocation37] }
 0x278   : > { %s9068_s0 = smov %s9067_s25  ;;  %s1304_s13 = sshll.u32 %s1294_s18, 4  ;;  %s7575_s13 = int_to_ptr.vmem [resolvable:$true] %s1304_s13 }
 0x279   : > { %s4809_s5 = scalar_select %p9065_p3, %s8899_s27, 0 }
 0x27a   : > { %s4814_s20 = scalar_select %p9069_p6, [#allocation8], [#allocation39] }
 0x27b   : > { %s7561_s23 = sld [smem:[%s4808_s1 + %s4809_s5]]  ;;  %s1349_s21 = sshll.u32 %s1339_s11, 4  ;;  %s7577_s21 = int_to_ptr.vmem [resolvable:$true] %s1349_s21 }
 0x27c   : > { %s4815_s30 = scalar_select %p9069_p6, %s8899_s27, 0 }
 0x27d   : > { %s4434_s8 = sshll.u32 %s1540_s19, 1  ;;  %s8676_s5 = scalar_lea.sflag [#allocation31], %s7307_s4 }
 0x27e   : > { %s7572_s22 = sld [smem:[%s4814_s20 + %s4815_s30]]  ;;  %s1542_s26 = sadd.s32 %s8897_s12, %s4434_s8 }
 0x27f   : > { %s4548_s1 = sshll.u32 %s1542_s26, 8  ;;  %s5637_s19 = scalar_lea.hbm %s9068_s0, 512 }
 0x280   : > { %s7580_s14 = scalar_lea.hbm %s9067_s25, %s4548_s1 }
 0x281   : > { %s4399_s18 = sshll.u32 %s7561_s23, 1  ;;  %s5633_s6 = scalar_lea.hbm %s7580_s14, 256 }
 0x282   : > { %p5634_p12 = scmp.ne.s32.totalorder %s7580_s14, %s5633_s6  ;;  %p5638_p10 = scmp.lt.u32.totalorder %s7580_s14, %s9068_s0 }
 0x283   : > { %p5639_p1 = scmp.lt.u32.totalorder %s5637_s19, %s5633_s6  ;;  %p5641_p2 = scmp.lt.u32.totalorder %s5633_s6, %s7580_s14 }
 0x284   : > { %p5635_p13 = pnand %p5634_p12, %p9064_p5 }
 0x285   : > { %p5640_p7 = por %p5639_p1, %p5638_p10 }
 0x286   : > { %p5636_p0 = pneg %p5635_p13 }
 0x287   : > { %p5642_p8 = por %p5641_p2, %p5640_p7 }
 0x289   : > { %p5643_p9 = pnand %p5642_p8, %p5636_p0 }
 0x28b   : > { %5646 = shalt.err (!%p5643_p9)
}
 0x28c   : > { %s5647_s26 = scalar_lea.vmem %s7569_s15, 256  ;;  %s6444_s25 = smov [#allocation30]  }
 0x28d   : > { %p5648_p11 = scmp.ne.s32.totalorder %s7569_s15, %s5647_s26  ;;  %s5651_s20 = sshll.u32 %s6444_s25, 4  ;;  %s5652_s20 = int_to_ptr.vmem [resolvable:$false] %s5651_s20 }
 0x28e   : > { %s5653_s2 = scalar_lea.vmem %s5652_s20, 512  ;;  %p5654_p12 = scmp.lt.s32.totalorder %s7569_s15, %s5652_s20 }
 0x28f   : > { %p5649_p4 = pnand %p5648_p11, %p9064_p5  ;;  %p5655_p13 = scmp.lt.s32.totalorder %s5653_s2, %s5647_s26 }
 0x291   : > { %p5650_p6 = pneg %p5649_p4  ;;  %p5656_p10 = por %p5655_p13, %p5654_p12 }
 0x293   : > { %p5657_p1 = pnand %p5656_p10, %p5650_p6 }
 0x295   : > { %5660 = shalt.err (!%p5657_p1)
}
 0x296   : > { %s9071_s30 = sld [smem:[#allocation125_spill]]  ;;  %s9072_s11 = sld [smem:[#allocation86_spill]] }
 0x297   : > { %4843 = dma.hbm_to_vmem [thread:$0]  (%p9064_p5), %s7580_s14, 256, %s7569_s15, %s8676_s5, %s9059_s17, %s9059_s17, %s9058_s16  }
 0x298   : > { %s1297_s8 = sadd.s32 %s8897_s12, %s4399_s18  ;;  %s4406_s19 = sshll.u32 %s7572_s22, 1 }
 0x299   : > { %s4400_s1 = sshll.u32 %s1297_s8, 4  ;;  %s7613_s25 = sadd.s32 %s8897_s12, %s4406_s19 }
 0x29c   : > { %s9073_s6 = smov %s9072_s11  ;;  %s1385_s7 = sand.u32 1, %s9071_s30  }
 0x29d   : > { %s1302_s26 = scalar_lea.hbm %s9072_s11, %s4400_s1  ;;  %s5665_s2 = scalar_lea.hbm %s9073_s6, 32 }
 0x29e   : > { %s5661_s20 = scalar_lea.hbm %s1302_s26, 16  ;;  %p5666_p2 = scmp.lt.u32.totalorder %s1302_s26, %s9073_s6 }
 0x29f   : > { %p5662_p6 = scmp.ne.s32.totalorder %s1302_s26, %s5661_s20  ;;  %p5667_p8 = scmp.lt.u32.totalorder %s5665_s2, %s5661_s20 }
 0x2a0   : > { %p5669_p11 = scmp.lt.u32.totalorder %s5661_s20, %s1302_s26 }
 0x2a1   : > { %p5663_p0 = pnand %p5662_p6, %p9065_p3  ;;  %p5668_p9 = por %p5667_p8, %p5666_p2 }
 0x2a3   : > { %p5664_p7 = pneg %p5663_p0  ;;  %p5670_p4 = por %p5669_p11, %p5668_p9 }
 0x2a5   : > { %p5671_p5 = pnand %p5670_p4, %p5664_p7 }
 0x2a7   : > { %5674 = shalt.err (!%p5671_p5)
}
 0x2a8   : > { %s5675_s22 = scalar_lea.vmem %s7575_s13, 16  ;;  %s6445_s15 = smov [#allocation14]  }
 0x2a9   : > { %p5676_p12 = scmp.ne.s32.totalorder %s7575_s13, %s5675_s22  ;;  %s5679_s23 = sshll.u32 %s6445_s15, 4  ;;  %s5680_s23 = int_to_ptr.vmem [resolvable:$false] %s5679_s23 }
 0x2aa   : > { %s5681_s14 = scalar_lea.vmem %s5680_s23, 32  ;;  %p5682_p1 = scmp.lt.s32.totalorder %s7575_s13, %s5680_s23 }
 0x2ab   : > { %p5677_p13 = pnand %p5676_p12, %p9065_p3  ;;  %p5683_p6 = scmp.lt.s32.totalorder %s5681_s14, %s5675_s22 }
 0x2ad   : > { %p5678_p10 = pneg %p5677_p13  ;;  %p5684_p0 = por %p5683_p6, %p5682_p1 }
 0x2af   : > { %p5685_p2 = pnand %p5684_p0, %p5678_p10 }
 0x2b1   : > { %5688 = shalt.err (!%p5685_p2)
}
 0x2b2   : > { %s9074_s18 = scalar_lea.sflag [#allocation13], %s7307_s4  ;;  %s9075_s11 = sld [smem:[#allocation88_spill]] }
 0x2b3   : > { %4810 = dma.hbm_to_vmem [thread:$0]  (%p9065_p3), %s1302_s26, 16, %s7575_s13, %s9074_s18  }
 0x2b4   : > { %s4543_s8 = sshll.u32 %s7613_s25, 8  ;;  %s7635_s19 = sshll.u32 %s1385_s7, 4 }
 0x2b5   : > { %p9077_p8 = scmp.ne.s32.totalorder %s9063_s29, 0 }
 0x2b8   : > { %s9076_s5 = smov %s9075_s11  ;;  %s7631_s1 = scalar_lea.hbm %s9075_s11, %s4543_s8 }
 0x2b9   : > { %s5689_s24 = scalar_lea.hbm %s7631_s1, 256  ;;  %s5693_s20 = scalar_lea.hbm %s9076_s5, 512 }
 0x2ba   : > { %p5690_p7 = scmp.ne.s32.totalorder %s7631_s1, %s5689_s24  ;;  %p5694_p4 = scmp.lt.u32.totalorder %s7631_s1, %s9076_s5 }
 0x2bb   : > { %p5695_p5 = scmp.lt.u32.totalorder %s5693_s20, %s5689_s24  ;;  %p5697_p3 = scmp.lt.u32.totalorder %s5689_s24, %s7631_s1 }
 0x2bc   : > { %p5691_p9 = pnand %p5690_p7, %p9077_p8 }
 0x2bd   : > { %p5696_p12 = por %p5695_p5, %p5694_p4 }
 0x2be   : > { %p5692_p11 = pneg %p5691_p9 }
 0x2bf   : > { %p5698_p13 = por %p5697_p3, %p5696_p12 }
 0x2c1   : > { %p5699_p10 = pnand %p5698_p13, %p5692_p11 }
 0x2c3   : > { %5702 = shalt.err (!%p5699_p10)
}
 0x2c4   : > { %s5703_s13 = scalar_lea.vmem %s7577_s21, 256  ;;  %s6446_s30 = smov [#allocation17]  }
 0x2c5   : > { %p5704_p1 = scmp.ne.s32.totalorder %s7577_s21, %s5703_s13  ;;  %s5707_s7 = sshll.u32 %s6446_s30, 4  ;;  %s5708_s7 = int_to_ptr.vmem [resolvable:$false] %s5707_s7 }
 0x2c6   : > { %s5709_s26 = scalar_lea.vmem %s5708_s7, 512  ;;  %p5710_p2 = scmp.lt.s32.totalorder %s7577_s21, %s5708_s7 }
 0x2c7   : > { %p5705_p6 = pnand %p5704_p1, %p9077_p8  ;;  %p5711_p7 = scmp.lt.s32.totalorder %s5709_s26, %s5703_s13 }
 0x2c9   : > { %p5706_p0 = pneg %p5705_p6  ;;  %p5712_p9 = por %p5711_p7, %p5710_p2 }
 0x2cb   : > { %p5713_p4 = pnand %p5712_p9, %p5706_p0 }
 0x2cd   : > { %5716 = shalt.err (!%p5713_p4)
}
 0x2ce   : > { %s9078_s25 = scalar_lea.sflag [#allocation16], %s7307_s4  ;;  %s9079_s2 = sld [smem:[#allocation162_spill]] }
 0x2cf   : > { %s9080_s22 = sld [smem:[#allocation131_spill]]  ;;  %s9081_s15 = sld [smem:[#allocation122_spill]] }
 0x2d0   : > { %s9082_s23 = sld [smem:[#allocation118_spill]]  ;;  %s9085_s8 = sld [smem:[#allocation90_spill]] }
 0x2d1   : > { %s9083_s14 = sld [smem:[#allocation169_spill]]  ;;  %s1387_s7 = scalar_lea.vmem [#allocation20], %s7635_s19 }
 0x2d2   : > { %4816 = dma.hbm_to_vmem [thread:$0]  (%p9077_p8), %s7631_s1, 256, %s7577_s21, %s9078_s25, %s9059_s17, %s9059_s17, %s9058_s16  }
 0x2d3   : > { %s1397_s26 = sshll.u32 %s1387_s7, 4  ;;  %s7679_s26 = int_to_ptr.vmem [resolvable:$true] %s1397_s26 }
 0x2d4   : > { %p9084_p11 = scmp.ne.s32.totalorder %s9079_s2, 0 }
 0x2d5   : > { %s1429_s20 = sand.u32 1, %s9080_s22   ;;  %p9087_p5 = scmp.ne.s32.totalorder %s9081_s15, 0 }
 0x2d6   : > { %s4820_s29 = scalar_select %p9084_p11, [#allocation8], [#allocation41] }
 0x2d7   : > { %s4821_s18 = scalar_select %p9084_p11, %s8899_s27, 0 }
 0x2d8   : > { %s9086_s24 = smov %s9085_s8  ;;  %s1473_s0 = sand.u32 1, %s9082_s23  }
 0x2d9   : > { %s1388_s11 = sld [smem:[%s4820_s29 + %s4821_s18]]  ;;  %s7676_s25 = sshll.u32 %s1473_s0, 4 }
 0x2da   : > { %s4826_s13 = scalar_select %p9087_p5, [#allocation8], [#allocation43] }
 0x2db   : > { %s4827_s30 = scalar_select %p9087_p5, %s8899_s27, 0 }
 0x2dc   : > { %s7681_s18 = scalar_lea.vmem [#allocation23], %s1429_s20  ;;  %s5721_s0 = scalar_lea.hbm %s9086_s24, 512 }
 0x2dd   : > { %s7672_s5 = sld [smem:[%s4826_s13 + %s4827_s30]]  ;;  %s1440_s6 = sshll.u32 %s7681_s18, 4  ;;  %s7714_s6 = int_to_ptr.vmem [resolvable:$true] %s1440_s6 }
 0x2df   : > { %s4414_s1 = sshll.u32 %s1388_s11, 1 }
 0x2e0   : > { %s1390_s29 = sadd.s32 %s8897_s12, %s4414_s1 }
 0x2e1   : > { %s4545_s22 = sshll.u32 %s1390_s29, 8 }
 0x2e2   : > { %s7685_s19 = scalar_lea.hbm %s9085_s8, %s4545_s22 }
 0x2e3   : > { %s5717_s23 = scalar_lea.hbm %s7685_s19, 256  ;;  %p5722_p10 = scmp.lt.u32.totalorder %s7685_s19, %s9086_s24 }
 0x2e4   : > { %p5718_p12 = scmp.ne.s32.totalorder %s7685_s19, %s5717_s23  ;;  %p5723_p1 = scmp.lt.u32.totalorder %s5721_s0, %s5717_s23 }
 0x2e5   : > { %p5725_p0 = scmp.lt.u32.totalorder %s5717_s23, %s7685_s19 }
 0x2e6   : > { %p5719_p3 = pnand %p5718_p12, %p9084_p11  ;;  %p5724_p6 = por %p5723_p1, %p5722_p10 }
 0x2e8   : > { %p5720_p13 = pneg %p5719_p3  ;;  %p5726_p2 = por %p5725_p0, %p5724_p6 }
 0x2ea   : > { %p5727_p7 = pnand %p5726_p2, %p5720_p13 }
 0x2ec   : > { %5730 = shalt.err (!%p5727_p7)
}
 0x2ed   : > { %s5731_s11 = scalar_lea.vmem %s7679_s26, 256  ;;  %s6447_s8 = smov [#allocation20]  }
 0x2ee   : > { %p5732_p9 = scmp.ne.s32.totalorder %s7679_s26, %s5731_s11  ;;  %s5735_s20 = sshll.u32 %s6447_s8, 4  ;;  %s5736_s20 = int_to_ptr.vmem [resolvable:$false] %s5735_s20 }
 0x2ef   : > { %s5737_s13 = scalar_lea.vmem %s5736_s20, 512  ;;  %p5738_p12 = scmp.lt.s32.totalorder %s7679_s26, %s5736_s20 }
 0x2f0   : > { %p5733_p4 = pnand %p5732_p9, %p9084_p11  ;;  %p5739_p3 = scmp.lt.s32.totalorder %s5737_s13, %s5731_s11 }
 0x2f2   : > { %p5734_p8 = pneg %p5733_p4  ;;  %p5740_p10 = por %p5739_p3, %p5738_p12 }
 0x2f4   : > { %p5741_p1 = pnand %p5740_p10, %p5734_p8 }
 0x2f6   : > { %5744 = shalt.err (!%p5741_p1)
}
 0x2f7   : > { %s9089_s30 = scalar_lea.sflag [#allocation19], %s7307_s4  ;;  %s9090_s7 = sld [smem:[#allocation112_spill]] }
 0x2f8   : > { %s9091_s1 = sld [smem:[#allocation92_spill]]  ;;  %s4419_s29 = sshll.u32 %s7672_s5, 1 }
 0x2f9   : > { %4822 = dma.hbm_to_vmem [thread:$0]  (%p9084_p11), %s7685_s19, 256, %s7679_s26, %s9089_s30, %s9059_s17, %s9059_s17, %s9058_s16  }
 0x2fa   : > { %s1433_s2 = sadd.s32 %s8897_s12, %s4419_s29  ;;  %s1475_s11 = scalar_lea.vmem [#allocation26], %s7676_s25 }
 0x2fb   : > { %s4420_s0 = sshll.u32 %s1433_s2, 4  ;;  %s7717_s8 = sshll.u32 %s1475_s11, 4  ;;  %s7756_s8 = int_to_ptr.vmem [resolvable:$true] %s7717_s8 }
 0x2fd   : > { %s1517_s23 = sand.u32 1, %s9090_s7  }
 0x2fe   : > { %s9092_s22 = smov %s9091_s1  ;;  %s1438_s20 = scalar_lea.hbm %s9091_s1, %s4420_s0 }
 0x2ff   : > { %s5745_s13 = scalar_lea.hbm %s1438_s20, 16  ;;  %s5749_s21 = scalar_lea.hbm %s9092_s22, 32 }
 0x300   : > { %p5746_p8 = scmp.ne.s32.totalorder %s1438_s20, %s5745_s13  ;;  %p5750_p0 = scmp.lt.u32.totalorder %s1438_s20, %s9092_s22 }
 0x301   : > { %p5751_p2 = scmp.lt.u32.totalorder %s5749_s21, %s5745_s13  ;;  %p5753_p7 = scmp.lt.u32.totalorder %s5745_s13, %s1438_s20 }
 0x302   : > { %p5747_p13 = pnand %p5746_p8, %p9087_p5 }
 0x303   : > { %p5752_p11 = por %p5751_p2, %p5750_p0 }
 0x304   : > { %p5748_p6 = pneg %p5747_p13 }
 0x305   : > { %p5754_p9 = por %p5753_p7, %p5752_p11 }
 0x307   : > { %p5755_p4 = pnand %p5754_p9, %p5748_p6 }
 0x309   : > { %5758 = shalt.err (!%p5755_p4)
}
 0x30a   : > { %s5759_s5 = scalar_lea.vmem %s7714_s6, 16  ;;  %s6448_s26 = smov [#allocation23]  }
 0x30b   : > { %p5760_p12 = scmp.ne.s32.totalorder %s7714_s6, %s5759_s5  ;;  %s5763_s25 = sshll.u32 %s6448_s26, 4  ;;  %s5764_s25 = int_to_ptr.vmem [resolvable:$false] %s5763_s25 }
 0x30c   : > { %s5765_s18 = scalar_lea.vmem %s5764_s25, 32  ;;  %p5766_p1 = scmp.lt.s32.totalorder %s7714_s6, %s5764_s25 }
 0x30d   : > { %p5761_p3 = pnand %p5760_p12, %p9087_p5  ;;  %p5767_p8 = scmp.lt.s32.totalorder %s5765_s18, %s5759_s5 }
 0x30f   : > { %p5762_p10 = pneg %p5761_p3  ;;  %p5768_p13 = por %p5767_p8, %p5766_p1 }
 0x311   : > { %p5769_p0 = pnand %p5768_p13, %p5762_p10 }
 0x313   : > { %5772 = shalt.err (!%p5769_p0)
}
 0x314   : > { %s9093_s21 = scalar_lea.sflag [#allocation22], %s7307_s4  ;;  %s9094_s19 = sld [smem:[#allocation173_spill]] }
 0x315   : > { %s9095_s30 = sld [smem:[#allocation106_spill]]  ;;  %p9096_p6 = scmp.ne.s32.totalorder %s9083_s14, 0 }
 0x316   : > { %4828 = dma.hbm_to_vmem [thread:$0]  (%p9087_p5), %s1438_s20, 16, %s7714_s6, %s9093_s21  }
 0x317   : > { %s4833_s1 = scalar_select %p9096_p6, %s8899_s27, 0 }
 0x318   : > { %s9098_s29 = scalar_select %p9096_p6, [#allocation8], [#allocation45] }
 0x319   : > { %s9099_s0 = sld [smem:[#allocation94_spill]]  ;;  %p9100_p11 = scmp.ne.s32.totalorder %s9011_s10, 0 }
 0x31a   : > { %p9097_p2 = scmp.ne.s32.totalorder %s9094_s19, 0  ;;  %s1476_s2 = sld [smem:[%s9098_s29 + %s4833_s1]] }
 0x31b   : > { %s1561_s11 = sand.u32 1, %s9095_s30   ;;  %s1518_s25 = scalar_lea.vmem [#allocation29], %s1517_s23 }
 0x31c   : > { %s4838_s15 = scalar_select %p9097_p2, [#allocation8], [#allocation47] }
 0x31d   : > { %s4839_s13 = scalar_select %p9097_p2, %s8899_s27, 0 }
 0x31e   : > { %s4844_s5 = scalar_select %p9100_p11, [#allocation8], [#allocation49] }
 0x31f   : > { %s7748_s26 = sld [smem:[%s4838_s15 + %s4839_s13]]  ;;  %s1528_s6 = sshll.u32 %s1518_s25, 4  ;;  %s7761_s6 = int_to_ptr.vmem [resolvable:$true] %s1528_s6 }
 0x320   : > { %s4845_s20 = scalar_select %p9100_p11, %s8899_s27, 0 }
 0x321   : > { %s4426_s18 = sshll.u32 %s1476_s2, 1  ;;  %s7763_s15 = scalar_lea.vmem [#allocation32], %s1561_s11 }
 0x322   : > { %s7758_s21 = sld [smem:[%s4844_s5 + %s4845_s20]]  ;;  %s1478_s30 = sadd.s32 %s8897_s12, %s4426_s18 }
 0x323   : > { %s4547_s1 = sshll.u32 %s1478_s30, 8  ;;  %s1572_s7 = sshll.u32 %s7763_s15, 4  ;;  %s7797_s7 = int_to_ptr.vmem [resolvable:$true] %s1572_s7 }
 0x324   : > { %s7767_s29 = scalar_lea.hbm %s9099_s0, %s4547_s1  ;;  %s5777_s2 = scalar_lea.hbm %s9099_s0, 512 }
 0x325   : > { %s4431_s23 = sshll.u32 %s7748_s26, 1  ;;  %s5773_s13 = scalar_lea.hbm %s7767_s29, 256 }
 0x326   : > { %p5774_p5 = scmp.ne.s32.totalorder %s7767_s29, %s5773_s13  ;;  %p5778_p4 = scmp.lt.u32.totalorder %s7767_s29, %s9099_s0 }
 0x327   : > { %p5779_p12 = scmp.lt.u32.totalorder %s5777_s2, %s5773_s13  ;;  %p5781_p10 = scmp.lt.u32.totalorder %s5773_s13, %s7767_s29 }
 0x328   : > { %p5775_p7 = pnand %p5774_p5, %p9096_p6 }
 0x329   : > { %p5780_p3 = por %p5779_p12, %p5778_p4 }
 0x32a   : > { %p5776_p9 = pneg %p5775_p7 }
 0x32b   : > { %p5782_p1 = por %p5781_p10, %p5780_p3 }
 0x32d   : > { %p5783_p8 = pnand %p5782_p1, %p5776_p9 }
 0x32f   : > { %5786 = shalt.err (!%p5783_p8)
}
 0x330   : > { %s5787_s11 = scalar_lea.vmem %s7756_s8, 256  ;;  %s6449_s5 = smov [#allocation26]  }
 0x331   : > { %p5788_p13 = scmp.ne.s32.totalorder %s7756_s8, %s5787_s11  ;;  %s5791_s25 = sshll.u32 %s6449_s5, 4  ;;  %s5792_s25 = int_to_ptr.vmem [resolvable:$false] %s5791_s25 }
 0x332   : > { %s5793_s20 = scalar_lea.vmem %s5792_s25, 512  ;;  %p5794_p5 = scmp.lt.s32.totalorder %s7756_s8, %s5792_s25 }
 0x333   : > { %p5789_p0 = pnand %p5788_p13, %p9096_p6  ;;  %p5795_p7 = scmp.lt.s32.totalorder %s5793_s20, %s5787_s11 }
 0x335   : > { %p5790_p11 = pneg %p5789_p0  ;;  %p5796_p4 = por %p5795_p7, %p5794_p5 }
 0x337   : > { %p5797_p12 = pnand %p5796_p4, %p5790_p11 }
 0x339   : > { %5800 = shalt.err (!%p5797_p12)
}
 0x33a   : > { %s9101_s18 = scalar_lea.sflag [#allocation25], %s7307_s4  ;;  %s9102_s30 = sld [smem:[#allocation96_spill]] }
 0x33b   : > { %4834 = dma.hbm_to_vmem [thread:$0]  (%p9096_p6), %s7767_s29, 256, %s7756_s8, %s9101_s18, %s9059_s17, %s9059_s17, %s9058_s16  }
 0x33c   : > { %s1521_s1 = sadd.s32 %s8897_s12, %s4431_s23  ;;  %s4437_s2 = sshll.u32 %s7758_s21, 1 }
 0x33d   : > { %s4432_s14 = sshll.u32 %s1521_s1, 4  ;;  %s7802_s5 = sadd.s32 %s8897_s12, %s4437_s2 }
 0x340   : > { %s9103_s13 = smov %s9102_s30  ;;  %s1526_s11 = scalar_lea.hbm %s9102_s30, %s4432_s14 }
 0x341   : > { %s5801_s25 = scalar_lea.hbm %s1526_s11, 16  ;;  %s5805_s20 = scalar_lea.hbm %s9103_s13, 32 }
 0x342   : > { %p5802_p11 = scmp.ne.s32.totalorder %s1526_s11, %s5801_s25  ;;  %p5806_p10 = scmp.lt.u32.totalorder %s1526_s11, %s9103_s13 }
 0x343   : > { %p5807_p1 = scmp.lt.u32.totalorder %s5805_s20, %s5801_s25  ;;  %p5809_p6 = scmp.lt.u32.totalorder %s5801_s25, %s1526_s11 }
 0x344   : > { %p5803_p9 = pnand %p5802_p11, %p9097_p2 }
 0x345   : > { %p5808_p8 = por %p5807_p1, %p5806_p10 }
 0x346   : > { %p5804_p3 = pneg %p5803_p9 }
 0x347   : > { %p5810_p13 = por %p5809_p6, %p5808_p8 }
 0x349   : > { %p5811_p0 = pnand %p5810_p13, %p5804_p3 }
 0x34b   : > { %5814 = shalt.err (!%p5811_p0)
}
 0x34c   : > { %s5815_s16 = scalar_lea.vmem %s7761_s6, 16  ;;  %s6450_s17 = smov [#allocation29]  }
 0x34d   : > { %p5816_p5 = scmp.ne.s32.totalorder %s7761_s6, %s5815_s16  ;;  %s5819_s8 = sshll.u32 %s6450_s17, 4  ;;  %s5820_s8 = int_to_ptr.vmem [resolvable:$false] %s5819_s8 }
 0x34e   : > { %s5821_s26 = scalar_lea.vmem %s5820_s8, 32  ;;  %p5822_p12 = scmp.lt.s32.totalorder %s7761_s6, %s5820_s8 }
 0x34f   : > { %p5817_p7 = pnand %p5816_p5, %p9097_p2  ;;  %p5823_p11 = scmp.lt.s32.totalorder %s5821_s26, %s5815_s16 }
 0x351   : > { %p5818_p4 = pneg %p5817_p7  ;;  %p5824_p9 = por %p5823_p11, %p5822_p12 }
 0x353   : > { %p5825_p10 = pnand %p5824_p9, %p5818_p4 }
 0x355   : > { %5828 = shalt.err (!%p5825_p10)
}
 0x356   : > { %s9104_s21 = scalar_lea.sflag [#allocation28], %s7307_s4  ;;  %s9105_s15 = sld [smem:[#allocation98_spill]] }
 0x357   : > { %4840 = dma.hbm_to_vmem [thread:$0]  (%p9097_p2), %s1526_s11, 16, %s7761_s6, %s9104_s21  }
 0x358   : > { %s4438_s29 = sshll.u32 %s7802_s5, 4  ;;  %p9107_p1 = scmp.ne.s32.totalorder %s9011_s10, 0 }
 0x35c   : > { %s9106_s0 = smov %s9105_s15  ;;  %s1570_s23 = scalar_lea.hbm %s9105_s15, %s4438_s29 }
 0x35d   : > { %s5829_s18 = scalar_lea.hbm %s1570_s23, 16  ;;  %s5833_s30 = scalar_lea.hbm %s9106_s0, 32 }
 0x35e   : > { %p5830_p3 = scmp.ne.s32.totalorder %s1570_s23, %s5829_s18  ;;  %p5834_p13 = scmp.lt.u32.totalorder %s1570_s23, %s9106_s0 }
 0x35f   : > { %p5835_p0 = scmp.lt.u32.totalorder %s5833_s30, %s5829_s18  ;;  %p5837_p7 = scmp.lt.u32.totalorder %s5829_s18, %s1570_s23 }
 0x360   : > { %p5831_p8 = pnand %p5830_p3, %p9107_p1 }
 0x361   : > { %p5836_p5 = por %p5835_p0, %p5834_p13 }
 0x362   : > { %p5832_p6 = pneg %p5831_p8 }
 0x363   : > { %p5838_p4 = por %p5837_p7, %p5836_p5 }
 0x365   : > { %p5839_p12 = pnand %p5838_p4, %p5832_p6 }
 0x367   : > { %5842 = shalt.err (!%p5839_p12)
}
 0x368   : > { %s5843_s19 = scalar_lea.vmem %s7797_s7, 16  ;;  %s6451_s6 = smov [#allocation32]  }
 0x369   : > { %p5844_p2 = scmp.ne.s32.totalorder %s7797_s7, %s5843_s19  ;;  %s5847_s1 = sshll.u32 %s6451_s6, 4  ;;  %s5848_s1 = int_to_ptr.vmem [resolvable:$false] %s5847_s1 }
 0x36a   : > { %s5849_s14 = scalar_lea.vmem %s5848_s1, 32  ;;  %p5850_p10 = scmp.lt.s32.totalorder %s7797_s7, %s5848_s1 }
 0x36b   : > { %p5845_p11 = pnand %p5844_p2, %p9107_p1  ;;  %p5851_p3 = scmp.lt.s32.totalorder %s5849_s14, %s5843_s19 }
 0x36d   : > { %p5846_p9 = pneg %p5845_p11  ;;  %p5852_p8 = por %p5851_p3, %p5850_p10 }
 0x36f   : > { %p5853_p13 = pnand %p5852_p8, %p5846_p9 }
 0x371   : > { %5856 = shalt.err (!%p5853_p13)
}
 0x372   : > { %s9108_s2 = scalar_lea.sflag [#allocation31], %s7307_s4 }
 0x373   : > { %4846 = dma.hbm_to_vmem [thread:$0]  (%p9107_p1), %s1570_s23, 16, %s7797_s7, %s9108_s2  }
 0x374 PF: > { %p9109_p6 = scmp.ne.s32.totalorder %s9023_s28, 0 }
 0x376   : > { %1581 = sbr.rel (%p9109_p6) target bundleno = 6232 (0x1858), region = 144 }
 0x37d   : > { %p9110_p0 = scmp.eq.s32.totalorder %s6907_s9, 0 }
 0x37f   : > { %6124 = dma.done.wait (%p9110_p0), [#allocation10], 128   ;;  %p9111_p5 = pmov %p9110_p0 }
 0x380   : > { %s9112_s11 = sld [smem:[#allocation138_spill]]  ;;  %s7841_s25 = sand.u32 1, %s6907_s9  }
 0x381   : > { %6126 = vsyncadd (%p9111_p5), [#allocation10], 4294967168  ;;  %s9113_s5 = sld [smem:[#allocation149_spill]]  ;;  %s1588_s4 = scalar_lea.sflag [#allocation13], %s7841_s25 }
 0x386   : > { %s1589_s10 = sand.u32 1, %s9112_s11  }
 0x387   : > { %s7845_s20 = scalar_lea.vmem [#allocation12], %s1589_s10  ;;  %p9115_p1 = scmp.ne.s32.totalorder %s9113_s5, 0 }
 0x388   : > { %9114 = sst [smem:[#allocation122_spill]] %s7845_s20 }
 0x389   : > { %6128 = dma.done.wait (%p9115_p1), %s1588_s4, 16  }
 0x38a   : > { %6130 = vsyncadd (%p9115_p1), %s1588_s4, 4294967280  ;;  %s9116_s28 = sld [smem:[#allocation129_spill]]  ;;  %s9117_s7 = sld [smem:[#allocation152_spill]] }
 0x390   : > { %s1597_s16 = sand.u32 1, %s9116_s28   ;;  %p9119_p7 = scmp.ne.s32.totalorder %s9117_s7, 0 }
 0x391   : > { %s7852_s17 = scalar_lea.vmem [#allocation14], %s1597_s16 }
 0x392   : > { %9118 = sst [smem:[#allocation128_spill]] %s7852_s17 }
 0x393   : > { %6132 = dma.done.wait (%p9119_p7), %s1588_s4, 16  }
 0x394   : > { %6134 = vsyncadd (%p9119_p7), %s1588_s4, 4294967280  ;;  %s9120_s9 = sld [smem:[#allocation137_spill]]  ;;  %s9121_s8 = sld [smem:[#allocation155_spill]] }
 0x395   : > { %s1604_s15 = scalar_lea.sflag [#allocation16], %s7841_s25 }
 0x39a   : > { %s1605_s26 = sand.u32 1, %s9120_s9   ;;  %p9123_p4 = scmp.ne.s32.totalorder %s9121_s8, 0 }
 0x39b   : > { %s7859_s21 = sshll.u32 %s1605_s26, 4 }
 0x39c   : > { %9122 = sst [smem:[#allocation182_spill]] %s7859_s21 }
 0x39d   : > { %6136 = dma.done.wait (%p9123_p4), %s1604_s15, 256  }
 0x39e   : > { %6138 = vsyncadd (%p9123_p4), %s1604_s15, 4294967040  ;;  %s9124_s23 = sld [smem:[#allocation135_spill]] }
 0x39f   : > { %s9125_s18 = sld [smem:[#allocation157_spill]] }
 0x3a4   : > { %s1614_s30 = sand.u32 1, %s9124_s23  }
 0x3a5   : > { %s7868_s19 = sshll.u32 %s1614_s30, 4  ;;  %p9127_p12 = scmp.ne.s32.totalorder %s9125_s18, 0 }
 0x3a6   : > { %9126 = sst [smem:[#allocation183_spill]] %s7868_s19 }
 0x3a7   : > { %6140 = dma.done.wait (%p9127_p12), %s1604_s15, 256  }
 0x3a8   : > { %6142 = vsyncadd (%p9127_p12), %s1604_s15, 4294967040  ;;  %s9128_s1 = sld [smem:[#allocation126_spill]]  ;;  %s9129_s14 = sld [smem:[#allocation160_spill]] }
 0x3a9   : > { %s1622_s5 = scalar_lea.sflag [#allocation19], %s7841_s25 }
 0x3ae   : > { %s1623_s2 = sand.u32 1, %s9128_s1   ;;  %p9131_p2 = scmp.ne.s32.totalorder %s9129_s14, 0 }
 0x3af   : > { %s7876_s11 = sshll.u32 %s1623_s2, 4 }
 0x3b0   : > { %9130 = sst [smem:[#allocation184_spill]] %s7876_s11 }
 0x3b1   : > { %6144 = dma.done.wait (%p9131_p2), %s1622_s5, 256  }
 0x3b2   : > { %6146 = vsyncadd (%p9131_p2), %s1622_s5, 4294967040  ;;  %s9132_s4 = sld [smem:[#allocation124_spill]]  ;;  %s9133_s28 = sld [smem:[#allocation163_spill]] }
 0x3b8   : > { %s1632_s7 = sand.u32 1, %s9132_s4   ;;  %p9135_p11 = scmp.ne.s32.totalorder %s9133_s28, 0 }
 0x3b9   : > { %s7885_s16 = sshll.u32 %s1632_s7, 4 }
 0x3ba   : > { %9134 = sst [smem:[#allocation185_spill]] %s7885_s16 }
 0x3bb   : > { %6148 = dma.done.wait (%p9135_p11), %s1622_s5, 256  }
 0x3bc   : > { %6150 = vsyncadd (%p9135_p11), %s1622_s5, 4294967040  ;;  %s9136_s8 = sld [smem:[#allocation133_spill]]  ;;  %s9137_s26 = sld [smem:[#allocation165_spill]] }
 0x3bd   : > { %s1640_s23 = scalar_lea.sflag [#allocation22], %s7841_s25 }
 0x3c2   : > { %s1641_s15 = sand.u32 1, %s9136_s8   ;;  %p9139_p9 = scmp.ne.s32.totalorder %s9137_s26, 0 }
 0x3c3   : > { %s7894_s18 = scalar_lea.vmem [#allocation21], %s1641_s15 }
 0x3c4   : > { %9138 = sst [smem:[#allocation186_spill]] %s7894_s18 }
 0x3c5   : > { %6152 = dma.done.wait (%p9139_p9), %s1640_s23, 16  }
 0x3c6   : > { %6154 = vsyncadd (%p9139_p9), %s1640_s23, 4294967280  ;;  %s9140_s30 = sld [smem:[#allocation123_spill]]  ;;  %s9141_s1 = sld [smem:[#allocation166_spill]] }
 0x3cc   : > { %s1649_s14 = sand.u32 1, %s9140_s30   ;;  %p9143_p10 = scmp.ne.s32.totalorder %s9141_s1, 0 }
 0x3cd   : > { %s7901_s2 = scalar_lea.vmem [#allocation23], %s1649_s14 }
 0x3ce   : > { %9142 = sst [smem:[#allocation187_spill]] %s7901_s2 }
 0x3cf   : > { %6156 = dma.done.wait (%p9143_p10), %s1640_s23, 16  }
 0x3d0   : > { %6158 = vsyncadd (%p9143_p10), %s1640_s23, 4294967280  ;;  %s9144_s5 = sld [smem:[#allocation120_spill]]  ;;  %s9145_s4 = sld [smem:[#allocation116_spill]] }
 0x3d1   : > { %s1656_s8 = scalar_lea.sflag [#allocation25], %s7841_s25 }
 0x3d6   : > { %s1657_s28 = sand.u32 1, %s9144_s5   ;;  %p9147_p3 = scmp.ne.s32.totalorder %s9145_s4, 0 }
 0x3d7   : > { %s7908_s7 = sshll.u32 %s1657_s28, 4 }
 0x3d8   : > { %9146 = sst [smem:[#allocation116_spill]] %s7908_s7 }
 0x3d9   : > { %6160 = dma.done.wait (%p9147_p3), %s1656_s8, 256  }
 0x3da   : > { %6162 = vsyncadd (%p9147_p3), %s1656_s8, 4294967040  ;;  %s9148_s15 = sld [smem:[#allocation117_spill]]  ;;  %s9149_s30 = sld [smem:[#allocation170_spill]] }
 0x3e0   : > { %s1666_s14 = sand.u32 1, %s9148_s15   ;;  %p9151_p8 = scmp.ne.s32.totalorder %s9149_s30, 0 }
 0x3e1   : > { %s7917_s9 = sshll.u32 %s1666_s14, 4 }
 0x3e2   : > { %9150 = sst [smem:[#allocation188_spill]] %s7917_s9 }
 0x3e3   : > { %6164 = dma.done.wait (%p9151_p8), %s1656_s8, 256  }
 0x3e4   : > { %6166 = vsyncadd (%p9151_p8), %s1656_s8, 4294967040  ;;  %s9152_s1 = sld [smem:[#allocation114_spill]]  ;;  %s9153_s5 = sld [smem:[#allocation110_spill]] }
 0x3e5   : > { %s1674_s26 = scalar_lea.sflag [#allocation28], %s7841_s25 }
 0x3ea   : > { %s1675_s28 = sand.u32 1, %s9152_s1   ;;  %p9155_p13 = scmp.ne.s32.totalorder %s9153_s5, 0 }
 0x3eb   : > { %s7926_s10 = scalar_lea.vmem [#allocation27], %s1675_s28 }
 0x3ec   : > { %9154 = sst [smem:[#allocation110_spill]] %s7926_s10 }
 0x3ed   : > { %6168 = dma.done.wait (%p9155_p13), %s1674_s26, 16  }
 0x3ee   : > { %6170 = vsyncadd (%p9155_p13), %s1674_s26, 4294967280  ;;  %s9156_s4 = sld [smem:[#allocation111_spill]]  ;;  %s9157_s15 = sld [smem:[#allocation174_spill]] }
 0x3f4   : > { %s1683_s14 = sand.u32 1, %s9156_s4   ;;  %p9159_p6 = scmp.ne.s32.totalorder %s9157_s15, 0 }
 0x3f5   : > { %s7933_s23 = scalar_lea.vmem [#allocation29], %s1683_s14 }
 0x3f6   : > { %9158 = sst [smem:[#allocation189_spill]] %s7933_s23 }
 0x3f7   : > { %6172 = dma.done.wait (%p9159_p6), %s1674_s26, 16  }
 0x3f8   : > { %6174 = vsyncadd (%p9159_p6), %s1674_s26, 4294967280  ;;  %s9160_s8 = sld [smem:[#allocation108_spill]]  ;;  %s9161_s30 = sld [smem:[#allocation104_spill]] }
 0x3f9   : > { %s1690_s6 = scalar_lea.sflag [#allocation31], %s7841_s25 }
 0x3fe   : > { %s1691_s1 = sand.u32 1, %s9160_s8   ;;  %p9163_p0 = scmp.ne.s32.totalorder %s9161_s30, 0 }
 0x3ff   : > { %s7940_s28 = sshll.u32 %s1691_s1, 4 }
 0x400   : > { %9162 = sst [smem:[#allocation104_spill]] %s7940_s28 }
 0x401   : > { %6176 = dma.done.wait (%p9163_p0), %s1690_s6, 256  }
 0x402   : > { %6178 = vsyncadd (%p9163_p0), %s1690_s6, 4294967040  ;;  %s9164_s4 = sld [smem:[#allocation105_spill]]  ;;  %p9166_p5 = scmp.ne.s32.totalorder %s9013_s3, 0 }
 0x408   : > { %s1700_s14 = sand.u32 1, %s9164_s4  }
 0x409   : > { %s7949_s29 = scalar_lea.vmem [#allocation32], %s1700_s14 }
 0x40a   : > { %9165 = sst [smem:[#allocation190_spill]] %s7949_s29 }
 0x40b   : > { %6180 = dma.done.wait (%p9166_p5), %s1690_s6, 16  }
 0x40c   : > { %6182 = vsyncadd (%p9166_p5), %s1690_s6, 4294967280  ;;  %s9167_s26 = sld [smem:[#allocation102_spill]]  ;;  %s9168_s15 = sld [smem:[#allocation142_spill]] }
 0x40d   : > { %s9169_s8 = sld [smem:[#allocation141_spill]]  ;;  %s9171_s1 = sld [smem:[#allocation68_spill]] }
 0x40e   : > { %s9174_s29 = sld [smem:[#allocation73_spill]]  ;;  %s9175_s28 = sld [smem:[#allocation74_spill]] }
 0x40f   : > { %s9176_s13 = sld [smem:[#allocation75_spill]]  ;;  %s9177_s2 = sld [smem:[#allocation76_spill]] }
 0x410   : > { %s9178_s18 = sld [smem:[#allocation77_spill]]  ;;  %s9179_s7 = sld [smem:[#allocation78_spill]] }
 0x411   : > { %s9180_s22 = sld [smem:[#allocation79_spill]] }
 0x412   : > { %s7956_s30 = sand.u32 1, %s9167_s26   ;;  %p1922_p1 = scmp.lt.s32.totalorder %s9168_s15, 1 }
 0x413   : > { %s1930_s6 = sld [smem:[#allocation7 + %s9169_s8]]  ;;  %p2057_p6 = scmp.eq.s32.totalorder %s9169_s8, 1 }
 0x414   : > { %s9373_s15 = smov (!%p1922_p1, %s9168_s15), 1  ;;  %s1935_s14 = sld [smem:[#allocation7 + %s9169_s8]] }
 0x415   : > { %s1940_s5 = sld [smem:[#allocation7 + %s9169_s8]]  ;;  %s4549_s0 = sshll.u32 %s9373_s15, 4 }
 0x416   : > { %s7970_s24 = scalar_lea.vmem %s9171_s1, %s4549_s0  ;;  %s1947_s27 = sld [smem:[#allocation7 + %s9169_s8]] }
 0x417   : > { %s1954_s26 = sld [smem:[#allocation7 + %s9169_s8]] }
 0x418   : > { %s1961_s12 = sld [smem:[#allocation7 + %s9169_s8]] }
 0x419   : > { %p1931_p7 = scmp.lt.s32.totalorder %s1930_s6, 1  ;;  %s1968_s10 = sld [smem:[#allocation7 + %s9169_s8]] }
 0x41a   : > { %s7977_s3 = sld [smem:[#allocation7 + %s9169_s8]]  ;;  %p1936_p4 = scmp.lt.s32.totalorder %s1935_s14, 1 }
 0x41b   : > { %s1978_s23 = sld [smem:[#allocation7 + %s9169_s8]]  ;;  %s9375_s6 = smov (!%p1931_p7, %s1930_s6), 1 }
 0x41c   : > { %p1941_p12 = scmp.lt.s32.totalorder %s1940_s5, 1  ;;  %p1948_p2 = scmp.lt.s32.totalorder %s1947_s27, 1 }
 0x41d   : > { %s9377_s14 = smov (!%p1936_p4, %s1935_s14), 1  ;;  %p1955_p11 = scmp.lt.s32.totalorder %s1954_s26, 1 }
 0x41e   : > { %s9379_s5 = smov (!%p1941_p12, %s1940_s5), 1  ;;  %p1962_p9 = scmp.lt.s32.totalorder %s1961_s12, 1 }
 0x41f   : > { %s4550_s1 = sshll.u32 %s9379_s5, 4  ;;  %p1969_p10 = scmp.lt.s32.totalorder %s1968_s10, 1 }
 0x420   : > { %s7989_s9 = scalar_lea.vmem %s9174_s29, %s4550_s1  ;;  %s9381_s27 = smov (!%p1948_p2, %s1947_s27), 1 }
 0x421   : > { %s9383_s26 = smov (!%p1955_p11, %s1954_s26), 1  ;;  %s4551_s4 = sshll.u32 %s9381_s27, 5 }
 0x422   : > { %p1974_p3 = scmp.lt.s32.totalorder %s7977_s3, 1  ;;  %s7993_s25 = scalar_lea.vmem %s9175_s28, %s4551_s4 }
 0x423   : > { %s4552_s0 = sshll.u32 %s9383_s26, 5  ;;  %p1979_p8 = scmp.lt.s32.totalorder %s1978_s23, 1 }
 0x424   : > { %s7996_s16 = scalar_lea.vmem %s9176_s13, %s4552_s0  ;;  %s9385_s12 = smov (!%p1962_p9, %s1961_s12), 1 }
 0x425   : > { %s9387_s10 = smov (!%p1969_p10, %s1968_s10), 1  ;;  %s4553_s29 = sshll.u32 %s9385_s12, 4 }
 0x426   : > { %s9181_s5 = sld [smem:[#allocation140_spill]]  ;;  %s8002_s27 = scalar_lea.vmem %s9177_s2, %s4553_s29 }
 0x427   : > { %s1985_s1 = sld [smem:[#allocation7 + %s9169_s8]]  ;;  %s1971_s11 = scalar_lea.vmem %s9178_s18, %s9387_s10 }
 0x428   : > { %s9182_s28 = sld [smem:[#allocation80_spill]]  ;;  %s9389_s3 = smov (!%p1974_p3, %s7977_s3), 1 }
 0x429   : > { %s9391_s23 = smov (!%p1979_p8, %s1978_s23), 1  ;;  %s1976_s13 = scalar_lea.vmem %s9179_s7, %s9389_s3 }
 0x42a   : > { %s1992_s26 = sld [smem:[#allocation7 + %s9169_s8]]  ;;  %s4554_s4 = sshll.u32 %s9391_s23, 4 }
 0x42b   : > { %s1997_s17 = sld [smem:[#allocation7 + %s9169_s8]]  ;;  %s8014_s19 = scalar_lea.vmem %s9180_s22, %s4554_s4 }
 0x42c   : > { %s2002_s12 = sld [smem:[#allocation7 + %s9169_s8]]  ;;  %p2058_p0 = scmp.eq.s32.totalorder %s9181_s5, 1 }
 0x42d   : > { %p1986_p13 = scmp.lt.s32.totalorder %s1985_s1, 1  ;;  %s2009_s21 = sld [smem:[#allocation7 + %s9169_s8]] }
 0x42e   : > { %s9185_s18 = sld [smem:[#allocation83_spill]]  ;;  %s9186_s2 = sld [smem:[#allocation84_spill]] }
 0x42f   : > { %s9393_s1 = smov (!%p1986_p13, %s1985_s1), 1  ;;  %p8037_p12 = pnand %p2058_p0, %p2057_p6 }
 0x430   : > { %s4555_s29 = sshll.u32 %s9393_s1, 4  ;;  %p1993_p5 = scmp.lt.s32.totalorder %s1992_s26, 1 }
 0x431   : > { %s8021_s7 = scalar_lea.vmem %s9182_s28, %s4555_s29  ;;  %p1998_p1 = scmp.lt.s32.totalorder %s1997_s17, 1 }
 0x432   : > { %s9395_s26 = smov (!%p1993_p5, %s1992_s26), 1  ;;  %p2003_p7 = scmp.lt.s32.totalorder %s2002_s12, 1 }
 0x433   : > { %s9397_s17 = smov (!%p1998_p1, %s1997_s17), 1  ;;  %p2010_p4 = scmp.lt.s32.totalorder %s2009_s21, 1 }
 0x434   : > { %s9399_s12 = smov (!%p2003_p7, %s2002_s12), 1  ;;  %p2061_p2 = scmp.eq.s32.totalorder %s9169_s8, 0 }
 0x435   : > { %s9401_s21 = smov (!%p2010_p4, %s2009_s21), 1  ;;  %s4556_s1 = sshll.u32 %s9399_s12, 4 }
 0x436   : > { %s8042_s4 = scalar_lea.vmem %s9185_s18, %s4556_s1  ;;  %s2012_s29 = scalar_lea.vmem %s9186_s2, %s9401_s21 }
 0x437   : > { %p2062_p11 = scmp.eq.s32.totalorder %s9181_s5, 0  ;;  %s9188_s0 = sshll.u32 %s7956_s30, 3 }
 0x438   : > { %s8050_s20 = scalar_lea.vmem [#allocation33], %s9188_s0  ;;  %s1921_s23 = scalar_lea.vmem [#allocation34], %s7956_s30 }
 0x439   : > { %p2063_p9 = pnand %p2062_p11, %p2061_p2 }
 0x43a   : > { %v2067_v0 = vld [vmem:[#allocation9] sm:$0xff] (!%p2063_p9)  ;;  %vm2068_vm0 = vcmask (!%p2063_p9), 261120  }
 0x43b   : > { %2066 = sbr.rel (%p2063_p9) target bundleno = 1090 (0x442), region = 208  ;;  %2069 = vst.msk [vmem:[#allocation2] sm:$0xff] (!%p2063_p9), %vm2068_vm0, %v2067_v0 }
 0x442 PF: > { %s9189_s12 = sld [smem:[#allocation140_spill]] }
 0x448   : > { %p4465_p10 = scmp.ne.s32.totalorder %s9189_s12, 0 }
 0x449   : > { %s9190_s22 = sld [smem:[#allocation141_spill]] (!%p4465_p10) }
 0x44a   : > { %2072 = sbr.rel (%p4465_p10) target bundleno = 3596 (0xe0c), region = 212 }
 0x44f   : > { %p4466_p3 = scmp.gt.s32.totalorder (!%p4465_p10), %s9190_s22, 1 }
 0x451   : > { %2076 = sbr.rel (%p4466_p3) target bundleno = 1340 (0x53c), region = 216  ;;  %v5349_v1 = vld [vmem:[%s7993_s25] sm:$0xff] (!%p4466_p3)   ;;  %v6452_v2 = vmov (!%p4466_p3), 0.0   ;;  %v5351_v4 = vld [vmem:[%s7993_s25 + $0x8] sm:$0xff] (!%p4466_p3)   ;;  %vm6453_vm1 = vmmov (!%p4466_p3), 0   ;;  %v5353_v6 = vld [vmem:[%s7993_s25 + $0x10] sm:$0xff] (!%p4466_p3)  }
 0x452   : > { %4623 = vmatprep.subr.bf16.mxu0 (!%p4466_p3), %v6452_v2  ;;  %4635 = vmatprep.subr.bf16.mxu1 (!%p4466_p3), %v6452_v2  ;;  %v5350_v3 = vld [vmem:[%s7996_s16] sm:$0xff] (!%p4466_p3)   ;;  %v5352_v5 = vld [vmem:[%s7996_s16 + $0x8] sm:$0xff] (!%p4466_p3)   ;;  %v5354_v7 = vld [vmem:[%s7996_s16 + $0x10] sm:$0xff] (!%p4466_p3)   ;;  %vm2112_vm2 = vcmask (!%p4466_p3), 523264   ;;  %vm2158_vm3 = vcmask (!%p4466_p3), 261120  }
 0x453   : > { %4624 = vmatpush3.bf16.msra.mxu0 (!%p4466_p3), %v5349_v1  ;;  %4631 = vmatprep.mubr.msk.bf16.mxu0 (!%p4466_p3), %vm6453_vm1, %v6452_v2  ;;  %v5355_v8 = vld [vmem:[%s7993_s25 + $0x18] sm:$0xff] (!%p4466_p3)   ;;  %v2077_v9 = vld [vmem:[%s7970_s24] sm:$0xff] (!%p4466_p3)  ;;  %v2078_v10 = vld [vmem:[%s7970_s24 + $0x8] sm:$0xff] (!%p4466_p3) }
 0x454   : > { %4636 = vmatpush3.bf16.msra.mxu1 (!%p4466_p3), %v5350_v3  ;;  %4625 = vmatprep.subr.bf16.mxu0 (!%p4466_p3), %v6452_v2  ;;  %v5356_v11 = vld [vmem:[%s7996_s16 + $0x18] sm:$0xff] (!%p4466_p3)   ;;  %v2079_v12 = vpack.c.bf16 (!%p4466_p3), %v2078_v10, %v2077_v9 }
 0x455   : > { %4637 = vmatprep.subr.bf16.mxu1 (!%p4466_p3), %v6452_v2  ;;  %4643 = vmatprep.mubr.msk.bf16.mxu1 (!%p4466_p3), %vm6453_vm1, %v6452_v2 }
 0x457   : > { %4626 = vmatpush3.bf16.msra.mxu0 (!%p4466_p3), %v5351_v4 }
 0x458   : > { %4638 = vmatpush3.bf16.msra.mxu1 %v5352_v5  ;;  %4627 = vmatprep.subr.bf16.mxu0 %v6452_v2 }
 0x459   : > { %4639 = vmatprep.subr.bf16.mxu1 %v6452_v2 }
 0x45b   : > { %4628 = vmatpush3.bf16.msra.mxu0 %v5353_v6 }
 0x45c   : > { %4640 = vmatpush3.bf16.msra.mxu1 %v5354_v7  ;;  %4629 = vmatprep.subr.bf16.mxu0 %v6452_v2 }
 0x45d   : > { %4641 = vmatprep.subr.bf16.mxu1 %v6452_v2 }
 0x45f   : > { %4630 = vmatpush3.bf16.msra.mxu0 %v5355_v8 }
 0x460   : > { %4642 = vmatpush3.bf16.msra.mxu1 %v5356_v11 }
 0x462   : > { %4632 = vmatmul.mubr.msk.bf16.vlgmr.msra.gmra.mrb[0].mxu0 %vm2112_vm2, %v2079_v12 }
 0x463   : > { %4644 = vmatmul.mubr.msk.bf16.vlgmr.msra.gmra.mrb[0].mxu1 %vm2112_vm2, %v2079_v12 }
 0x535   : > { %v2150_v13 = vpop.f32.mrb[0].mxu0 }
 0x536   : > { %v2226_v14 = vpop.f32.mrb[0].mxu1  ;;  %v4633_v15 = vpop.f32.mrb[1].mxu0 }
 0x537   : > { %v4645_v16 = vpop.f32.mrb[1].mxu1  ;;  %v2153_v17 = vpop.f32.mrb[2].mxu0 }
 0x538   : > { %v2157_v18 = vpack.c.bf16 %v2153_v17, %v2150_v13  ;;  %v2229_v19 = vpop.f32.mrb[2].mxu1  ;;  %v4634_v20 = vpop.f32.mrb[3].mxu0 }
 0x539   : > { %v2233_v21 = vpack.c.bf16 %v2229_v19, %v2226_v14  ;;  %v4646_v22 = vpop.f32.mrb[3].mxu1 }
 0x53a   : > { %2159 = vst.msk [vmem:[#allocation4] sm:$0xff] %vm2158_vm3, %v2157_v18 }
 0x53b   : > { %2234 = vst.msk [vmem:[#allocation5] sm:$0xff] %vm2158_vm3, %v2233_v21 }
 0x53c PF: > { %v8065_v23 = vld [vmem:[#allocation2] sm:$0xff]  ;;  %vm2238_vm4 = vcmask 261120   ;;  %v6454_v31 = vmov 0.0   ;;  %vm6455_vm5 = vmmov 0   ;;  %s9191_s24 = sld [smem:[#allocation71_spill]]  ;;  %v5358_v32 = vld [vmem:[%s7989_s9 + $0x8] sm:$0xff]   ;;  %v2379_v50 = vlaneseq }
 0x53d   : > { %v2239_v24 = vsel %vm2238_vm4, %v8065_v23, 0.0  ;;  %v5357_v30 = vld [vmem:[%s7989_s9] sm:$0xff]   ;;  %4647 = vmatprep.subr.bf16.mxu0 %v6454_v31  ;;  %4651 = vmatprep.mubr.msk.bf16.mxu0 %vm6455_vm5, %v6454_v31  ;;  %s9192_s16 = sld [smem:[#allocation72_spill]]  ;;  %s9194_s8 = sld [smem:[#allocation69_spill]]  ;;  %v6456_v54 = vmov 0   ;;  %vm2385_vm8 = vcmask 130048  }
 0x53e   : > { %2240 = vadd.xlane.f32.xlu0 %v2239_v24  ;;  %4648 = vmatpush3.bf16.msra.mxu0 %v5357_v30  ;;  %v2380_v52 = vshrl.u32 %v2379_v50, 7  ;;  %v5359_v6 = vld [vmem:[%s8002_s27] sm:$0xff]   ;;  %v5360_v7 = vld [vmem:[%s8002_s27 + $0x8] sm:$0xff]   ;;  %s9199_s5 = sld [smem:[#allocation82_spill]] }
 0x53f   : > { %4655 = vmatprep.subr.bf16.mxu1 %v6454_v31  ;;  %4649 = vmatprep.subr.bf16.mxu0 %v6454_v31  ;;  %v5363_v30 = vld [vmem:[%s8021_s7 + $0x8] sm:$0xff]  }
 0x540   : > { %4657 = vmatprep.mubr.msk.bf16.mxu1 %vm6455_vm5, %v6454_v31  ;;  %v2381_v53 = vsub.s32 0, %v2380_v52 }
 0x541   : > { %v2328_v33 = vld [vmem:[#allocation4] sm:$0xff] }
 0x542   : > { %4650 = vmatpush3.bf16.msra.mxu0 %v5358_v32  ;;  %v2333_v34 = vsel %vm2238_vm4, %v2328_v33, 0  ;;  %s9193_s9 = scalar_lea.vmem %s9191_s24, %s9375_s6  ;;  %v2398_v5 = vld [vmem:[#allocation5] sm:$0xff]  ;;  %v5364_v32 = vld [vmem:[%s8014_s19 + $0x8] sm:$0xff]  }
 0x543   : > { %4661 = vmatprep.subr.bf16.mxu0 %v6454_v31  ;;  %4656 = vmatpush3.bf16.xpose.msra.mxu1 %v2333_v34  ;;  %v4477_v39 = vld [vmem:[%s9193_s9] ss:$0 sm:$0xff]  ;;  %s9195_s25 = scalar_lea.vmem %s9192_s16, %s9377_s14  ;;  %s9196_s6 = scalar_lea.vmem %s9194_s8, %s9373_s15 }
 0x544   : > { %4667 = vmatprep.subr.bf16.mxu1 %v6454_v31  ;;  %v4478_v41 = vld [vmem:[%s9195_s25] ss:$0 sm:$0xff] }
 0x545   : > { %v2376_v51 = vld [vmem:[%s9196_s6] sm:$0x1] }
 0x546   : > { %vm2377_vm6 = vcmp.gt.f32.partialorder %v2376_v51, 0.0 }
 0x547   : > { %v2378_v55 = vsel %vm2377_vm6, 1, %v6456_v54 }
 0x548   : > { %v2382_v56 = vrot.slane %v2378_v55, %v2381_v53 }
 0x54a   : > { %vm2383_vm7 = vcmp.eq.s32.totalorder %v2382_v56, 1 }
 0x5cb   : > { %v2241_v25 = vpop.xlane.xlu0 %2240 }
 0x5cc   : > { %v2243_v26 = vmul.f32 0.03125, %v2241_v25 }
 0x5ce   : > { %v2244_v27 = vsub.f32 %v8065_v23, %v2243_v26 }
 0x5d0   : > { %v2245_v28 = vmul.f32 %v2244_v27, %v2244_v27 }
 0x5d2   : > { %v2246_v29 = vsel %vm2238_vm4, %v2245_v28, 0.0 }
 0x5d3   : > { %2247 = vadd.xlane.f32.xlu0 %v2246_v29  ;;  %v5361_v29 = vld [vmem:[%s8021_s7] sm:$0xff]  }
 0x660   : > { %v2248_v35 = vpop.xlane.xlu0 %2247 }
 0x661   : > { %v2249_v36 = vmul.f32 0.03125, %v2248_v35 }
 0x663   : > { %v2250_v37 = vadd.f32 1e-05, %v2249_v36 }
 0x665   : > { %5367 = vrsqrt.f32 %v2250_v37  ;;  %v4487_v37 = vld [vmem:[%s1971_s11] ss:$0 sm:$0xff]  ;;  %s9201_s11 = scalar_lea.vmem %s9199_s5, %s9397_s17 }
 0x66f   : > { %v5368_v38 = vpop.eup %5367 }
 0x670   : > { %v2252_v40 = vmul.f32 %v5368_v38, %v2244_v27 }
 0x672   : > { %v2259_v42 = vmul.f32 %v4477_v39, %v2252_v40  ;;  %v4488_v39 = vld [vmem:[%s1976_s13] ss:$0 sm:$0xff] }
 0x674   : > { %v2266_v43 = vadd.f32 %v4478_v41, %v2259_v42 }
 0x676   : > { %v2267_v44 = vpack.c.bf16 %v2266_v43, %v2266_v43  ;;  %v5365_v43 = vld [vmem:[%s8042_s4] sm:$0xff]  }
 0x678   : > { %4652 = vmatmul.mubr.msk.bf16.vlgmr.msra.gmra.mrb[0].mxu0 %vm2238_vm4, %v2267_v44  ;;  %v5366_v44 = vld [vmem:[%s8042_s4 + $0x8] sm:$0xff]  }
 0x679   : > { %4663 = vmatprep.mubr.msk.bf16.mxu0 %vm6455_vm5, %v6454_v31  ;;  %4662 = vmatpush3.bf16.msra.mxu0 %v2398_v5 }
 0x67a   : > { %4675 = vmatprep.subr.bf16.mxu0 %v6454_v31 }
 0x74b   : > { %v2321_v45 = vpop.f32.mrb[0].mxu0 }
 0x74c   : > { %v2327_v46 = vpack.c.bf16 %v2321_v45, %v2321_v45  ;;  %v4653_v47 = vpop.f32.mrb[1].mxu0  ;;  %v4493_v45 = vld [vmem:[%s9201_s11] ss:$0 sm:$0xff] }
 0x74d   : > { %v2324_v48 = vpop.f32.mrb[2].mxu0 }
 0x74e   : > { %v4654_v49 = vpop.f32.mrb[3].mxu0  ;;  %4658 = vmatmul.mubr.msk.bf16.vlgmr.msra.gmra.mrb[0].mxu1 %vm2238_vm4, %v2327_v46 }
 0x74f   : > { %4671 = vmatprep.mubr.msk.bf16.mxu1 %vm6455_vm5, %v6454_v31  ;;  %4668 = vmatpush3.bf16.msra.mxu1 %v5359_v6 }
 0x750   : > { %4669 = vmatprep.subr.bf16.mxu1 %v6454_v31 }
 0x753   : > { %4670 = vmatpush3.bf16.msra.mxu1 %v5360_v7 }
 0x754   : > { %4683 = vmatprep.subr.bf16.mxu1 %v6454_v31 }
 0x821   : > { %v2369_v57 = vpop.f32.mrb[0].mxu1 }
 0x822   : > { %v2375_v58 = vmul.f32 0.17677669, %v2369_v57  ;;  %v4659_v59 = vpop.f32.mrb[1].mxu1 }
 0x823   : > { %v2372_v60 = vpop.f32.mrb[2].mxu1 }
 0x824   : > { %v4660_v61 = vpop.f32.mrb[3].mxu1  ;;  %v2384_v62 = vsel %vm2383_vm7, %v2375_v58, -1e+30 }
 0x825   : > { %v2386_v63 = vsel %vm2385_vm8, %v2384_v62, -inf }
 0x826   : > { %2387 = vmax.xlane.f32.xlu1 %v2386_v63  ;;  %v4497_v63 = vld [vmem:[%s2012_s29] ss:$0 sm:$0xff] }
 0x8b3   : > { %v2388_v0 = vpop.xlane.xlu1 %2387 }
 0x8b4   : > { %v2389_v1 = vsub.f32 %v2384_v62, %v2388_v0 }
 0x8b6   : > { %v2390_v2 = vmul.f32 1.442695, %v2389_v1 }
 0x8b8   : > { %5369 = vpow2.f32 %v2390_v2 }
 0x8c2   : > { %v5370_v3 = vpop.eup %5369 }
 0x8c3   : > { %v2392_v4 = vsel %vm2385_vm8, %v5370_v3, 0.0 }
 0x8c4   : > { %2393 = vadd.xlane.f32.xlu1 %v2392_v4 }
 0x951   : > { %v2394_v8 = vpop.xlane.xlu1 %2393 }
 0x952   : > { %5371 = vrcp.f32 %v2394_v8 }
 0x95c   : > { %v5372_v9 = vpop.eup %5371 }
 0x95d   : > { %v2396_v10 = vmul.f32 %v5372_v9, %v5370_v3 }
 0x95f   : > { %v2397_v11 = vpack.c.bf16 %v2396_v10, %v2396_v10 }
 0x961   : > { %4664 = vmatmul.mubr.msk.bf16.vlgmr.msra.gmra.mrb[4].mxu0 %vm2385_vm8, %v2397_v11 }
 0x962   : > { %4679 = vmatprep.mubr.msk.bf16.mxu0 %vm6455_vm5, %v6454_v31 }
 0xa34   : > { %v2436_v12 = vpop.f32.mrb[4].mxu0 }
 0xa35   : > { %v2442_v13 = vpack.c.bf16 %v2436_v12, %v2436_v12  ;;  %v4665_v14 = vpop.f32.mrb[5].mxu0 }
 0xa36   : > { %v2439_v15 = vpop.f32.mrb[6].mxu0 }
 0xa37   : > { %v4666_v16 = vpop.f32.mrb[7].mxu0  ;;  %4672 = vmatmul.mubr.msk.bf16.vlgmr.msra.gmra.mrb[4].mxu1 %vm2238_vm4, %v2442_v13 }
 0xa38   : > { %4687 = vmatprep.mubr.msk.bf16.mxu1 %vm6455_vm5, %v6454_v31  ;;  %4684 = vmatpush3.bf16.msra.mxu1 %v5361_v29 }
 0xa39   : > { %4685 = vmatprep.subr.bf16.mxu1 %v6454_v31 }
 0xa3c   : > { %4686 = vmatpush3.bf16.msra.mxu1 %v5363_v30 }
 0xb0a   : > { %v2496_v17 = vpop.f32.mrb[4].mxu1 }
 0xb0b   : > { %v8112_v18 = vadd.f32 %v2496_v17, %v8065_v23  ;;  %v4673_v19 = vpop.f32.mrb[5].mxu1  ;;  %v5362_v23 = vld [vmem:[%s8014_s19] sm:$0xff]   ;;  %s9200_s19 = sld [smem:[#allocation81_spill]] }
 0xb0c   : > { %v2499_v20 = vpop.f32.mrb[6].mxu1  ;;  %4676 = vmatpush3.bf16.msra.mxu0 %v5362_v23 }
 0xb0d   : > { %v4674_v21 = vpop.f32.mrb[7].mxu1  ;;  %v2505_v22 = vsel %vm2238_vm4, %v8112_v18, 0.0  ;;  %4677 = vmatprep.subr.bf16.mxu0 %v6454_v31 }
 0xb0e   : > { %2506 = vadd.xlane.f32.xlu0 %v2505_v22 }
 0xb10   : > { %4678 = vmatpush3.bf16.msra.mxu0 %v5364_v32 }
 0xb11   : > { %4691 = vmatprep.subr.bf16.mxu0 %v6454_v31  ;;  %s9203_s3 = scalar_lea.vmem %s9200_s19, %s9395_s26 }
 0xb12   : > { %v4489_v56 = vld [vmem:[%s9203_s3] ss:$0 sm:$0xff] }
 0xb9b   : > { %v2507_v24 = vpop.xlane.xlu0 %2506 }
 0xb9c   : > { %v2508_v25 = vmul.f32 0.03125, %v2507_v24 }
 0xb9e   : > { %v2509_v26 = vsub.f32 %v8112_v18, %v2508_v25 }
 0xba0   : > { %v2510_v27 = vmul.f32 %v2509_v26, %v2509_v26 }
 0xba2   : > { %v2511_v28 = vsel %vm2238_vm4, %v2510_v27, 0.0 }
 0xba3   : > { %2512 = vadd.xlane.f32.xlu1 %v2511_v28 }
 0xc30   : > { %v2513_v33 = vpop.xlane.xlu1 %2512 }
 0xc31   : > { %v2514_v34 = vmul.f32 0.03125, %v2513_v33 }
 0xc33   : > { %v2515_v35 = vadd.f32 1e-05, %v2514_v34 }
 0xc35   : > { %5373 = vrsqrt.f32 %v2515_v35 }
 0xc3f   : > { %v5374_v36 = vpop.eup %5373 }
 0xc40   : > { %v2517_v38 = vmul.f32 %v5374_v36, %v2509_v26 }
 0xc42   : > { %v2524_v40 = vmul.f32 %v4487_v37, %v2517_v38 }
 0xc44   : > { %v2531_v41 = vadd.f32 %v4488_v39, %v2524_v40 }
 0xc46   : > { %v2532_v42 = vpack.c.bf16 %v2531_v41, %v2531_v41 }
 0xc48   : > { %4680 = vmatmul.mubr.msk.bf16.vlgmr.msra.gmra.mrb[8].mxu0 %vm2238_vm4, %v2532_v42  ;;  %4688 = vmatmul.mubr.msk.bf16.vlgmr.msra.gmra.mrb[8].mxu1 %vm2238_vm4, %v2532_v42 }
 0xc49   : > { %4695 = vmatprep.mubr.msk.bf16.mxu0 %vm6455_vm5, %v6454_v31  ;;  %4692 = vmatpush3.bf16.msra.mxu0 %v5365_v43 }
 0xc4a   : > { %4693 = vmatprep.subr.bf16.mxu0 %v6454_v31 }
 0xc4d   : > { %4694 = vmatpush3.bf16.msra.mxu0 %v5366_v44 }
 0xd1b   : > { %v2593_v46 = vpop.f32.mrb[8].mxu0  ;;  %v2656_v47 = vpop.f32.mrb[8].mxu1 }
 0xd1c   : > { %v2657_v48 = vadd.f32 %v4493_v45, %v2656_v47  ;;  %v4681_v49 = vpop.f32.mrb[9].mxu0  ;;  %v4689_v50 = vpop.f32.mrb[9].mxu1  ;;  %v2594_v59 = vadd.f32 %v4489_v56, %v2593_v46 }
 0xd1d   : > { %v2596_v51 = vpop.f32.mrb[10].mxu0  ;;  %v2659_v52 = vpop.f32.mrb[10].mxu1 }
 0xd1e   : > { %v2664_v53 = vmul.f32 0.70710677, %v2657_v48  ;;  %v4682_v54 = vpop.f32.mrb[11].mxu0  ;;  %v4690_v55 = vpop.f32.mrb[11].mxu1  ;;  %v2662_v57 = vmul.f32 0.5, %v2657_v48 }
 0xd20   : > { %5375 = verf.f32 %v2664_v53 }
 0xd2a   : > { %v5376_v31 = vpop.eup %5375 }
 0xd2b   : > { %v2666_v58 = vadd.f32 1.0, %v5376_v31 }
 0xd2d   : > { %v2667_v60 = vmul.f32 %v2666_v58, %v2662_v57 }
 0xd2f   : > { %v2668_v61 = vmul.f32 %v2667_v60, %v2594_v59 }
 0xd31   : > { %v2669_v62 = vpack.c.bf16 %v2668_v61, %v2668_v61 }
 0xd33   : > { %4696 = vmatmul.mubr.msk.bf16.vlgmr.msra.gmra.mrb[12].mxu0 %vm2238_vm4, %v2669_v62 }
 0xe06   : > { %v2730_v0 = vpop.f32.mrb[12].mxu0 }
 0xe07   : > { %v2731_v1 = vadd.f32 %v4497_v63, %v2730_v0  ;;  %v4697_v2 = vpop.f32.mrb[13].mxu0 }
 0xe08   : > { %v2733_v3 = vpop.f32.mrb[14].mxu0 }
 0xe09   : > { %v2736_v4 = vadd.f32 %v2731_v1, %v8112_v18  ;;  %v4698_v5 = vpop.f32.mrb[15].mxu0 }
 0xe0b   : > { %2737 = vst.msk [vmem:[#allocation2] sm:$0xff] %vm2238_vm4, %v2736_v4 }
 0xe0c PF: > { %s9204_s17 = sld [smem:[#allocation182_spill]]  ;;  %s9205_s27 = sld [smem:[#allocation183_spill]]  ;;  %vm2741_vm9 = vcmask 261120   ;;  %v6457_v15 = vmov 0.0   ;;  %vm6458_vm10 = vmmov 0   ;;  %vm2945_vm11 = vcmask 64512  }
 0xe0d   : > { %4699 = vmatprep.subr.bf16.mxu0 %v6457_v15  ;;  %4707 = vmatprep.subr.bf16.mxu1 %v6457_v15  ;;  %s9210_s2 = sld [smem:[#allocation122_spill]]  ;;  %s9211_s7 = sld [smem:[#allocation128_spill]]  ;;  %vm3008_vm12 = vcmask 1043456   ;;  %vm3171_vm13 = vcmask 130112   ;;  %vm3288_vm14 = vcmask 195712   ;;  %vm3405_vm15 = vcmask 261312  }
 0xe0e   : > { %4703 = vmatprep.mubr.msk.bf16.mxu0 %vm6458_vm10, %v6457_v15  ;;  %s9212_s22 = sld [smem:[#allocation184_spill]]  ;;  %4711 = vmatprep.mubr.msk.bf16.mxu1 %vm6458_vm10, %v6457_v15  ;;  %s6459_s29 = smov 112   ;;  %vm3717_vm0 = vcmask (!%p8037_p12), 253952  }
 0xe0f   : > { %s6460_s0 = smov 120   ;;  %s6461_s12 = smov 104  }
 0xe10   : > { %s9215_s24 = sld [smem:[#allocation185_spill]]  ;;  %s6462_s16 = smov 8  }
 0xe11   : > { %s6463_s9 = smov 16   ;;  %s6464_s6 = smov 24  }
 0xe12   : > { %v8150_v6 = vld [vmem:[#allocation2] sm:$0xff]  ;;  %s9206_s21 = scalar_lea.vmem [#allocation15], %s9204_s17  ;;  %s9207_s13 = scalar_lea.vmem [#allocation17], %s9205_s27 }
 0xe13   : > { %v2742_v7 = vsel %vm2741_vm9, %v8150_v6, 0.0  ;;  %v5377_v13 = vld [vmem:[%s9206_s21] sm:$0xff]   ;;  %s9208_s26 = smov %s9206_s21  ;;  %s9209_s18 = smov %s9207_s13 }
 0xe14   : > { %2743 = vadd.xlane.f32.xlu0 %v2742_v7  ;;  %v5378_v14 = vld [vmem:[%s9207_s13] sm:$0xff]   ;;  %4700 = vmatpush3.bf16.msra.mxu0 %v5377_v13  ;;  %v5379_v16 = vld [vmem:[%s9208_s26 + $0x8] sm:$0xff]   ;;  %s9213_s1 = scalar_lea.vmem [#allocation18], %s9212_s22  ;;  %s9218_s15 = sld [smem:[#allocation116_spill]] }
 0xe15   : > { %4708 = vmatpush3.bf16.msra.mxu1 %v5378_v14  ;;  %v5380_v17 = vld [vmem:[%s9209_s18 + $0x8] sm:$0xff]   ;;  %4701 = vmatprep.subr.bf16.mxu0 %v6457_v15  ;;  %v4501_v22 = vld [vmem:[%s9210_s2] ss:$0 sm:$0xff]  ;;  %s9214_s4 = smov %s9213_s1  ;;  %s9219_s14 = sld [smem:[#allocation188_spill]] }
 0xe16   : > { %4709 = vmatprep.subr.bf16.mxu1 %v6457_v15  ;;  %v4502_v25 = vld [vmem:[%s9211_s7] ss:$0 sm:$0xff]  ;;  %v5382_v23 = vld [vmem:[%s9214_s4 + $0x8] sm:$0xff]   ;;  %s9216_s8 = scalar_lea.vmem [#allocation20], %s9215_s24  ;;  %s9222_s11 = sld [smem:[#allocation186_spill]] }
 0xe17   : > { %v5381_v28 = vld [vmem:[%s9213_s1] sm:$0xff]   ;;  %s9217_s25 = smov %s9216_s8  ;;  %s9223_s10 = sld [smem:[#allocation187_spill]] }
 0xe18   : > { %4702 = vmatpush3.bf16.msra.mxu0 %v5379_v16  ;;  %s9226_s27 = sld [smem:[#allocation104_spill]]  ;;  %s9227_s21 = sld [smem:[#allocation189_spill]] }
 0xe19   : > { %4710 = vmatpush3.bf16.msra.mxu1 %v5380_v17  ;;  %4715 = vmatprep.subr.bf16.mxu0 %v6457_v15  ;;  %s9230_s18 = sld [smem:[#allocation110_spill]] }
 0xe1a   : > { %4723 = vmatprep.subr.bf16.mxu1 %v6457_v15  ;;  %s9220_s5 = scalar_lea.vmem [#allocation24], %s9218_s15  ;;  %s9231_s2 = sld [smem:[#allocation190_spill]] }
 0xe1b   : > { %s9221_s19 = scalar_lea.vmem [#allocation26], %s9219_s14  ;;  %s9224_s3 = smov %s9220_s5 }
 0xe1c   : > { %s9225_s17 = smov %s9221_s19 }
 0xe1e   : > { %s9228_s13 = scalar_lea.vmem [#allocation30], %s9226_s27 }
 0xe1f   : > { %s9229_s26 = smov %s9228_s13 }
 0xea1   : > { %v2744_v8 = vpop.xlane.xlu0 %2743 }
 0xea2   : > { %v2746_v9 = vmul.f32 0.03125, %v2744_v8 }
 0xea4   : > { %v2747_v10 = vsub.f32 %v8150_v6, %v2746_v9 }
 0xea6   : > { %v2748_v11 = vmul.f32 %v2747_v10, %v2747_v10 }
 0xea8   : > { %v2749_v12 = vsel %vm2741_vm9, %v2748_v11, 0.0 }
 0xea9   : > { %2750 = vadd.xlane.f32.xlu0 %v2749_v12 }
 0xf36   : > { %v2751_v18 = vpop.xlane.xlu0 %2750 }
 0xf37   : > { %v2752_v19 = vmul.f32 0.03125, %v2751_v18 }
 0xf39   : > { %v2753_v20 = vadd.f32 1e-05, %v2752_v19 }
 0xf3b   : > { %5391 = vrsqrt.f32 %v2753_v20 }
 0xf45   : > { %v5392_v21 = vpop.eup %5391 }
 0xf46   : > { %v2755_v24 = vmul.f32 %v5392_v21, %v2747_v10 }
 0xf48   : > { %v2762_v26 = vmul.f32 %v4501_v22, %v2755_v24 }
 0xf4a   : > { %v2769_v27 = vadd.f32 %v4502_v25, %v2762_v26 }
 0xf4c   : > { %v2770_v29 = vpack.c.bf16 %v2769_v27, %v2769_v27 }
 0xf4e   : > { %4704 = vmatmul.mubr.msk.bf16.vlgmr.msra.gmra.mrb[0].mxu0 %vm2741_vm9, %v2770_v29  ;;  %4712 = vmatmul.mubr.msk.bf16.vlgmr.msra.gmra.mrb[0].mxu1 %vm2741_vm9, %v2770_v29 }
 0xf4f   : > { %4716 = vmatpush3.bf16.msra.mxu0 %v5381_v28  ;;  %4719 = vmatprep.mubr.msk.bf16.mxu0 %vm6458_vm10, %v6457_v15 }
 0xf50   : > { %4717 = vmatprep.subr.bf16.mxu0 %v6457_v15  ;;  %4725 = vmatprep.mubr.msk.bf16.mxu1 %vm6458_vm10, %v6457_v15 }
 0xf53   : > { %4718 = vmatpush3.bf16.msra.mxu0 %v5382_v23 }
 0xf54   : > { %4729 = vmatprep.subr.bf16.mxu0 %v6457_v15 }
 0xf56   : > { %4720 = vmatmul.mubr.msk.bf16.vlgmr.msra.gmra.mrb[4].mxu0 %vm2741_vm9, %v2770_v29 }
 0xf57   : > { %4731 = vmatprep.mubr.msk.bf16.mxu0 %vm6458_vm10, %v6457_v15 }
0x1021   : > { %v2824_v30 = vpop.f32.mrb[0].mxu0  ;;  %v2880_v32 = vpop.f32.mrb[0].mxu1 }
0x1022   : > { %v2943_v33 = vpack.c.bf16 %v2880_v32, %v2880_v32  ;;  %v4705_v34 = vpop.f32.mrb[1].mxu0  ;;  %v4713_v35 = vpop.f32.mrb[1].mxu1  ;;  %v2942_v41 = vpack.c.bf16 %v2824_v30, %v2824_v30 }
0x1023   : > { %v2827_v36 = vpop.f32.mrb[2].mxu0  ;;  %v2883_v37 = vpop.f32.mrb[2].mxu1 }
0x1024   : > { %3175 = vrot.lane.b32.xlu0 %v2943_v33, %s6459_s29  ;;  %3057 = vrot.lane.b32.xlu1 %v2943_v33, %s6460_s0  ;;  %v4706_v38 = vpop.f32.mrb[3].mxu0  ;;  %v4714_v39 = vpop.f32.mrb[3].mxu1  ;;  %v2950_v40 = vsel %vm2945_vm11, %v2943_v33, 0 }
0x1025   : > { %4724 = vmatpush3.bf16.xpose.msra.mxu1 %v2950_v40 }
0x1026   : > { %4735 = vmatprep.subr.bf16.mxu1 %v6457_v15 }
0x1028   : > { %3054 = vrot.lane.b32.xlu1 %v2942_v41, %s6460_s0 }
0x1029   : > { %v2936_v42 = vpop.f32.mrb[4].mxu0 }
0x102a   : > { %v8196_v43 = vpack.c.bf16 %v2936_v42, %v2936_v42  ;;  %v4721_v44 = vpop.f32.mrb[5].mxu0 }
0x102b   : > { %v2939_v45 = vpop.f32.mrb[6].mxu0 }
0x102c   : > { %3173 = vrot.lane.b32.xlu1 %v2942_v41, %s6459_s29  ;;  %v4722_v46 = vpop.f32.mrb[7].mxu0  ;;  %4726 = vmatmul.mubr.msk.bf16.vlgmr.msra.gmra.mrb[4].mxu1 %vm2945_vm11, %v2942_v41  ;;  %v3010_v47 = vsel %vm3008_vm12, %v8196_v43, 0 }
0x102d   : > { %4730 = vmatpush3.bf16.msra.mxu0 %v3010_v47  ;;  %4737 = vmatprep.mubr.msk.bf16.mxu1 %vm6458_vm10, %v6457_v15 }
0x102e   : > { %4741 = vmatprep.subr.bf16.mxu0 %v6457_v15 }
0x1030   : > { %3292 = vrot.lane.b32.xlu1 %v2943_v33, %s6461_s12 }
0x1034   : > { %3290 = vrot.lane.b32.xlu1 %v2942_v41, %s6461_s12 }
0x1096   : > { %v3058_v48 = vpop.permute.xlu1 %3057  ;;  %v3176_v51 = vpop.permute.xlu0 %3175 }
0x1097   : > { %v3063_v49 = vsel %vm2945_vm11, %v3058_v48, 0  ;;  %v3181_v53 = vsel %vm2945_vm11, %v3176_v51, 0 }
0x1098   : > { %4736 = vmatpush3.bf16.xpose.msra.mxu1 %v3063_v49 }
0x1099   : > { %4747 = vmatprep.subr.bf16.mxu1 %v6457_v15 }
0x109a   : > { %v3055_v50 = vpop.permute.xlu1 %3054 }
0x109e   : > { %v3174_v52 = vpop.permute.xlu1 %3173 }
0x109f   : > { %4738 = vmatmul.mubr.msk.bf16.vlgmr.msra.gmra.mrb[8].mxu1 %vm2945_vm11, %v3055_v50 }
0x10a0   : > { %4748 = vmatpush3.bf16.xpose.msra.mxu1 %v3181_v53  ;;  %4749 = vmatprep.mubr.msk.bf16.mxu1 %vm6458_vm10, %v6457_v15 }
0x10a1   : > { %4759 = vmatprep.subr.bf16.mxu1 %v6457_v15 }
0x10a2   : > { %v3293_v54 = vpop.permute.xlu1 %3292 }
0x10a3   : > { %v3298_v55 = vsel %vm2945_vm11, %v3293_v54, 0 }
0x10a6   : > { %v3291_v31 = vpop.permute.xlu1 %3290 }
0x10a7   : > { %4750 = vmatmul.mubr.msk.bf16.vlgmr.msra.gmra.mrb[12].mxu1 %vm2945_vm11, %v3174_v52 }
0x10a8   : > { %4760 = vmatpush3.bf16.xpose.msra.mxu1 %v3298_v55  ;;  %4761 = vmatprep.mubr.msk.bf16.mxu1 %vm6458_vm10, %v6457_v15 }
0x10a9   : > { %4771 = vmatprep.subr.bf16.mxu1 %v6457_v15 }
0x10af   : > { %4762 = vmatmul.mubr.msk.bf16.vlgmr.msra.gmra.mrb[16].mxu1 %vm2945_vm11, %v3291_v31 }
0x10b0   : > { %4775 = vmatprep.mubr.msk.bf16.mxu1 %vm6458_vm10, %v6457_v15 }
0x10ff   : > { %v2986_v56 = vpop.f32.mrb[4].mxu1 }
0x1100   : > { %v2992_v57 = vmul.f32 0.35355338, %v2986_v56  ;;  %v4727_v58 = vpop.f32.mrb[5].mxu1 }
0x1101   : > { %v2989_v59 = vpop.f32.mrb[6].mxu1 }
0x1102   : > { %v4728_v60 = vpop.f32.mrb[7].mxu1  ;;  %v2993_v61 = vsel %vm2945_vm11, %v2992_v57, -inf }
0x1103   : > { %2994 = vmax.xlane.f32.xlu1 %v2993_v61 }
0x1172   : > { %v3099_v62 = vpop.f32.mrb[8].mxu1 }
0x1173   : > { %v3105_v63 = vmul.f32 0.35355338, %v3099_v62  ;;  %v4739_v0 = vpop.f32.mrb[9].mxu1 }
0x1174   : > { %v3102_v1 = vpop.f32.mrb[10].mxu1 }
0x1175   : > { %v4740_v2 = vpop.f32.mrb[11].mxu1  ;;  %v3106_v3 = vsel %vm2945_vm11, %v3105_v63, -inf }
0x1176   : > { %3107 = vmax.xlane.f32.xlu0 %v3106_v3 }
0x117a   : > { %v3217_v4 = vpop.f32.mrb[12].mxu1 }
0x117b   : > { %v3223_v5 = vmul.f32 0.35355338, %v3217_v4  ;;  %v4751_v7 = vpop.f32.mrb[13].mxu1 }
0x117c   : > { %v3220_v8 = vpop.f32.mrb[14].mxu1 }
0x117d   : > { %v4752_v9 = vpop.f32.mrb[15].mxu1  ;;  %v3224_v10 = vsel %vm2945_vm11, %v3223_v5, -inf }
0x117e   : > { %3225 = vmax.xlane.f32.xlu1 %v3224_v10  ;;  %v5383_v9 = vld [vmem:[%s9216_s8] sm:$0xff]   ;;  %v5384_v10 = vld [vmem:[%s9217_s25 + $0x8] sm:$0xff]  }
0x117f   : > { %4772 = vmatpush3.bf16.msra.mxu1 %v5383_v9 }
0x1180   : > { %4773 = vmatprep.subr.bf16.mxu1 %v6457_v15 }
0x1182   : > { %v3334_v11 = vpop.f32.mrb[16].mxu1 }
0x1183   : > { %v3340_v12 = vmul.f32 0.35355338, %v3334_v11  ;;  %v4763_v13 = vpop.f32.mrb[17].mxu1  ;;  %4774 = vmatpush3.bf16.msra.mxu1 %v5384_v10 }
0x1184   : > { %v3337_v14 = vpop.f32.mrb[18].mxu1  ;;  %4787 = vmatprep.subr.bf16.mxu1 %v6457_v15 }
0x1185   : > { %v4764_v16 = vpop.f32.mrb[19].mxu1  ;;  %v3341_v17 = vsel %vm2945_vm11, %v3340_v12, -inf }
0x1186   : > { %3342 = vmax.xlane.f32.xlu1 %v3341_v17 }
0x1190   : > { %v2995_v18 = vpop.xlane.xlu1 %2994 }
0x1191   : > { %v2996_v19 = vsub.f32 %v2992_v57, %v2995_v18 }
0x1193   : > { %v2997_v20 = vmul.f32 1.442695, %v2996_v19 }
0x1195   : > { %5393 = vpow2.f32 %v2997_v20 }
0x119f   : > { %v5394_v21 = vpop.eup %5393 }
0x11a0   : > { %v2999_v22 = vsel %vm2945_vm11, %v5394_v21, 0.0 }
0x11a1   : > { %3000 = vadd.xlane.f32.xlu0 %v2999_v22 }
0x1203   : > { %v3108_v24 = vpop.xlane.xlu0 %3107 }
0x1204   : > { %v3109_v25 = vsub.f32 %v3105_v63, %v3108_v24 }
0x1206   : > { %v3110_v26 = vmul.f32 1.442695, %v3109_v25 }
0x1208   : > { %5395 = vpow2.f32 %v3110_v26 }
0x120b   : > { %v3226_v27 = vpop.xlane.xlu1 %3225 }
0x120c   : > { %v3227_v28 = vsub.f32 %v3223_v5, %v3226_v27 }
0x120e   : > { %v3228_v29 = vmul.f32 1.442695, %v3227_v28 }
0x1210   : > { %5397 = vpow2.f32 %v3228_v29 }
0x1212   : > { %v5396_v23 = vpop.eup %5395 }
0x1213   : > { %v3112_v30 = vsel %vm2945_vm11, %v5396_v23, 0.0  ;;  %v3343_v35 = vpop.xlane.xlu1 %3342 }
0x1214   : > { %3113 = vadd.xlane.f32.xlu1 %v3112_v30  ;;  %v3344_v36 = vsub.f32 %v3340_v12, %v3343_v35  ;;  %v5388_v35 = vld [vmem:[%s9225_s17 + $0x8] sm:$0xff]  }
0x1216   : > { %v3345_v37 = vmul.f32 1.442695, %v3344_v36 }
0x121a   : > { %v5398_v32 = vpop.eup %5397 }
0x121b   : > { %v3230_v33 = vsel %vm2945_vm11, %v5398_v32, 0.0 }
0x121c   : > { %3231 = vadd.xlane.f32.xlu0 %v3230_v33  ;;  %v5386_v33 = vld [vmem:[%s9221_s19] sm:$0xff]  }
0x1225   : > { %3236 = vrot.lane.b32.xlu1 %v8196_v43, %s6459_s29 }
0x122e   : > { %v3001_v34 = vpop.xlane.xlu0 %3000 }
0x122f   : > { %5399 = vrcp.f32 %v3001_v34  ;;  %v5387_v34 = vld [vmem:[%s9224_s3 + $0x8] sm:$0xff]  }
0x1230   : > { %5401 = vpow2.f32 %v3345_v37 }
0x1232   : > { %3119 = vrot.lane.b32.xlu0 %v8196_v43, %s6460_s0 }
0x1239   : > { %v5400_v38 = vpop.eup %5399 }
0x123a   : > { %v3003_v39 = vmul.f32 %v5400_v38, %v5394_v21  ;;  %v5402_v41 = vpop.eup %5401 }
0x123b   : > { %v3347_v42 = vsel %vm2945_vm11, %v5402_v41, 0.0 }
0x123c   : > { %v3004_v40 = vpack.c.bf16 %v3003_v39, %v3003_v39 }
0x123e   : > { %4732 = vmatmul.mubr.msk.bf16.vlgmr.msra.gmra.mrb[8].mxu0 %vm2945_vm11, %v3004_v40  ;;  %v4523_v40 = vld [vmem:[%s9222_s11] ss:$0 sm:$0xff] }
0x123f   : > { %4743 = vmatprep.mubr.msk.bf16.mxu0 %vm6458_vm10, %v6457_v15 }
0x1249   : > { %3348 = vadd.xlane.f32.xlu1 %v3347_v42  ;;  %v4524_v42 = vld [vmem:[%s9223_s10] ss:$0 sm:$0xff] }
0x125a   : > { %3353 = vrot.lane.b32.xlu1 %v8196_v43, %s6461_s12 }
0x12a1   : > { %v3114_v44 = vpop.xlane.xlu1 %3113 }
0x12a2   : > { %5403 = vrcp.f32 %v3114_v44 }
0x12a5   : > { %v3237_v50 = vpop.permute.xlu1 %3236 }
0x12a6   : > { %v3242_v52 = vsel %vm3008_vm12, %v3237_v50, 0 }
0x12a9   : > { %v3232_v45 = vpop.xlane.xlu0 %3231 }
0x12aa   : > { %5405 = vrcp.f32 %v3232_v45 }
0x12ac   : > { %v5404_v46 = vpop.eup %5403 }
0x12ad   : > { %v3116_v47 = vmul.f32 %v5404_v46, %v5396_v23  ;;  %v3120_v48 = vpop.permute.xlu0 %3119 }
0x12ae   : > { %v3125_v49 = vsel %vm3008_vm12, %v3120_v48, 0  ;;  %v5390_v48 = vld [vmem:[%s9229_s26 + $0x8] sm:$0xff]  }
0x12af   : > { %4742 = vmatpush3.bf16.msra.mxu0 %v3125_v49  ;;  %v3117_v51 = vpack.c.bf16 %v3116_v47, %v3116_v47  ;;  %v5389_v47 = vld [vmem:[%s9228_s13] sm:$0xff]  }
0x12b0   : > { %4753 = vmatprep.subr.bf16.mxu0 %v6457_v15  ;;  %v4529_v49 = vld [vmem:[%s9227_s21] ss:$0 sm:$0xff] }
0x12b2   : > { %4744 = vmatmul.mubr.msk.bf16.vlgmr.msra.gmra.mrb[12].mxu0 %vm2945_vm11, %v3117_v51 }
0x12b3   : > { %4754 = vmatpush3.bf16.msra.mxu0 %v3242_v52  ;;  %4755 = vmatprep.mubr.msk.bf16.mxu0 %vm6458_vm10, %v6457_v15 }
0x12b4   : > { %v5406_v43 = vpop.eup %5405  ;;  %4765 = vmatprep.subr.bf16.mxu0 %v6457_v15 }
0x12b5   : > { %v3234_v53 = vmul.f32 %v5406_v43, %v5398_v32 }
0x12b7   : > { %v3235_v54 = vpack.c.bf16 %v3234_v53, %v3234_v53 }
0x12ba   : > { %4756 = vmatmul.mubr.msk.bf16.vlgmr.msra.gmra.mrb[16].mxu0 %vm2945_vm11, %v3235_v54 }
0x12bb   : > { %4767 = vmatprep.mubr.msk.bf16.mxu0 %vm6458_vm10, %v6457_v15 }
0x12d6   : > { %v3349_v55 = vpop.xlane.xlu1 %3348 }
0x12d7   : > { %5407 = vrcp.f32 %v3349_v55 }
0x12da   : > { %v3354_v31 = vpop.permute.xlu1 %3353 }
0x12db   : > { %v3359_v56 = vsel %vm3008_vm12, %v3354_v31, 0 }
0x12dc   : > { %4766 = vmatpush3.bf16.msra.mxu0 %v3359_v56 }
0x12dd   : > { %4779 = vmatprep.subr.bf16.mxu0 %v6457_v15 }
0x12e1   : > { %v5408_v57 = vpop.eup %5407 }
0x12e2   : > { %v3351_v58 = vmul.f32 %v5408_v57, %v5402_v41 }
0x12e4   : > { %v3352_v59 = vpack.c.bf16 %v3351_v58, %v3351_v58 }
0x12e6   : > { %4768 = vmatmul.mubr.msk.bf16.vlgmr.msra.gmra.mrb[20].mxu0 %vm2945_vm11, %v3352_v59  ;;  %v4525_v59 = vld [vmem:[%s9230_s18] ss:$0 sm:$0xff] }
0x12e7   : > { %4783 = vmatprep.mubr.msk.bf16.mxu0 %vm6458_vm10, %v6457_v15 }
0x1311   : > { %v3046_v60 = vpop.f32.mrb[8].mxu0 }
0x1312   : > { %3052 = vst.msk [vmem:[#allocation3] sm:$0xff] %vm2945_vm11, %v3046_v60  ;;  %v4733_v61 = vpop.f32.mrb[9].mxu0 }
0x1313   : > { %v3049_v62 = vpop.f32.mrb[10].mxu0 }
0x1314   : > { %v4734_v63 = vpop.f32.mrb[11].mxu0 }
0x1385   : > { %v3161_v0 = vpop.f32.mrb[12].mxu0 }
0x1386   : > { %3168 = vrot.lane.b32.xlu0 %v3161_v0, %s6462_s16  ;;  %v4745_v1 = vpop.f32.mrb[13].mxu0 }
0x1387   : > { %v3164_v2 = vpop.f32.mrb[14].mxu0  ;;  %v4533_v1 = vld [vmem:[%s9231_s2] ss:$0 sm:$0xff] }
0x1388   : > { %v4746_v3 = vpop.f32.mrb[15].mxu0 }
0x138d   : > { %v3278_v4 = vpop.f32.mrb[16].mxu0 }
0x138e   : > { %3285 = vrot.lane.b32.xlu1 %v3278_v4, %s6463_s9  ;;  %v4757_v5 = vpop.f32.mrb[17].mxu0 }
0x138f   : > { %v3281_v7 = vpop.f32.mrb[18].mxu0 }
0x1390   : > { %v4758_v8 = vpop.f32.mrb[19].mxu0 }
0x13b9   : > { %v3395_v11 = vpop.f32.mrb[20].mxu0 }
0x13ba   : > { %3402 = vrot.lane.b32.xlu0 %v3395_v11, %s6464_s6  ;;  %v4769_v12 = vpop.f32.mrb[21].mxu0 }
0x13bb   : > { %v3398_v13 = vpop.f32.mrb[22].mxu0 }
0x13bc   : > { %v4770_v14 = vpop.f32.mrb[23].mxu0 }
0x13f8   : > { %v3169_v16 = vpop.permute.xlu0 %3168 }
0x13f9   : > { %3172 = vst.msk [vmem:[#allocation3] sm:$0xff] %vm3171_vm13, %v3169_v16 }
0x1400   : > { %v3286_v17 = vpop.permute.xlu1 %3285 }
0x1401   : > { %3289 = vst.msk [vmem:[#allocation3] sm:$0xff] %vm3288_vm14, %v3286_v17 }
0x142c   : > { %v3403_v18 = vpop.permute.xlu0 %3402 }
0x142d   : > { %3406 = vst.msk [vmem:[#allocation3] sm:$0xff] %vm3405_vm15, %v3403_v18 }
0x1434   : > { %v3407_v19 = vld [vmem:[#allocation3] sm:$0xff] }
0x1435   : > { %v3408_v20 = vpack.c.bf16 %v3407_v19, %v3407_v19 }
0x1437   : > { %4776 = vmatmul.mubr.msk.bf16.vlgmr.msra.gmra.mrb[20].mxu1 %vm2741_vm9, %v3408_v20 }
0x1438   : > { %4791 = vmatprep.mubr.msk.bf16.mxu1 %vm6458_vm10, %v6457_v15  ;;  %4788 = vmatpush3.bf16.msra.mxu1 %v5386_v33 }
0x1439   : > { %4789 = vmatprep.subr.bf16.mxu1 %v6457_v15 }
0x143c   : > { %4790 = vmatpush3.bf16.msra.mxu1 %v5388_v35 }
0x150a   : > { %v3462_v21 = vpop.f32.mrb[20].mxu1 }
0x150b   : > { %v8265_v22 = vadd.f32 %v3462_v21, %v8150_v6  ;;  %v4777_v24 = vpop.f32.mrb[21].mxu1  ;;  %v5385_v6 = vld [vmem:[%s9220_s5] sm:$0xff]  }
0x150c   : > { %v3465_v25 = vpop.f32.mrb[22].mxu1  ;;  %4780 = vmatpush3.bf16.msra.mxu0 %v5385_v6 }
0x150d   : > { %v4778_v26 = vpop.f32.mrb[23].mxu1  ;;  %v3471_v27 = vsel %vm2741_vm9, %v8265_v22, 0.0  ;;  %4781 = vmatprep.subr.bf16.mxu0 %v6457_v15 }
0x150e   : > { %3472 = vadd.xlane.f32.xlu1 %v3471_v27 }
0x1510   : > { %4782 = vmatpush3.bf16.msra.mxu0 %v5387_v34 }
0x1511   : > { %4795 = vmatprep.subr.bf16.mxu0 %v6457_v15 }
0x159b   : > { %v3473_v28 = vpop.xlane.xlu1 %3472 }
0x159c   : > { %v3474_v29 = vmul.f32 0.03125, %v3473_v28 }
0x159e   : > { %v3475_v23 = vsub.f32 %v8265_v22, %v3474_v29 }
0x15a0   : > { %v3476_v30 = vmul.f32 %v3475_v23, %v3475_v23 }
0x15a2   : > { %v3477_v32 = vsel %vm2741_vm9, %v3476_v30, 0.0 }
0x15a3   : > { %3478 = vadd.xlane.f32.xlu0 %v3477_v32 }
0x1630   : > { %v3479_v36 = vpop.xlane.xlu0 %3478 }
0x1631   : > { %v3480_v37 = vmul.f32 0.03125, %v3479_v36 }
0x1633   : > { %v3481_v38 = vadd.f32 1e-05, %v3480_v37 }
0x1635   : > { %5409 = vrsqrt.f32 %v3481_v38 }
0x163f   : > { %v5410_v39 = vpop.eup %5409 }
0x1640   : > { %v3483_v41 = vmul.f32 %v5410_v39, %v3475_v23 }
0x1642   : > { %v3490_v44 = vmul.f32 %v4523_v40, %v3483_v41 }
0x1644   : > { %v3497_v45 = vadd.f32 %v4524_v42, %v3490_v44 }
0x1646   : > { %v3498_v46 = vpack.c.bf16 %v3497_v45, %v3497_v45 }
0x1648   : > { %4784 = vmatmul.mubr.msk.bf16.vlgmr.msra.gmra.mrb[24].mxu0 %vm2741_vm9, %v3498_v46  ;;  %4792 = vmatmul.mubr.msk.bf16.vlgmr.msra.gmra.mrb[24].mxu1 %vm2741_vm9, %v3498_v46 }
0x1649   : > { %4799 = vmatprep.mubr.msk.bf16.mxu0 %vm6458_vm10, %v6457_v15  ;;  %4796 = vmatpush3.bf16.msra.mxu0 %v5389_v47 }
0x164a   : > { %4797 = vmatprep.subr.bf16.mxu0 %v6457_v15 }
0x164d   : > { %4798 = vmatpush3.bf16.msra.mxu0 %v5390_v48 }
0x171b   : > { %v3559_v50 = vpop.f32.mrb[24].mxu0  ;;  %v3622_v51 = vpop.f32.mrb[24].mxu1 }
0x171c   : > { %v3623_v52 = vadd.f32 %v4529_v49, %v3622_v51  ;;  %v4785_v43 = vpop.f32.mrb[25].mxu0  ;;  %v4793_v53 = vpop.f32.mrb[25].mxu1  ;;  %v3560_v61 = vadd.f32 %v4525_v59, %v3559_v50 }
0x171d   : > { %v3562_v54 = vpop.f32.mrb[26].mxu0  ;;  %v3625_v55 = vpop.f32.mrb[26].mxu1 }
0x171e   : > { %v3630_v31 = vmul.f32 0.70710677, %v3623_v52  ;;  %v4786_v56 = vpop.f32.mrb[27].mxu0  ;;  %v4794_v57 = vpop.f32.mrb[27].mxu1  ;;  %v3628_v15 = vmul.f32 0.5, %v3623_v52 }
0x1720   : > { %5411 = verf.f32 %v3630_v31 }
0x172a   : > { %v5412_v58 = vpop.eup %5411 }
0x172b   : > { %v3632_v60 = vadd.f32 1.0, %v5412_v58 }
0x172d   : > { %v3633_v62 = vmul.f32 %v3632_v60, %v3628_v15 }
0x172f   : > { %v3634_v63 = vmul.f32 %v3633_v62, %v3560_v61 }
0x1731   : > { %v3635_v0 = vpack.c.bf16 %v3634_v63, %v3634_v63 }
0x1733   : > { %4800 = vmatmul.mubr.msk.bf16.vlgmr.msra.gmra.mrb[28].mxu0 %vm2741_vm9, %v3635_v0 }
0x1805   : > { %3705 = sbr.rel (%p8037_p12) target bundleno = 6179 (0x1823), region = 220 }
0x1806   : > { %v3696_v2 = vpop.f32.mrb[28].mxu0 }
0x1807   : > { %v3697_v3 = vadd.f32 %v4533_v1, %v3696_v2  ;;  %v4801_v4 = vpop.f32.mrb[29].mxu0 }
0x1808   : > { %v3699_v5 = vpop.f32.mrb[30].mxu0 }
0x1809   : > { %v3702_v7 = vadd.f32 %v3697_v3, %v8265_v22  ;;  %v4802_v8 = vpop.f32.mrb[31].mxu0 }
0x180b   : > { %3703 = vst.msk [vmem:[#allocation2] sm:$0xff] %vm2741_vm9, %v3702_v7 }
0x1812   : > { %v3706_v9 = vld [vmem:[#allocation2] sm:$0xff] }
0x1813   : > { %3707 = vst.msk [vmem:[%s8050_s20] sm:$0xff] %vm2741_vm9, %v3706_v9  ;;  %v3708_v10 = vsel %vm2741_vm9, %v3706_v9, 0.0 }
0x1814   : > { %v3709_v11 = vrot.slane %v3708_v10, 4 }
0x1816   : > { %v3710_v12 = vadd.f32 %v3709_v11, %v3708_v10 }
0x1818   : > { %v3711_v13 = vrot.slane %v3710_v12, 2 }
0x181a   : > { %v3712_v14 = vadd.f32 %v3711_v13, %v3710_v12 }
0x181c   : > { %v3713_v16 = vrot.slane %v3712_v14, 1 }
0x181e   : > { %v3714_v17 = vadd.f32 %v3713_v16, %v3712_v14 }
0x1820   : > { %v3716_v18 = vmul.f32 0.125, %v3714_v17 }
0x1822   : > { %3718 = vst.msk [vmem:[%s1921_s23] sm:$0x1] %vm3717_vm0, %v3716_v18 }
0x1823 PF: > { %s9232_s28 = sld [smem:[#allocation142_spill]]  ;;  %s9233_s7 = sld [smem:[#allocation99_spill]] }
0x1824   : > { %s9235_s1 = sld [smem:[#allocation180_spill]]  ;;  %s3737_s0 = sshll.u32 %s8050_s20, 4  ;;  %s3738_s0 = int_to_ptr.vmem [resolvable:$true] %s3737_s0 }
0x1825   : > { %s3720_s12 = scalar_lea.sflag [#allocation11], %s7956_s30  ;;  %s5857_s24 = scalar_lea.vmem %s3738_s0, 128 }
0x1826   : > { %p5858_p8 = scmp.ne.s32.totalorder %s3738_s0, %s5857_s24  ;;  %s6465_s16 = smov [#allocation33]  }
0x1827   : > { %s5861_s9 = sshll.u32 %s6465_s16, 4  ;;  %s5862_s9 = int_to_ptr.vmem [resolvable:$false] %s5861_s9 }
0x1828   : > { %s5863_s8 = scalar_lea.vmem %s5862_s9, 256  ;;  %p5864_p5 = scmp.lt.s32.totalorder %s3738_s0, %s5862_s9 }
0x1829   : > { %s9234_s22 = smov %s9233_s7  ;;  %s4538_s4 = sshll.u32 %s9232_s28, 7 }
0x182a   : > { %s8308_s29 = scalar_lea.hbm %s9233_s7, %s4538_s4  ;;  %p9236_p13 = scmp.ne.s32.totalorder %s9235_s1, 0 }
0x182b   : > { %p5865_p1 = scmp.lt.s32.totalorder %s5863_s8, %s5857_s24 }
0x182c   : > { %p5859_p6 = pnand %p5858_p8, %p9236_p13 }
0x182d   : > { %p5866_p7 = por %p5865_p1, %p5864_p5 }
0x182e   : > { %p5860_p0 = pneg %p5859_p6 }
0x1830   : > { %p5867_p4 = pnand %p5866_p7, %p5860_p0 }
0x1832   : > { %5870 = shalt.err (!%p5867_p4)
}
0x1833   : > { %s5871_s20 = scalar_lea.hbm %s8308_s29, 128  ;;  %s5875_s25 = scalar_lea.hbm %s9234_s22, 256 }
0x1834   : > { %p5872_p12 = scmp.ne.s32.totalorder %s8308_s29, %s5871_s20  ;;  %p5876_p9 = scmp.lt.u32.totalorder %s8308_s29, %s9234_s22 }
0x1835   : > { %p5877_p10 = scmp.lt.u32.totalorder %s5875_s25, %s5871_s20  ;;  %p5879_p8 = scmp.lt.u32.totalorder %s5871_s20, %s8308_s29 }
0x1836   : > { %p5873_p2 = pnand %p5872_p12, %p9236_p13 }
0x1837   : > { %p5878_p3 = por %p5877_p10, %p5876_p9 }
0x1838   : > { %p5874_p11 = pneg %p5873_p2 }
0x1839   : > { %p5880_p6 = por %p5879_p8, %p5878_p3 }
0x183b   : > { %p5881_p0 = pnand %p5880_p6, %p5874_p11 }
0x183d   : > { %5884 = shalt.err (!%p5881_p0)
}
0x183e   : > { %s9237_s6 = sld [smem:[#allocation100_spill]]  ;;  %s4539_s15 = sshll.u32 %s9232_s28, 4 }
0x183f   : > { %4863 = dma.vmem_to_hbm [thread:$0]  (%p9236_p13), %s3738_s0, 128, %s8308_s29, %s3720_s12  }
0x1840   : > { %s3750_s14 = sshll.u32 %s1921_s23, 4  ;;  %s3725_s19 = scalar_lea.sflag [#allocation35], %s7956_s30  ;;  %s3751_s14 = int_to_ptr.vmem [resolvable:$true] %s3750_s14 }
0x1841   : > { %s5885_s11 = scalar_lea.vmem %s3751_s14, 16  ;;  %s6466_s10 = smov [#allocation34]  }
0x1842   : > { %p5886_p5 = scmp.ne.s32.totalorder %s3751_s14, %s5885_s11  ;;  %s5889_s3 = sshll.u32 %s6466_s10, 4  ;;  %s5890_s3 = int_to_ptr.vmem [resolvable:$false] %s5889_s3 }
0x1843   : > { %s5891_s17 = scalar_lea.vmem %s5890_s3, 32  ;;  %p5892_p4 = scmp.lt.s32.totalorder %s3751_s14, %s5890_s3 }
0x1844   : > { %s8329_s5 = scalar_lea.hbm %s9237_s6, %s4539_s15  ;;  %p5887_p1 = pnand %p5886_p5, %p9236_p13 }
0x1845   : > { %p5893_p12 = scmp.lt.s32.totalorder %s5891_s17, %s5885_s11 }
0x1846   : > { %p5888_p7 = pneg %p5887_p1 }
0x1847   : > { %p5894_p2 = por %p5893_p12, %p5892_p4 }
0x1849   : > { %p5895_p11 = pnand %p5894_p2, %p5888_p7 }
0x184b   : > { %5898 = shalt.err (!%p5895_p11)
}
0x184c   : > { %s5899_s30 = scalar_lea.hbm %s8329_s5, 16  ;;  %s5903_s23 = scalar_lea.hbm %s9237_s6, 32 }
0x184d   : > { %p5900_p9 = scmp.ne.s32.totalorder %s8329_s5, %s5899_s30  ;;  %p5904_p8 = scmp.lt.u32.totalorder %s8329_s5, %s9237_s6 }
0x184e   : > { %p5905_p6 = scmp.lt.u32.totalorder %s5903_s23, %s5899_s30  ;;  %p5907_p5 = scmp.lt.u32.totalorder %s5899_s30, %s8329_s5 }
0x184f   : > { %p5901_p10 = pnand %p5900_p9, %p9236_p13 }
0x1850   : > { %p5906_p0 = por %p5905_p6, %p5904_p8 }
0x1851   : > { %p5902_p3 = pneg %p5901_p10 }
0x1852   : > { %p5908_p1 = por %p5907_p5, %p5906_p0 }
0x1854   : > { %p5909_p7 = pnand %p5908_p1, %p5902_p3 }
0x1856   : > { %5912 = shalt.err (!%p5909_p7)
}
0x1857   : > { %4864 = dma.vmem_to_hbm [thread:$0]  (%p9236_p13), %s3751_s14, 16, %s8329_s5, %s3725_s19  }
0x1858 PF: > { %s9238_s7 = sld [smem:[#allocation146_spill]]  ;;  %s9240_s21 = sld [smem:[#allocation101_spill]] }
0x1859   : > { %s9241_s13 = sld [smem:[#allocation181_spill]] }
0x185e   : > { %s9239_s27 = smov %s9238_s7  ;;  %p4880_p4 = scmp.ge.s32.totalorder %s9238_s7, 2 }
0x185f   : > { %s3762_s26 = sand.u32 1, %s9240_s21   ;;  %p9242_p12 = scmp.ne.s32.totalorder %s9241_s13, 0 }
0x1860   : > { %s3763_s18 = scalar_lea.sflag [#allocation11], %s3762_s26 }
0x1861   : > { %p4872_p2 = pnand %p4880_p4, %p9242_p12 }
0x1863   : > { %6184 = dma.done.wait (!%p4872_p2), %s3763_s18, 128  }
0x1864   : > { %6186 = vsyncadd (!%p4872_p2), %s3763_s18, 4294967168  ;;  %s3772_s2 = scalar_lea.sflag [#allocation35], %s3762_s26 }
0x1865   : > { %6188 = dma.done.wait (!%p4872_p2), %s3772_s2, 16  }
0x1866   : > { %6190 = vsyncadd (!%p4872_p2), %s3772_s2, 4294967280  ;;  %s8702_s0 = sadd.s32 1, %s9239_s27  }
0x1867   : > { %s9243_s28 = sld [smem:[#allocation102_spill]]  ;;  %s9244_s3 = sld [smem:[#allocation103_spill]] }
0x1868   : > { %s9245_s1 = sld [smem:[#allocation179_spill]]  ;;  %s9246_s2 = sld [smem:[#allocation105_spill]] }
0x1869   : > { %s9247_s29 = sld [smem:[#allocation106_spill]]  ;;  %s9248_s7 = sld [smem:[#allocation178_spill]] }
0x186a   : > { %s9249_s11 = sld [smem:[#allocation108_spill]]  ;;  %s9250_s14 = sld [smem:[#allocation109_spill]] }
0x186b   : > { %s9251_s15 = sld [smem:[#allocation177_spill]]  ;;  %s9252_s18 = sld [smem:[#allocation111_spill]] }
0x186c   : > { %s9253_s8 = sld [smem:[#allocation112_spill]]  ;;  %s9254_s4 = sld [smem:[#allocation175_spill]] }
0x186d   : > { %s9255_s26 = sld [smem:[#allocation114_spill]]  ;;  %s9256_s5 = sld [smem:[#allocation115_spill]] }
0x186e   : > { %s9257_s13 = sld [smem:[#allocation107_spill]]  ;;  %p8352_p13 = scmp.ge.s32.totalorder %s8702_s0, 10  }
0x186f   : > { %s9260_s9 = sld [smem:[#allocation117_spill]]  ;;  %s9262_s21 = sld [smem:[#allocation118_spill]] }
0x1870   : > { %s9258_s12 = scalar_select %p8352_p13, 1, 0 }
0x1871   : > { %9261 = sst [smem:[#allocation101_spill]] %s9243_s28  ;;  %s9263_s10 = sld [smem:[#allocation171_spill]] }
0x1872   : > { %9259 = sst [smem:[#allocation191_spill]] %s9258_s12  ;;  %s9264_s28 = smov %s9245_s1 }
0x1873   : > { %s9265_s23 = sld [smem:[#allocation120_spill]]  ;;  %s9266_s19 = sld [smem:[#allocation121_spill]] }
0x1874   : > { %s9267_s24 = sld [smem:[#allocation113_spill]]  ;;  %s9268_s16 = sld [smem:[#allocation123_spill]] }
0x1875   : > { %s9269_s20 = sld [smem:[#allocation131_spill]]  ;;  %s9270_s25 = sld [smem:[#allocation167_spill]] }
0x1876   : > { %s9271_s17 = sld [smem:[#allocation133_spill]]  ;;  %9272 = sst [smem:[#allocation102_spill]] %s9252_s18 }
0x1877   : > { %s9273_s30 = sld [smem:[#allocation132_spill]]  ;;  %9274 = sst [smem:[#allocation103_spill]] %s9253_s8 }
0x1878   : > { %s9275_s1 = sld [smem:[#allocation119_spill]]  ;;  %9276 = sst [smem:[#allocation104_spill]] %s9254_s4 }
0x1879   : > { %s9277_s0 = sld [smem:[#allocation124_spill]]  ;;  %9278 = sst [smem:[#allocation105_spill]] %s9255_s26 }
0x187a   : > { %s9279_s6 = sld [smem:[#allocation125_spill]]  ;;  %9280 = sst [smem:[#allocation106_spill]] %s9256_s5 }
0x187b   : > { %s9281_s22 = sld [smem:[#allocation164_spill]]  ;;  %9282 = sst [smem:[#allocation107_spill]] %s9257_s13 }
0x187c   : > { %s9283_s12 = sld [smem:[#allocation126_spill]]  ;;  %9284 = sst [smem:[#allocation108_spill]] %s9260_s9 }
0x187d   : > { %s9285_s27 = sld [smem:[#allocation127_spill]]  ;;  %9286 = sst [smem:[#allocation109_spill]] %s9262_s21 }
0x187e   : > { %s9287_s18 = sld [smem:[#allocation161_spill]]  ;;  %9288 = sst [smem:[#allocation110_spill]] %s9263_s10 }
0x187f   : > { %s9289_s8 = sld [smem:[#allocation135_spill]]  ;;  %s9291_s4 = sld [smem:[#allocation136_spill]] }
0x1880   : > { %9290 = sst [smem:[#allocation111_spill]] %s9265_s23  ;;  %s9293_s26 = sld [smem:[#allocation159_spill]] }
0x1881   : > { %9292 = sst [smem:[#allocation112_spill]] %s9266_s19  ;;  %s9295_s5 = sld [smem:[#allocation137_spill]] }
0x1882   : > { %9294 = sst [smem:[#allocation113_spill]] %s9267_s24  ;;  %s9297_s13 = sld [smem:[#allocation134_spill]] }
0x1883   : > { %9296 = sst [smem:[#allocation114_spill]] %s9268_s16  ;;  %s9299_s9 = sld [smem:[#allocation158_spill]] }
0x1884   : > { %9298 = sst [smem:[#allocation115_spill]] %s9269_s20  ;;  %s9301_s24 = sld [smem:[#allocation129_spill]] }
0x1885   : > { %9300 = sst [smem:[#allocation116_spill]] %s9270_s25  ;;  %s9303_s21 = sld [smem:[#allocation130_spill]] }
0x1886   : > { %9302 = sst [smem:[#allocation117_spill]] %s9271_s17  ;;  %s9305_s17 = sld [smem:[#allocation154_spill]] }
0x1887   : > { %9304 = sst [smem:[#allocation118_spill]] %s9273_s30  ;;  %s9307_s30 = sld [smem:[#allocation138_spill]] }
0x1888   : > { %9306 = sst [smem:[#allocation119_spill]] %s9275_s1  ;;  %s9309_s19 = sld [smem:[#allocation139_spill]] }
0x1889   : > { %9308 = sst [smem:[#allocation120_spill]] %s9277_s0  ;;  %s9311_s20 = sld [smem:[#allocation153_spill]] }
0x188a   : > { %9310 = sst [smem:[#allocation121_spill]] %s9279_s6  ;;  %s9313_s25 = sld [smem:[#allocation143_spill]] }
0x188b   : > { %9312 = sst [smem:[#allocation122_spill]] %s9281_s22  ;;  %s9315_s1 = sld [smem:[#allocation144_spill]] }
0x188c   : > { %9314 = sst [smem:[#allocation123_spill]] %s9283_s12  ;;  %s9317_s16 = sld [smem:[#allocation145_spill]] }
0x188d   : > { %9316 = sst [smem:[#allocation124_spill]] %s9285_s27  ;;  %s9319_s0 = sld [smem:[#allocation147_spill]] }
0x188e   : > { %9318 = sst [smem:[#allocation125_spill]] %s9287_s18  ;;  %s9321_s23 = sld [smem:[#allocation148_spill]] }
0x188f   : > { %9320 = sst [smem:[#allocation126_spill]] %s9289_s8  ;;  %s9323_s10 = sld [smem:[#allocation150_spill]] }
0x1890   : > { %9322 = sst [smem:[#allocation127_spill]] %s9291_s4  ;;  %s9332_s4 = smov %s9309_s19 }
0x1891   : > { %9324 = sst [smem:[#allocation128_spill]] %s9293_s26  ;;  %s9325_s6 = sld [smem:[#allocation146_spill]] }
0x1892   : > { %9326 = sst [smem:[#allocation129_spill]] %s9295_s5 }
0x1893   : > { %9328 = sst [smem:[#allocation130_spill]] %s9297_s13 }
0x1894   : > { %9329 = sst [smem:[#allocation131_spill]] %s9299_s9  ;;  %117 = sbr.rel (!%p8352_p13) target bundleno = 157 (0x9d), region = 464 }
0x1895   : > { %9330 = sst [smem:[#allocation132_spill]] %s9301_s24 }
0x1896   : > { %9331 = sst [smem:[#allocation133_spill]] %s9303_s21 }
0x1897   : > { %9333 = sst [smem:[#allocation134_spill]] %s9319_s0  ;;  %s9336_s9 = sadd.s32 1, %s9325_s6  }
0x1898   : > { %9334 = sst [smem:[#allocation135_spill]] %s9321_s23 }
0x1899   : > { %9335 = sst [smem:[#allocation136_spill]] %s9323_s10 }
0x189a   : > { %9337 = sst [smem:[#allocation137_spill]] %s9336_s9 }
0x189b   :  { %3776 = vsyncpa [#allocation10], 1 }
0x189c   :  { %3778 = vsyncpa [#allocation10 + $0x1], 1 }
0x189d   :  { %3779 = vsyncpa [#allocation13], 1 }
0x189e   :  { %3781 = vsyncpa [#allocation13 + $0x1], 1 }
0x189f   :  { %3782 = vsyncpa [#allocation16], 1 }
0x18a0   :  { %3784 = vsyncpa [#allocation16 + $0x1], 1 }
0x18a1   :  { %3785 = vsyncpa [#allocation19], 1 }
0x18a2   :  { %3787 = vsyncpa [#allocation19 + $0x1], 1 }
0x18a3   :  { %3788 = vsyncpa [#allocation22], 1 }
0x18a4   :  { %3790 = vsyncpa [#allocation22 + $0x1], 1 }
0x18a5   :  { %3791 = vsyncpa [#allocation25], 1 }
0x18a6   :  { %3793 = vsyncpa [#allocation25 + $0x1], 1 }
0x18a7   :  { %3794 = vsyncpa [#allocation28], 1 }
0x18a8   :  { %3796 = vsyncpa [#allocation28 + $0x1], 1 }
0x18a9   :  { %3797 = vsyncpa [#allocation31], 1 }
0x18aa   :  { %3799 = vsyncpa [#allocation31 + $0x1], 1 }
0x18ab   :  { %3800 = vsyncpa [#allocation11], 1 }
0x18ac   :  { %3802 = vsyncpa [#allocation11 + $0x1], 1 }
0x18ad   :  { %3803 = vsyncpa [#allocation35], 1 }
0x18ae   :  { %3805 = vsyncpa [#allocation35 + $0x1], 1 }

</bundles_post_ra>
